<compile_context>
chip_gen: v7x
topology: tpu7x:2x2x1
jax: 0.10.0
libtpu: 0.0.40
codegen_flags: <defaults>
</compile_context>

<pallas_src>
import math

import jax
import jax.numpy as jnp
from jax.experimental import pallas as pl
from jax.experimental.pallas import tpu as pltpu

_HIDDEN = 512  # num_h1 = num_h2 = num_h3 = 512, fixed by the module.


def _round_up(n, m):
    return ((n + m - 1) // m) * m


# --------------------------------------------------------------------------- #
# Kernel
# --------------------------------------------------------------------------- #
def _simulation_nn_kernel(
    x_ref,
    w1, b1, f1,                                   # fused policy+value layer 1
    pw2, pb2, pf2, pw3, pb3, pf3,                 # policy hidden layers 2-3
    vw2, vb2, vf2, vw3, vb3, vf3,                 # value  hidden layers 2-3
    w4p, w4v, b4, f4,                             # fused, lane-padded heads
    out_ref,
):
    x = x_ref[...]                      # (tb, S) f32
    t = x[:, 0:1]                       # task_indicator = x[:, 0].unsqueeze(-1)

    def film(y, f_ref):
        # f_ref: (4, feat) = [W_gamma, b_gamma, W_beta, b_beta] (embed dim == 1)
        f = f_ref[...]
        gamma = t * f[0:1, :] + f[1:2, :]
        beta = t * f[2:3, :] + f[3:4, :]
        return gamma * y + beta

    def hidden_layer(h, w_ref, b_ref, f_ref):
        y = jnp.dot(h, w_ref[...], preferred_element_type=jnp.float32)
        y = y + b_ref[...]
        return jnp.maximum(film(y, f_ref), 0.0)

    # Layer 1: both branches fused into a single (S, 2H) matmul.  (Note: the
    # full x, including the task indicator, feeds fc1 — exactly as in PyTorch.)
    h1 = hidden_layer(x, w1, b1, f1)              # (tb, 2H)
    hp = h1[:, :_HIDDEN]                          # lane-aligned split at 512
    hv = h1[:, _HIDDEN:]

    # Policy branch.
    hp = hidden_layer(hp, pw2, pb2, pf2)
    hp = hidden_layer(hp, pw3, pb3, pf3)

    # Value branch.
    hv = hidden_layer(hv, vw2, vb2, vf2)
    hv = hidden_layer(hv, vw3, vb3, vf3)

    # Fused final layer: columns [0, A) hold p_fc4/p_film4 (loc), column A holds
    # v_fc4/v_film4 (value), remaining pad columns have all-zero weights/bias/
    # FiLM params so they produce exact zeros.  One lane-dense (tb, 128) store.
    y = (jnp.dot(hp, w4p[...], preferred_element_type=jnp.float32)
         + jnp.dot(hv, w4v[...], preferred_element_type=jnp.float32)
         + b4[...])
    out_ref[...] = film(y, f4)


# --------------------------------------------------------------------------- #
# Parameter helpers
# --------------------------------------------------------------------------- #
def init_params(key, num_states, num_actions, hidden=_HIDDEN):
    """Deterministic example parameters (init scheme is not part of forward
    semantics; values are chosen to keep activations O(1) for the check).

    Linear weights are stored (in, out) (transposed vs torch), biases (out,),
    and each FiLM layer as a (4, feat) stack [W_gamma, b_gamma, W_beta, b_beta].
    """
    def linear(k, fan_in, fan_out):
        kw, kb = jax.random.split(k)
        w = jax.random.normal(kw, (fan_in, fan_out), jnp.float32) / math.sqrt(fan_in)
        b = 0.1 * jax.random.normal(kb, (fan_out,), jnp.float32)
        return w, b

    params = {}
    for branch, out_last in (("p", num_actions), ("v", 1)):
        dims = [(num_states, hidden), (hidden, hidden),
                (hidden, hidden), (hidden, out_last)]
        ws, bs, fs = [], [], []
        for fan_in, fan_out in dims:
            key, kl, kf = jax.random.split(key, 3)
            w, b = linear(kl, fan_in, fan_out)
            ws.append(w)
            bs.append(b)
            fs.append(0.5 * jax.random.normal(kf, (4, fan_out), jnp.float32))
        params[branch] = {"w": ws, "b": bs, "film": fs}
    return params


def _pack_operands(params, pad_width):
    """Flatten params into kernel operand order; fuse layer 1 and the heads."""
    H = params["p"]["w"][3].shape[0]
    A = params["p"]["w"][3].shape[1]

    # Layer 1: concatenate policy + value along the output (lane) axis.
    w1 = jnp.concatenate([params["p"]["w"][0], params["v"]["w"][0]], axis=1)
    b1 = jnp.concatenate([params["p"]["b"][0], params["v"]["b"][0]]).reshape(1, -1)
    f1 = jnp.concatenate([params["p"]["film"][0], params["v"]["film"][0]], axis=1)
    ops = [w1, b1, f1]

    # Layers 2-3 per branch.
    for branch in ("p", "v"):
        for li in (1, 2):
            ops += [
                params[branch]["w"][li],
                params[branch]["b"][li].reshape(1, -1),
                params[branch]["film"][li],
            ]

    # Fused, lane-padded heads.
    pw4, vw4 = params["p"]["w"][3], params["v"]["w"][3]
    pb4 = params["p"]["b"][3].reshape(1, -1)
    vb4 = params["v"]["b"][3].reshape(1, -1)
    pf4, vf4 = params["p"]["film"][3], params["v"]["film"][3]

    w4p = jnp.zeros((H, pad_width), jnp.float32).at[:, :A].set(pw4)
    w4v = jnp.zeros((H, pad_width), jnp.float32).at[:, A:A + 1].set(vw4)
    b4 = (jnp.zeros((1, pad_width), jnp.float32)
          .at[:, :A].set(pb4).at[:, A:A + 1].set(vb4))
    f4 = (jnp.zeros((4, pad_width), jnp.float32)
          .at[:, :A].set(pf4).at[:, A:A + 1].set(vf4))
    ops += [w4p, w4v, b4, f4]
    return ops, A


# --------------------------------------------------------------------------- #
# Wrapper
# --------------------------------------------------------------------------- #
def simulation_nn_forward(x, params, log_std, *, tile_b=512):
    """Pallas forward of SimulationNN.

    Returns (loc, scale, value) — the parameters of p_out = Normal(loc, scale)
    and the value head output v_out, matching the PyTorch forward.
    """
    x = jnp.asarray(x, jnp.float32)
    squeeze = x.ndim == 1
    if squeeze:
        x = x[None, :]
    B, S = x.shape

    A = params["p"]["w"][3].shape[1]
    pad_width = _round_up(A + 1, 128)                 # lane-dense fused width
    ops, _ = _pack_operands(params, pad_width)

    # Batch tiling: minimal-padding, 8-sublane-aligned tiles.
    n_tiles = pl.cdiv(B, tile_b)
    tb = _round_up(pl.cdiv(B, n_tiles), 8)
    Bp = tb * n_tiles
    xp = jnp.pad(x, ((0, Bp - B), (0, 0))) if Bp != B else x

    in_specs = [pl.BlockSpec((tb, S), lambda i: (i, 0))]
    # Weights: full-array blocks, constant index map -> stay VMEM-resident.
    in_specs += [pl.BlockSpec(p.shape, lambda i: (0, 0)) for p in ops]

    out = pl.pallas_call(
        _simulation_nn_kernel,
        out_shape=jax.ShapeDtypeStruct((Bp, pad_width), jnp.float32),
        grid=(n_tiles,),
        in_specs=in_specs,
        out_specs=pl.BlockSpec((tb, pad_width), lambda i: (i, 0)),
        compiler_params=pltpu.CompilerParams(
            dimension_semantics=("parallel",),       # v7x: shard over both TCs
            vmem_limit_bytes=48 * 1024 * 1024,       # headroom over v5e's 16 MiB default
        ),
    )(xp, *ops)

    loc = out[:B, :A]
    value = out[:B, A:A + 1]
    scale = jnp.broadcast_to(jnp.exp(log_std)[None, :], (B, A))
    if squeeze:
        return loc[0], scale[0], value[0]
    return loc, scale, value


# --------------------------------------------------------------------------- #
# Pure-JAX reference (for correctness check)
# --------------------------------------------------------------------------- #
def reference_forward(x, params, log_std):
    t = x[:, 0:1]

    def film(y, f):
        return (t * f[0:1, :] + f[1:2, :]) * y + (t * f[2:3, :] + f[3:4, :])

    def branch(name):
        h = x
        for li in range(4):
            w = params[name]["w"][li]
            b = params[name]["b"][li].reshape(1, -1)
            f = params[name]["film"][li]
            y = film(jnp.dot(h, w, precision=jax.lax.Precision.HIGHEST) + b, f)
            h = jnp.maximum(y, 0.0) if li < 3 else y
        return h

    loc = branch("p")
    val = branch("v")
    scale = jnp.broadcast_to(jnp.exp(log_std)[None, :], loc.shape)
    return loc, scale, val


# --------------------------------------------------------------------------- #
# Demo / self-check
# --------------------------------------------------------------------------- #
if __name__ == "__main__":
    batch, num_states, num_actions = 2, 64, 16   # hidden dims fixed at 512

    key = jax.random.PRNGKey(0)
    key, kx, kp = jax.random.split(key, 3)
    x = jax.random.normal(kx, (batch, num_states), dtype=jnp.float32)
    params = init_params(kp, num_states, num_actions)

    # log_std exactly as the module builds it (non-learnable branch).
    log_std = jnp.ones((num_actions,), jnp.float32)
    log_std = log_std.at[18:].multiply(0.5)   # no-op for num_actions <= 18
    log_std = log_std.at[-1].set(1.0)

    loc, scale, value = simulation_nn_forward(x, params, log_std)
    jax.block_until_ready((loc, scale, value))

    ref_loc, ref_scale, ref_value = reference_forward(x, params, log_std)

    assert loc.shape == (batch, num_actions) and loc.dtype == jnp.float32
    assert scale.shape == (batch, num_actions)
    assert value.shape == (batch, 1) and value.dtype == jnp.float32
    assert jnp.allclose(loc, ref_loc, rtol=2e-2, atol=2e-2)
    assert jnp.allclose(value, ref_value, rtol=2e-2, atol=2e-2)
    assert jnp.allclose(scale, ref_scale)

    # TODO(synk): torch.distributions.Normal sampling / log_prob are left to
    # the caller; the kernel returns the distribution parameters (loc, scale).
    print("KERNEL_OK")
</pallas_src>

<mosaic_0001>
module attributes {stable_mosaic.version = 11 : i64} {
  func.func @_simulation_nn_kernel(%arg0: i32, %arg1: memref<8x64xf32, #tpu.memory_space<vmem>>, %arg2: memref<64x1024xf32, #tpu.memory_space<vmem>>, %arg3: memref<1x1024xf32, #tpu.memory_space<vmem>>, %arg4: memref<4x1024xf32, #tpu.memory_space<vmem>>, %arg5: memref<512x512xf32, #tpu.memory_space<vmem>>, %arg6: memref<1x512xf32, #tpu.memory_space<vmem>>, %arg7: memref<4x512xf32, #tpu.memory_space<vmem>>, %arg8: memref<512x512xf32, #tpu.memory_space<vmem>>, %arg9: memref<1x512xf32, #tpu.memory_space<vmem>>, %arg10: memref<4x512xf32, #tpu.memory_space<vmem>>, %arg11: memref<512x512xf32, #tpu.memory_space<vmem>>, %arg12: memref<1x512xf32, #tpu.memory_space<vmem>>, %arg13: memref<4x512xf32, #tpu.memory_space<vmem>>, %arg14: memref<512x512xf32, #tpu.memory_space<vmem>>, %arg15: memref<1x512xf32, #tpu.memory_space<vmem>>, %arg16: memref<4x512xf32, #tpu.memory_space<vmem>>, %arg17: memref<512x128xf32, #tpu.memory_space<vmem>>, %arg18: memref<512x128xf32, #tpu.memory_space<vmem>>, %arg19: memref<1x128xf32, #tpu.memory_space<vmem>>, %arg20: memref<4x128xf32, #tpu.memory_space<vmem>>, %arg21: memref<8x128xf32, #tpu.memory_space<vmem>>) attributes {dimension_semantics = [#tpu.dimension_semantics<parallel>], iteration_bounds = array<i64: 1>, scalar_prefetch = 0 : i64, scratch_operands = 0 : i64, tpu.core_type = #tpu.core_type<tc>, window_params = [{transform_indices = @transform_0, window_bounds = array<i64: 8, 64>}, {pipeline_mode = #tpu.pipeline_mode<synchronous>, transform_indices = @transform_1, window_bounds = array<i64: 64, 1024>}, {pipeline_mode = #tpu.pipeline_mode<synchronous>, transform_indices = @transform_2, window_bounds = array<i64: 1, 1024>}, {pipeline_mode = #tpu.pipeline_mode<synchronous>, transform_indices = @transform_3, window_bounds = array<i64: 4, 1024>}, {pipeline_mode = #tpu.pipeline_mode<synchronous>, transform_indices = @transform_4, window_bounds = array<i64: 512, 512>}, {pipeline_mode = #tpu.pipeline_mode<synchronous>, transform_indices = @transform_5, window_bounds = array<i64: 1, 512>}, {pipeline_mode = #tpu.pipeline_mode<synchronous>, transform_indices = @transform_6, window_bounds = array<i64: 4, 512>}, {pipeline_mode = #tpu.pipeline_mode<synchronous>, transform_indices = @transform_7, window_bounds = array<i64: 512, 512>}, {pipeline_mode = #tpu.pipeline_mode<synchronous>, transform_indices = @transform_8, window_bounds = array<i64: 1, 512>}, {pipeline_mode = #tpu.pipeline_mode<synchronous>, transform_indices = @transform_9, window_bounds = array<i64: 4, 512>}, {pipeline_mode = #tpu.pipeline_mode<synchronous>, transform_indices = @transform_10, window_bounds = array<i64: 512, 512>}, {pipeline_mode = #tpu.pipeline_mode<synchronous>, transform_indices = @transform_11, window_bounds = array<i64: 1, 512>}, {pipeline_mode = #tpu.pipeline_mode<synchronous>, transform_indices = @transform_12, window_bounds = array<i64: 4, 512>}, {pipeline_mode = #tpu.pipeline_mode<synchronous>, transform_indices = @transform_13, window_bounds = array<i64: 512, 512>}, {pipeline_mode = #tpu.pipeline_mode<synchronous>, transform_indices = @transform_14, window_bounds = array<i64: 1, 512>}, {pipeline_mode = #tpu.pipeline_mode<synchronous>, transform_indices = @transform_15, window_bounds = array<i64: 4, 512>}, {pipeline_mode = #tpu.pipeline_mode<synchronous>, transform_indices = @transform_16, window_bounds = array<i64: 512, 128>}, {pipeline_mode = #tpu.pipeline_mode<synchronous>, transform_indices = @transform_17, window_bounds = array<i64: 512, 128>}, {pipeline_mode = #tpu.pipeline_mode<synchronous>, transform_indices = @transform_18, window_bounds = array<i64: 1, 128>}, {pipeline_mode = #tpu.pipeline_mode<synchronous>, transform_indices = @transform_19, window_bounds = array<i64: 4, 128>}, {transform_indices = @transform_20, window_bounds = array<i64: 8, 128>}]} {
    %c0 = arith.constant 0 : index
    %c0_0 = arith.constant 0 : index
    %0 = vector.load %arg1[%c0, %c0_0] : memref<8x64xf32, #tpu.memory_space<vmem>>, vector<8x64xf32>
    %1 = vector.extract_strided_slice %0 {offsets = [0, 0], sizes = [8, 1], strides = [1, 1]} : vector<8x64xf32> to vector<8x1xf32>
    %c0_1 = arith.constant 0 : index
    %c0_2 = arith.constant 0 : index
    %2 = vector.load %arg2[%c0_1, %c0_2] : memref<64x1024xf32, #tpu.memory_space<vmem>>, vector<64x1024xf32>
    %cst = arith.constant dense<0.000000e+00> : vector<8x1024xf32>
    %3 = tpu.matmul %0, %2, %cst {dimension_numbers = #tpu.dot_dimension_numbers<[1], [0], [0], [1], [0, 0, 1, 1], [], []>} : vector<8x64xf32>, vector<64x1024xf32>, vector<8x1024xf32> -> vector<8x1024xf32>
    %c0_3 = arith.constant 0 : index
    %c0_4 = arith.constant 0 : index
    %4 = vector.load %arg3[%c0_3, %c0_4] : memref<1x1024xf32, #tpu.memory_space<vmem>>, vector<1x1024xf32>
    %5 = vector.broadcast %4 : vector<1x1024xf32> to vector<8x1024xf32>
    %6 = arith.addf %3, %5 : vector<8x1024xf32>
    %c0_5 = arith.constant 0 : index
    %c0_6 = arith.constant 0 : index
    %7 = vector.load %arg4[%c0_5, %c0_6] : memref<4x1024xf32, #tpu.memory_space<vmem>>, vector<4x1024xf32>
    %8 = vector.extract_strided_slice %7 {offsets = [0, 0], sizes = [1, 1024], strides = [1, 1]} : vector<4x1024xf32> to vector<1x1024xf32>
    %9 = vector.broadcast %1 : vector<8x1xf32> to vector<8x1024xf32>
    %10 = vector.broadcast %8 : vector<1x1024xf32> to vector<8x1024xf32>
    %11 = arith.mulf %9, %10 : vector<8x1024xf32>
    %12 = vector.extract_strided_slice %7 {offsets = [1, 0], sizes = [1, 1024], strides = [1, 1]} : vector<4x1024xf32> to vector<1x1024xf32>
    %13 = vector.broadcast %12 : vector<1x1024xf32> to vector<8x1024xf32>
    %14 = arith.addf %11, %13 : vector<8x1024xf32>
    %15 = vector.extract_strided_slice %7 {offsets = [2, 0], sizes = [1, 1024], strides = [1, 1]} : vector<4x1024xf32> to vector<1x1024xf32>
    %16 = vector.broadcast %1 : vector<8x1xf32> to vector<8x1024xf32>
    %17 = vector.broadcast %15 : vector<1x1024xf32> to vector<8x1024xf32>
    %18 = arith.mulf %16, %17 : vector<8x1024xf32>
    %19 = vector.extract_strided_slice %7 {offsets = [3, 0], sizes = [1, 1024], strides = [1, 1]} : vector<4x1024xf32> to vector<1x1024xf32>
    %20 = vector.broadcast %19 : vector<1x1024xf32> to vector<8x1024xf32>
    %21 = arith.addf %18, %20 : vector<8x1024xf32>
    %22 = arith.mulf %14, %6 : vector<8x1024xf32>
    %23 = arith.addf %22, %21 : vector<8x1024xf32>
    %cst_7 = arith.constant 0.000000e+00 : f32
    %24 = vector.broadcast %cst_7 : f32 to vector<8x1024xf32>
    %25 = arith.maximumf %23, %24 : vector<8x1024xf32>
    %26 = vector.extract_strided_slice %25 {offsets = [0, 0], sizes = [8, 512], strides = [1, 1]} : vector<8x1024xf32> to vector<8x512xf32>
    %27 = vector.extract_strided_slice %25 {offsets = [0, 512], sizes = [8, 512], strides = [1, 1]} : vector<8x1024xf32> to vector<8x512xf32>
    %c0_8 = arith.constant 0 : index
    %c0_9 = arith.constant 0 : index
    %28 = vector.load %arg5[%c0_8, %c0_9] : memref<512x512xf32, #tpu.memory_space<vmem>>, vector<512x512xf32>
    %cst_10 = arith.constant dense<0.000000e+00> : vector<8x512xf32>
    %29 = tpu.matmul %26, %28, %cst_10 {dimension_numbers = #tpu.dot_dimension_numbers<[1], [0], [0], [1], [0, 0, 1, 1], [], []>} : vector<8x512xf32>, vector<512x512xf32>, vector<8x512xf32> -> vector<8x512xf32>
    %c0_11 = arith.constant 0 : index
    %c0_12 = arith.constant 0 : index
    %30 = vector.load %arg6[%c0_11, %c0_12] : memref<1x512xf32, #tpu.memory_space<vmem>>, vector<1x512xf32>
    %31 = vector.broadcast %30 : vector<1x512xf32> to vector<8x512xf32>
    %32 = arith.addf %29, %31 : vector<8x512xf32>
    %c0_13 = arith.constant 0 : index
    %c0_14 = arith.constant 0 : index
    %33 = vector.load %arg7[%c0_13, %c0_14] : memref<4x512xf32, #tpu.memory_space<vmem>>, vector<4x512xf32>
    %34 = vector.extract_strided_slice %33 {offsets = [0, 0], sizes = [1, 512], strides = [1, 1]} : vector<4x512xf32> to vector<1x512xf32>
    %35 = vector.broadcast %1 : vector<8x1xf32> to vector<8x512xf32>
    %36 = vector.broadcast %34 : vector<1x512xf32> to vector<8x512xf32>
    %37 = arith.mulf %35, %36 : vector<8x512xf32>
    %38 = vector.extract_strided_slice %33 {offsets = [1, 0], sizes = [1, 512], strides = [1, 1]} : vector<4x512xf32> to vector<1x512xf32>
    %39 = vector.broadcast %38 : vector<1x512xf32> to vector<8x512xf32>
    %40 = arith.addf %37, %39 : vector<8x512xf32>
    %41 = vector.extract_strided_slice %33 {offsets = [2, 0], sizes = [1, 512], strides = [1, 1]} : vector<4x512xf32> to vector<1x512xf32>
    %42 = vector.broadcast %1 : vector<8x1xf32> to vector<8x512xf32>
    %43 = vector.broadcast %41 : vector<1x512xf32> to vector<8x512xf32>
    %44 = arith.mulf %42, %43 : vector<8x512xf32>
    %45 = vector.extract_strided_slice %33 {offsets = [3, 0], sizes = [1, 512], strides = [1, 1]} : vector<4x512xf32> to vector<1x512xf32>
    %46 = vector.broadcast %45 : vector<1x512xf32> to vector<8x512xf32>
    %47 = arith.addf %44, %46 : vector<8x512xf32>
    %48 = arith.mulf %40, %32 : vector<8x512xf32>
    %49 = arith.addf %48, %47 : vector<8x512xf32>
    %cst_15 = arith.constant 0.000000e+00 : f32
    %50 = vector.broadcast %cst_15 : f32 to vector<8x512xf32>
    %51 = arith.maximumf %49, %50 : vector<8x512xf32>
    %c0_16 = arith.constant 0 : index
    %c0_17 = arith.constant 0 : index
    %52 = vector.load %arg8[%c0_16, %c0_17] : memref<512x512xf32, #tpu.memory_space<vmem>>, vector<512x512xf32>
    %cst_18 = arith.constant dense<0.000000e+00> : vector<8x512xf32>
    %53 = tpu.matmul %51, %52, %cst_18 {dimension_numbers = #tpu.dot_dimension_numbers<[1], [0], [0], [1], [0, 0, 1, 1], [], []>} : vector<8x512xf32>, vector<512x512xf32>, vector<8x512xf32> -> vector<8x512xf32>
    %c0_19 = arith.constant 0 : index
    %c0_20 = arith.constant 0 : index
    %54 = vector.load %arg9[%c0_19, %c0_20] : memref<1x512xf32, #tpu.memory_space<vmem>>, vector<1x512xf32>
    %55 = vector.broadcast %54 : vector<1x512xf32> to vector<8x512xf32>
    %56 = arith.addf %53, %55 : vector<8x512xf32>
    %c0_21 = arith.constant 0 : index
    %c0_22 = arith.constant 0 : index
    %57 = vector.load %arg10[%c0_21, %c0_22] : memref<4x512xf32, #tpu.memory_space<vmem>>, vector<4x512xf32>
    %58 = vector.extract_strided_slice %57 {offsets = [0, 0], sizes = [1, 512], strides = [1, 1]} : vector<4x512xf32> to vector<1x512xf32>
    %59 = vector.broadcast %1 : vector<8x1xf32> to vector<8x512xf32>
    %60 = vector.broadcast %58 : vector<1x512xf32> to vector<8x512xf32>
    %61 = arith.mulf %59, %60 : vector<8x512xf32>
    %62 = vector.extract_strided_slice %57 {offsets = [1, 0], sizes = [1, 512], strides = [1, 1]} : vector<4x512xf32> to vector<1x512xf32>
    %63 = vector.broadcast %62 : vector<1x512xf32> to vector<8x512xf32>
    %64 = arith.addf %61, %63 : vector<8x512xf32>
    %65 = vector.extract_strided_slice %57 {offsets = [2, 0], sizes = [1, 512], strides = [1, 1]} : vector<4x512xf32> to vector<1x512xf32>
    %66 = vector.broadcast %1 : vector<8x1xf32> to vector<8x512xf32>
    %67 = vector.broadcast %65 : vector<1x512xf32> to vector<8x512xf32>
    %68 = arith.mulf %66, %67 : vector<8x512xf32>
    %69 = vector.extract_strided_slice %57 {offsets = [3, 0], sizes = [1, 512], strides = [1, 1]} : vector<4x512xf32> to vector<1x512xf32>
    %70 = vector.broadcast %69 : vector<1x512xf32> to vector<8x512xf32>
    %71 = arith.addf %68, %70 : vector<8x512xf32>
    %72 = arith.mulf %64, %56 : vector<8x512xf32>
    %73 = arith.addf %72, %71 : vector<8x512xf32>
    %cst_23 = arith.constant 0.000000e+00 : f32
    %74 = vector.broadcast %cst_23 : f32 to vector<8x512xf32>
    %75 = arith.maximumf %73, %74 : vector<8x512xf32>
    %c0_24 = arith.constant 0 : index
    %c0_25 = arith.constant 0 : index
    %76 = vector.load %arg11[%c0_24, %c0_25] : memref<512x512xf32, #tpu.memory_space<vmem>>, vector<512x512xf32>
    %cst_26 = arith.constant dense<0.000000e+00> : vector<8x512xf32>
    %77 = tpu.matmul %27, %76, %cst_26 {dimension_numbers = #tpu.dot_dimension_numbers<[1], [0], [0], [1], [0, 0, 1, 1], [], []>} : vector<8x512xf32>, vector<512x512xf32>, vector<8x512xf32> -> vector<8x512xf32>
    %c0_27 = arith.constant 0 : index
    %c0_28 = arith.constant 0 : index
    %78 = vector.load %arg12[%c0_27, %c0_28] : memref<1x512xf32, #tpu.memory_space<vmem>>, vector<1x512xf32>
    %79 = vector.broadcast %78 : vector<1x512xf32> to vector<8x512xf32>
    %80 = arith.addf %77, %79 : vector<8x512xf32>
    %c0_29 = arith.constant 0 : index
    %c0_30 = arith.constant 0 : index
    %81 = vector.load %arg13[%c0_29, %c0_30] : memref<4x512xf32, #tpu.memory_space<vmem>>, vector<4x512xf32>
    %82 = vector.extract_strided_slice %81 {offsets = [0, 0], sizes = [1, 512], strides = [1, 1]} : vector<4x512xf32> to vector<1x512xf32>
    %83 = vector.broadcast %1 : vector<8x1xf32> to vector<8x512xf32>
    %84 = vector.broadcast %82 : vector<1x512xf32> to vector<8x512xf32>
    %85 = arith.mulf %83, %84 : vector<8x512xf32>
    %86 = vector.extract_strided_slice %81 {offsets = [1, 0], sizes = [1, 512], strides = [1, 1]} : vector<4x512xf32> to vector<1x512xf32>
    %87 = vector.broadcast %86 : vector<1x512xf32> to vector<8x512xf32>
    %88 = arith.addf %85, %87 : vector<8x512xf32>
    %89 = vector.extract_strided_slice %81 {offsets = [2, 0], sizes = [1, 512], strides = [1, 1]} : vector<4x512xf32> to vector<1x512xf32>
    %90 = vector.broadcast %1 : vector<8x1xf32> to vector<8x512xf32>
    %91 = vector.broadcast %89 : vector<1x512xf32> to vector<8x512xf32>
    %92 = arith.mulf %90, %91 : vector<8x512xf32>
    %93 = vector.extract_strided_slice %81 {offsets = [3, 0], sizes = [1, 512], strides = [1, 1]} : vector<4x512xf32> to vector<1x512xf32>
    %94 = vector.broadcast %93 : vector<1x512xf32> to vector<8x512xf32>
    %95 = arith.addf %92, %94 : vector<8x512xf32>
    %96 = arith.mulf %88, %80 : vector<8x512xf32>
    %97 = arith.addf %96, %95 : vector<8x512xf32>
    %cst_31 = arith.constant 0.000000e+00 : f32
    %98 = vector.broadcast %cst_31 : f32 to vector<8x512xf32>
    %99 = arith.maximumf %97, %98 : vector<8x512xf32>
    %c0_32 = arith.constant 0 : index
    %c0_33 = arith.constant 0 : index
    %100 = vector.load %arg14[%c0_32, %c0_33] : memref<512x512xf32, #tpu.memory_space<vmem>>, vector<512x512xf32>
    %cst_34 = arith.constant dense<0.000000e+00> : vector<8x512xf32>
    %101 = tpu.matmul %99, %100, %cst_34 {dimension_numbers = #tpu.dot_dimension_numbers<[1], [0], [0], [1], [0, 0, 1, 1], [], []>} : vector<8x512xf32>, vector<512x512xf32>, vector<8x512xf32> -> vector<8x512xf32>
    %c0_35 = arith.constant 0 : index
    %c0_36 = arith.constant 0 : index
    %102 = vector.load %arg15[%c0_35, %c0_36] : memref<1x512xf32, #tpu.memory_space<vmem>>, vector<1x512xf32>
    %103 = vector.broadcast %102 : vector<1x512xf32> to vector<8x512xf32>
    %104 = arith.addf %101, %103 : vector<8x512xf32>
    %c0_37 = arith.constant 0 : index
    %c0_38 = arith.constant 0 : index
    %105 = vector.load %arg16[%c0_37, %c0_38] : memref<4x512xf32, #tpu.memory_space<vmem>>, vector<4x512xf32>
    %106 = vector.extract_strided_slice %105 {offsets = [0, 0], sizes = [1, 512], strides = [1, 1]} : vector<4x512xf32> to vector<1x512xf32>
    %107 = vector.broadcast %1 : vector<8x1xf32> to vector<8x512xf32>
    %108 = vector.broadcast %106 : vector<1x512xf32> to vector<8x512xf32>
    %109 = arith.mulf %107, %108 : vector<8x512xf32>
    %110 = vector.extract_strided_slice %105 {offsets = [1, 0], sizes = [1, 512], strides = [1, 1]} : vector<4x512xf32> to vector<1x512xf32>
    %111 = vector.broadcast %110 : vector<1x512xf32> to vector<8x512xf32>
    %112 = arith.addf %109, %111 : vector<8x512xf32>
    %113 = vector.extract_strided_slice %105 {offsets = [2, 0], sizes = [1, 512], strides = [1, 1]} : vector<4x512xf32> to vector<1x512xf32>
    %114 = vector.broadcast %1 : vector<8x1xf32> to vector<8x512xf32>
    %115 = vector.broadcast %113 : vector<1x512xf32> to vector<8x512xf32>
    %116 = arith.mulf %114, %115 : vector<8x512xf32>
    %117 = vector.extract_strided_slice %105 {offsets = [3, 0], sizes = [1, 512], strides = [1, 1]} : vector<4x512xf32> to vector<1x512xf32>
    %118 = vector.broadcast %117 : vector<1x512xf32> to vector<8x512xf32>
    %119 = arith.addf %116, %118 : vector<8x512xf32>
    %120 = arith.mulf %112, %104 : vector<8x512xf32>
    %121 = arith.addf %120, %119 : vector<8x512xf32>
    %cst_39 = arith.constant 0.000000e+00 : f32
    %122 = vector.broadcast %cst_39 : f32 to vector<8x512xf32>
    %123 = arith.maximumf %121, %122 : vector<8x512xf32>
    %c0_40 = arith.constant 0 : index
    %c0_41 = arith.constant 0 : index
    %124 = vector.load %arg17[%c0_40, %c0_41] : memref<512x128xf32, #tpu.memory_space<vmem>>, vector<512x128xf32>
    %cst_42 = arith.constant dense<0.000000e+00> : vector<8x128xf32>
    %125 = tpu.matmul %75, %124, %cst_42 {dimension_numbers = #tpu.dot_dimension_numbers<[1], [0], [0], [1], [0, 0, 1, 1], [], []>} : vector<8x512xf32>, vector<512x128xf32>, vector<8x128xf32> -> vector<8x128xf32>
    %c0_43 = arith.constant 0 : index
    %c0_44 = arith.constant 0 : index
    %126 = vector.load %arg18[%c0_43, %c0_44] : memref<512x128xf32, #tpu.memory_space<vmem>>, vector<512x128xf32>
    %cst_45 = arith.constant dense<0.000000e+00> : vector<8x128xf32>
    %127 = tpu.matmul %123, %126, %cst_45 {dimension_numbers = #tpu.dot_dimension_numbers<[1], [0], [0], [1], [0, 0, 1, 1], [], []>} : vector<8x512xf32>, vector<512x128xf32>, vector<8x128xf32> -> vector<8x128xf32>
    %128 = arith.addf %125, %127 : vector<8x128xf32>
    %c0_46 = arith.constant 0 : index
    %c0_47 = arith.constant 0 : index
    %129 = vector.load %arg19[%c0_46, %c0_47] : memref<1x128xf32, #tpu.memory_space<vmem>>, vector<1x128xf32>
    %130 = vector.broadcast %129 : vector<1x128xf32> to vector<8x128xf32>
    %131 = arith.addf %128, %130 : vector<8x128xf32>
    %c0_48 = arith.constant 0 : index
    %c0_49 = arith.constant 0 : index
    %132 = vector.load %arg20[%c0_48, %c0_49] : memref<4x128xf32, #tpu.memory_space<vmem>>, vector<4x128xf32>
    %133 = vector.extract_strided_slice %132 {offsets = [0, 0], sizes = [1, 128], strides = [1, 1]} : vector<4x128xf32> to vector<1x128xf32>
    %134 = vector.broadcast %1 : vector<8x1xf32> to vector<8x128xf32>
    %135 = vector.broadcast %133 : vector<1x128xf32> to vector<8x128xf32>
    %136 = arith.mulf %134, %135 : vector<8x128xf32>
    %137 = vector.extract_strided_slice %132 {offsets = [1, 0], sizes = [1, 128], strides = [1, 1]} : vector<4x128xf32> to vector<1x128xf32>
    %138 = vector.broadcast %137 : vector<1x128xf32> to vector<8x128xf32>
    %139 = arith.addf %136, %138 : vector<8x128xf32>
    %140 = vector.extract_strided_slice %132 {offsets = [2, 0], sizes = [1, 128], strides = [1, 1]} : vector<4x128xf32> to vector<1x128xf32>
    %141 = vector.broadcast %1 : vector<8x1xf32> to vector<8x128xf32>
    %142 = vector.broadcast %140 : vector<1x128xf32> to vector<8x128xf32>
    %143 = arith.mulf %141, %142 : vector<8x128xf32>
    %144 = vector.extract_strided_slice %132 {offsets = [3, 0], sizes = [1, 128], strides = [1, 1]} : vector<4x128xf32> to vector<1x128xf32>
    %145 = vector.broadcast %144 : vector<1x128xf32> to vector<8x128xf32>
    %146 = arith.addf %143, %145 : vector<8x128xf32>
    %147 = arith.mulf %139, %131 : vector<8x128xf32>
    %148 = arith.addf %147, %146 : vector<8x128xf32>
    %c0_50 = arith.constant 0 : index
    %c0_51 = arith.constant 0 : index
    %149 = vector.load %arg21[%c0_50, %c0_51] : memref<8x128xf32, #tpu.memory_space<vmem>>, vector<8x128xf32>
    tpu.vector_store %arg21[%c0_50, %c0_51], %148 {strides = array<i32>} : memref<8x128xf32, #tpu.memory_space<vmem>>, vector<8x128xf32>,
    return
  }
  func.func @transform_0(%arg0: i32) -> (i32, i32) {
    %c0_i32 = arith.constant 0 : i32
    %c0_i32_0 = arith.constant 0 : i32
    return %arg0, %c0_i32 : i32, i32
  }
  func.func @transform_1(%arg0: i32) -> (i32, i32) {
    %c0_i32 = arith.constant 0 : i32
    %c0_i32_0 = arith.constant 0 : i32
    %c0_i32_1 = arith.constant 0 : i32
    return %c0_i32, %c0_i32_0 : i32, i32
  }
  func.func @transform_2(%arg0: i32) -> (i32, i32) {
    %c0_i32 = arith.constant 0 : i32
    %c0_i32_0 = arith.constant 0 : i32
    %c0_i32_1 = arith.constant 0 : i32
    return %c0_i32, %c0_i32_0 : i32, i32
  }
  func.func @transform_3(%arg0: i32) -> (i32, i32) {
    %c0_i32 = arith.constant 0 : i32
    %c0_i32_0 = arith.constant 0 : i32
    %c0_i32_1 = arith.constant 0 : i32
    return %c0_i32, %c0_i32_0 : i32, i32
  }
  func.func @transform_4(%arg0: i32) -> (i32, i32) {
    %c0_i32 = arith.constant 0 : i32
    %c0_i32_0 = arith.constant 0 : i32
    %c0_i32_1 = arith.constant 0 : i32
    return %c0_i32, %c0_i32_0 : i32, i32
  }
  func.func @transform_5(%arg0: i32) -> (i32, i32) {
    %c0_i32 = arith.constant 0 : i32
    %c0_i32_0 = arith.constant 0 : i32
    %c0_i32_1 = arith.constant 0 : i32
    return %c0_i32, %c0_i32_0 : i32, i32
  }
  func.func @transform_6(%arg0: i32) -> (i32, i32) {
    %c0_i32 = arith.constant 0 : i32
    %c0_i32_0 = arith.constant 0 : i32
    %c0_i32_1 = arith.constant 0 : i32
    return %c0_i32, %c0_i32_0 : i32, i32
  }
  func.func @transform_7(%arg0: i32) -> (i32, i32) {
    %c0_i32 = arith.constant 0 : i32
    %c0_i32_0 = arith.constant 0 : i32
    %c0_i32_1 = arith.constant 0 : i32
    return %c0_i32, %c0_i32_0 : i32, i32
  }
  func.func @transform_8(%arg0: i32) -> (i32, i32) {
    %c0_i32 = arith.constant 0 : i32
    %c0_i32_0 = arith.constant 0 : i32
    %c0_i32_1 = arith.constant 0 : i32
    return %c0_i32, %c0_i32_0 : i32, i32
  }
  func.func @transform_9(%arg0: i32) -> (i32, i32) {
    %c0_i32 = arith.constant 0 : i32
    %c0_i32_0 = arith.constant 0 : i32
    %c0_i32_1 = arith.constant 0 : i32
    return %c0_i32, %c0_i32_0 : i32, i32
  }
  func.func @transform_10(%arg0: i32) -> (i32, i32) {
    %c0_i32 = arith.constant 0 : i32
    %c0_i32_0 = arith.constant 0 : i32
    %c0_i32_1 = arith.constant 0 : i32
    return %c0_i32, %c0_i32_0 : i32, i32
  }
  func.func @transform_11(%arg0: i32) -> (i32, i32) {
    %c0_i32 = arith.constant 0 : i32
    %c0_i32_0 = arith.constant 0 : i32
    %c0_i32_1 = arith.constant 0 : i32
    return %c0_i32, %c0_i32_0 : i32, i32
  }
  func.func @transform_12(%arg0: i32) -> (i32, i32) {
    %c0_i32 = arith.constant 0 : i32
    %c0_i32_0 = arith.constant 0 : i32
    %c0_i32_1 = arith.constant 0 : i32
    return %c0_i32, %c0_i32_0 : i32, i32
  }
  func.func @transform_13(%arg0: i32) -> (i32, i32) {
    %c0_i32 = arith.constant 0 : i32
    %c0_i32_0 = arith.constant 0 : i32
    %c0_i32_1 = arith.constant 0 : i32
    return %c0_i32, %c0_i32_0 : i32, i32
  }
  func.func @transform_14(%arg0: i32) -> (i32, i32) {
    %c0_i32 = arith.constant 0 : i32
    %c0_i32_0 = arith.constant 0 : i32
    %c0_i32_1 = arith.constant 0 : i32
    return %c0_i32, %c0_i32_0 : i32, i32
  }
  func.func @transform_15(%arg0: i32) -> (i32, i32) {
    %c0_i32 = arith.constant 0 : i32
    %c0_i32_0 = arith.constant 0 : i32
    %c0_i32_1 = arith.constant 0 : i32
    return %c0_i32, %c0_i32_0 : i32, i32
  }
  func.func @transform_16(%arg0: i32) -> (i32, i32) {
    %c0_i32 = arith.constant 0 : i32
    %c0_i32_0 = arith.constant 0 : i32
    %c0_i32_1 = arith.constant 0 : i32
    return %c0_i32, %c0_i32_0 : i32, i32
  }
  func.func @transform_17(%arg0: i32) -> (i32, i32) {
    %c0_i32 = arith.constant 0 : i32
    %c0_i32_0 = arith.constant 0 : i32
    %c0_i32_1 = arith.constant 0 : i32
    return %c0_i32, %c0_i32_0 : i32, i32
  }
  func.func @transform_18(%arg0: i32) -> (i32, i32) {
    %c0_i32 = arith.constant 0 : i32
    %c0_i32_0 = arith.constant 0 : i32
    %c0_i32_1 = arith.constant 0 : i32
    return %c0_i32, %c0_i32_0 : i32, i32
  }
  func.func @transform_19(%arg0: i32) -> (i32, i32) {
    %c0_i32 = arith.constant 0 : i32
    %c0_i32_0 = arith.constant 0 : i32
    %c0_i32_1 = arith.constant 0 : i32
    return %c0_i32, %c0_i32_0 : i32, i32
  }
  func.func @transform_20(%arg0: i32) -> (i32, i32) {
    %c0_i32 = arith.constant 0 : i32
    %c0_i32_0 = arith.constant 0 : i32
    return %arg0, %c0_i32 : i32, i32
  }
}

</mosaic_0001>

<bundles_post_ra>
// kernel: tpu_custom_call.1
= control target key start
LH: loop header
LB: loop body
LE: loop exit
PB: predicated region body
PF: predicated region fallthrough
CT: control target
= control target key end

     0   :  { %s6997_s0 = inlined_call_operand.hbm [shape: f32[8,64], index: 0, kind: input, shape index: {}]   ;;  %s6998_s1 = inlined_call_operand.hbm [shape: f32[64,1024], index: 1, kind: input, shape index: {}]   ;;  %s6999_s2 = inlined_call_operand.hbm [shape: f32[1,1024], index: 2, kind: input, shape index: {}]   ;;  %s7000_s3 = inlined_call_operand.hbm [shape: f32[4,1024], index: 3, kind: input, shape index: {}]   ;;  %s7001_s4 = inlined_call_operand.hbm [shape: f32[512,512], index: 4, kind: input, shape index: {}]   ;;  %s7002_s5 = inlined_call_operand.hbm [shape: f32[1,512], index: 5, kind: input, shape index: {}]   ;;  %s7003_s6 = inlined_call_operand.vmem [shape: f32[4,512], index: 6, kind: input, shape index: {}]   ;;  %s7004_s7 = inlined_call_operand.hbm [shape: f32[512,512], index: 7, kind: input, shape index: {}]   ;;  %s7005_s8 = inlined_call_operand.hbm [shape: f32[1,512], index: 8, kind: input, shape index: {}]   ;;  %s7006_s9 = inlined_call_operand.vmem [shape: f32[4,512], index: 9, kind: input, shape index: {}]   ;;  %s7007_s10 = inlined_call_operand.hbm [shape: f32[512,512], index: 10, kind: input, shape index: {}]   ;;  %s7008_s11 = inlined_call_operand.hbm [shape: f32[1,512], index: 11, kind: input, shape index: {}]   ;;  %s7009_s12 = inlined_call_operand.hbm [shape: f32[4,512], index: 12, kind: input, shape index: {}]   ;;  %s7010_s13 = inlined_call_operand.hbm [shape: f32[512,512], index: 13, kind: input, shape index: {}]   ;;  %s7011_s14 = inlined_call_operand.vmem [shape: f32[1,512], index: 14, kind: input, shape index: {}]   ;;  %s7012_s15 = inlined_call_operand.vmem [shape: f32[4,512], index: 15, kind: input, shape index: {}]   ;;  %s7013_s16 = inlined_call_operand.hbm [shape: f32[512,128], index: 16, kind: input, shape index: {}]   ;;  %s7014_s17 = inlined_call_operand.hbm [shape: f32[512,128], index: 17, kind: input, shape index: {}]   ;;  %s7015_s18 = inlined_call_operand.vmem [shape: f32[1,128], index: 18, kind: input, shape index: {}]   ;;  %s7016_s19 = inlined_call_operand.vmem [shape: f32[4,128], index: 19, kind: input, shape index: {}]   ;;  %s7017_s20 = inlined_call_operand.hbm [shape: f32[8,128], index: 20, kind: output, shape index: {}]  }
   0x1   :  { %7024 = sst [smem:[#allocation35_spill]] %s6997_s0 }
   0x2   :  { %7025 = sst [smem:[#allocation36_spill]] %s6998_s1 }
   0x3   :  { %7026 = sst [smem:[#allocation37_spill]] %s6999_s2 }
   0x4   :  { %7027 = sst [smem:[#allocation38_spill]] %s7000_s3 }
   0x5   :  { %7028 = sst [smem:[#allocation39_spill]] %s7001_s4 }
   0x6   :  { %7029 = sst [smem:[#allocation40_spill]] %s7015_s18 }
   0x7   :  { %7030 = sst [smem:[#allocation41_spill]] %s7016_s19 }
   0x8   :  { %7031 = sst [smem:[#allocation42_spill]] %s7017_s20 }
   0x9   :  { %25 = vsyncpa [#allocation3], 0 }
   0xa   :  { %26 = vsyncpa [#allocation6], 0 }
   0xb   :  { %27 = vsyncpa [#allocation9], 0 }
   0xc   :  { %28 = vsyncpa [#allocation12], 0 }
   0xd   :  { %29 = vsyncpa [#allocation15], 0 }
   0xe   :  { %30 = vsyncpa [#allocation18], 0 }
   0xf   :  { %31 = vsyncpa [#allocation21], 0 }
  0x10   :  { %32 = vsyncpa [#allocation24], 0 }
  0x11   :  { %33 = vsyncpa [#allocation4], 0  ;;  %s6174_s1 = smov [#allocation5]   ;;  %s7032_s2 = sld [smem:[#allocation36_spill]] }
  0x12   :  { %s49_s22 = sshll.u32 %s6174_s1, 4  ;;  %s50_s22 = int_to_ptr.vmem [resolvable:$true] %s49_s22 }
  0x17   :  { %s5826_s25 = scalar_lea.hbm %s7032_s2, 8192 }
  0x18   :  { %p5827_p0 = scmp.ne.s32.totalorder %s7032_s2, %s5826_s25  ;;  %p5830_p1 = scmp.lt.u32.totalorder %s5826_s25, %s7032_s2 }
  0x1a   :  { %p5832_p2 = pnand %p5830_p1, %p5827_p0 }
  0x1c   :  { %5835 = shalt.err (!%p5832_p2)
}
  0x1d   :  { %s5836_s4 = scalar_lea.vmem %s50_s22, 8192  ;;  %p5841_p4 = scmp.lt.s32.totalorder %s50_s22, %s50_s22 }
  0x1e   :  { %p5837_p3 = scmp.ne.s32.totalorder %s50_s22, %s5836_s4  ;;  %p5842_p5 = scmp.lt.s32.totalorder %s5836_s4, %s5836_s4 }
  0x20   :  { %p5843_p6 = por %p5842_p5, %p5841_p4 }
  0x22   :  { %p5844_p7 = pnand %p5843_p6, %p5837_p3 }
  0x24   :  { %5847 = shalt.err (!%p5844_p7)
}
  0x25   :  { %s6175_s29 = smov 1024   ;;  %s6176_s30 = smov 64  }
  0x26   :  { %55 = dma.hbm_to_vmem [thread:$0]  %s7032_s2, 8192, %s50_s22, [#allocation6], %s6175_s29, %s6175_s29, %s6176_s30  }
  0x27   :  { %s6177_s1 = smov [#allocation8]   ;;  %s6178_s24 = smov [#allocation11]  }
  0x28   :  { %s72_s23 = sshll.u32 %s6177_s1, 4  ;;  %s94_s25 = sshll.u32 %s6178_s24, 4  ;;  %s73_s23 = int_to_ptr.vmem [resolvable:$true] %s72_s23  ;;  %s95_s25 = int_to_ptr.vmem [resolvable:$true] %s94_s25 }
  0x29   :  { %s7033_s27 = sld [smem:[#allocation38_spill]] }
  0x2f   :  { %s5848_s28 = scalar_lea.hbm %s7033_s27, 512 }
  0x30   :  { %p5849_p8 = scmp.ne.s32.totalorder %s7033_s27, %s5848_s28  ;;  %p5852_p9 = scmp.lt.u32.totalorder %s5848_s28, %s7033_s27 }
  0x32   :  { %p5854_p10 = pnand %p5852_p9, %p5849_p8 }
  0x34   :  { %5857 = shalt.err (!%p5854_p10)
}
  0x35   :  { %s5858_s22 = scalar_lea.vmem %s73_s23, 512  ;;  %p5863_p12 = scmp.lt.s32.totalorder %s73_s23, %s73_s23 }
  0x36   :  { %p5859_p11 = scmp.ne.s32.totalorder %s73_s23, %s5858_s22  ;;  %p5864_p13 = scmp.lt.s32.totalorder %s5858_s22, %s5858_s22 }
  0x38   :  { %p5865_p0 = por %p5864_p13, %p5863_p12 }
  0x3a   :  { %p5866_p1 = pnand %p5865_p0, %p5859_p11 }
  0x3c   :  { %5869 = shalt.err (!%p5866_p1)
}
  0x3d   :  { %75 = dma.hbm_to_vmem [thread:$0]  %s7033_s27, 512, %s73_s23, [#allocation9]  }
  0x3e   :  { %s5870_s0 = scalar_lea.hbm %s7002_s5, 64 }
  0x3f   :  { %p5871_p2 = scmp.ne.s32.totalorder %s7002_s5, %s5870_s0  ;;  %p5874_p3 = scmp.lt.u32.totalorder %s5870_s0, %s7002_s5 }
  0x41   :  { %p5876_p4 = pnand %p5874_p3, %p5871_p2 }
  0x43   :  { %5879 = shalt.err (!%p5876_p4)
}
  0x44   :  { %s5880_s24 = scalar_lea.vmem %s95_s25, 64  ;;  %p5885_p6 = scmp.lt.s32.totalorder %s95_s25, %s95_s25 }
  0x45   :  { %p5881_p5 = scmp.ne.s32.totalorder %s95_s25, %s5880_s24  ;;  %p5886_p7 = scmp.lt.s32.totalorder %s5880_s24, %s5880_s24 }
  0x47   :  { %p5887_p8 = por %p5886_p7, %p5885_p6 }
  0x49   :  { %p5888_p9 = pnand %p5887_p8, %p5881_p5 }
  0x4b   :  { %5891 = shalt.err (!%p5888_p9)
}
  0x4c   :  { %97 = dma.hbm_to_vmem [thread:$0]  %s7002_s5, 64, %s95_s25, [#allocation12]  }
  0x4d   :  { %s6179_s26 = smov [#allocation14]   ;;  %s6180_s28 = smov [#allocation17]  }
  0x4e   :  { %s118_s27 = sshll.u32 %s6179_s26, 4  ;;  %s142_s4 = sshll.u32 %s6180_s28, 4  ;;  %s119_s27 = int_to_ptr.vmem [resolvable:$true] %s118_s27  ;;  %s143_s4 = int_to_ptr.vmem [resolvable:$true] %s142_s4 }
  0x4f   :  { %s5892_s29 = scalar_lea.hbm %s7005_s8, 64 }
  0x50   :  { %p5893_p10 = scmp.ne.s32.totalorder %s7005_s8, %s5892_s29  ;;  %p5896_p11 = scmp.lt.u32.totalorder %s5892_s29, %s7005_s8 }
  0x52   :  { %p5898_p12 = pnand %p5896_p11, %p5893_p10 }
  0x54   :  { %5901 = shalt.err (!%p5898_p12)
}
  0x55   :  { %s5902_s5 = scalar_lea.vmem %s119_s27, 64  ;;  %p5907_p0 = scmp.lt.s32.totalorder %s119_s27, %s119_s27 }
  0x56   :  { %p5903_p13 = scmp.ne.s32.totalorder %s119_s27, %s5902_s5  ;;  %p5908_p1 = scmp.lt.s32.totalorder %s5902_s5, %s5902_s5 }
  0x58   :  { %p5909_p2 = por %p5908_p1, %p5907_p0 }
  0x5a   :  { %p5910_p3 = pnand %p5909_p2, %p5903_p13 }
  0x5c   :  { %5913 = shalt.err (!%p5910_p3)
}
  0x5d   :  { %121 = dma.hbm_to_vmem [thread:$0]  %s7005_s8, 64, %s119_s27, [#allocation15]  }
  0x5e   :  { %s5914_s24 = scalar_lea.hbm %s7008_s11, 64 }
  0x5f   :  { %p5915_p4 = scmp.ne.s32.totalorder %s7008_s11, %s5914_s24  ;;  %p5918_p5 = scmp.lt.u32.totalorder %s5914_s24, %s7008_s11 }
  0x61   :  { %p5920_p6 = pnand %p5918_p5, %p5915_p4 }
  0x63   :  { %5923 = shalt.err (!%p5920_p6)
}
  0x64   :  { %s5924_s22 = scalar_lea.vmem %s143_s4, 64  ;;  %p5929_p8 = scmp.lt.s32.totalorder %s143_s4, %s143_s4 }
  0x65   :  { %p5925_p7 = scmp.ne.s32.totalorder %s143_s4, %s5924_s22  ;;  %p5930_p9 = scmp.lt.s32.totalorder %s5924_s22, %s5924_s22 }
  0x67   :  { %p5931_p10 = por %p5930_p9, %p5929_p8 }
  0x69   :  { %p5932_p11 = pnand %p5931_p10, %p5925_p7 }
  0x6b   :  { %5935 = shalt.err (!%p5932_p11)
}
  0x6c   :  { %145 = dma.hbm_to_vmem [thread:$0]  %s7008_s11, 64, %s143_s4, [#allocation18]  }
  0x6d   :  { %s6181_s2 = smov [#allocation20]   ;;  %s6182_s20 = smov [#allocation2]  }
  0x6e   :  { %s161_s29 = sshll.u32 %s6181_s2, 4  ;;  %s40_s30 = sshll.u32 %s6182_s20, 4  ;;  %s162_s29 = int_to_ptr.vmem [resolvable:$true] %s161_s29  ;;  %s41_s30 = int_to_ptr.vmem [resolvable:$true] %s40_s30 }
  0x6f   :  { %s5936_s5 = scalar_lea.hbm %s7010_s13, 32768 }
  0x70   :  { %p5937_p12 = scmp.ne.s32.totalorder %s7010_s13, %s5936_s5  ;;  %p5940_p13 = scmp.lt.u32.totalorder %s5936_s5, %s7010_s13 }
  0x72   :  { %p5942_p0 = pnand %p5940_p13, %p5937_p12 }
  0x74   :  { %5945 = shalt.err (!%p5942_p0)
}
  0x75   :  { %s5946_s11 = scalar_lea.vmem %s162_s29, 32768  ;;  %p5951_p2 = scmp.lt.s32.totalorder %s162_s29, %s162_s29 }
  0x76   :  { %p5947_p1 = scmp.ne.s32.totalorder %s162_s29, %s5946_s11  ;;  %p5952_p3 = scmp.lt.s32.totalorder %s5946_s11, %s5946_s11 }
  0x78   :  { %p5953_p4 = por %p5952_p3, %p5951_p2 }
  0x7a   :  { %p5954_p5 = pnand %p5953_p4, %p5947_p1 }
  0x7c   :  { %5957 = shalt.err (!%p5954_p5)
}
  0x7d   :  { %s6183_s4 = smov 512   ;;  %s6184_s24 = smov 32  }
  0x7e   :  { %167 = dma.hbm_to_vmem [thread:$0]  %s7010_s13, 32768, %s162_s29, [#allocation21], %s6183_s4, %s6183_s4, %s6184_s24  }
  0x7f   :  { %s7034_s22 = sld [smem:[#allocation35_spill]] }
  0x85   :  { %s5958_s8 = scalar_lea.hbm %s7034_s22, 128 }
  0x86   :  { %p5959_p6 = scmp.ne.s32.totalorder %s7034_s22, %s5958_s8  ;;  %p5962_p7 = scmp.lt.u32.totalorder %s5958_s8, %s7034_s22 }
  0x88   :  { %p5964_p8 = pnand %p5962_p7, %p5959_p6 }
  0x8a   :  { %5967 = shalt.err (!%p5964_p8)
}
  0x8b   :  { %s5968_s18 = scalar_lea.vmem %s41_s30, 128  ;;  %p5973_p10 = scmp.lt.s32.totalorder %s41_s30, %s41_s30 }
  0x8c   :  { %p5969_p9 = scmp.ne.s32.totalorder %s41_s30, %s5968_s18  ;;  %p5974_p11 = scmp.lt.s32.totalorder %s5968_s18, %s5968_s18 }
  0x8e   :  { %p5975_p12 = por %p5974_p11, %p5973_p10 }
  0x90   :  { %p5976_p13 = pnand %p5975_p12, %p5969_p9 }
  0x92   :  { %5979 = shalt.err (!%p5976_p13)
}
  0x93   :  { %43 = dma.hbm_to_vmem [thread:$0]  %s7034_s22, 128, %s41_s30, [#allocation3]  }
  0x94   :  { %s6185_s5 = smov [#allocation7]   ;;  %s6186_s19 = smov [#allocation10]  }
  0x95   :  { %s62_s25 = sshll.u32 %s6185_s5, 4  ;;  %s81_s21 = sshll.u32 %s6186_s19, 4  ;;  %s63_s25 = int_to_ptr.vmem [resolvable:$true] %s62_s25  ;;  %s82_s21 = int_to_ptr.vmem [resolvable:$true] %s81_s21 }
  0x96   :  { %s7035_s23 = sld [smem:[#allocation37_spill]] }
  0x9c   :  { %s5980_s3 = scalar_lea.hbm %s7035_s23, 128 }
  0x9d   :  { %p5981_p0 = scmp.ne.s32.totalorder %s7035_s23, %s5980_s3  ;;  %p5984_p1 = scmp.lt.u32.totalorder %s5980_s3, %s7035_s23 }
  0x9f   :  { %p5986_p2 = pnand %p5984_p1, %p5981_p0 }
  0xa1   :  { %5989 = shalt.err (!%p5986_p2)
}
  0xa2   :  { %s5990_s30 = scalar_lea.vmem %s63_s25, 128  ;;  %p5995_p4 = scmp.lt.s32.totalorder %s63_s25, %s63_s25 }
  0xa3   :  { %p5991_p3 = scmp.ne.s32.totalorder %s63_s25, %s5990_s30  ;;  %p5996_p5 = scmp.lt.s32.totalorder %s5990_s30, %s5990_s30 }
  0xa5   :  { %p5997_p6 = por %p5996_p5, %p5995_p4 }
  0xa7   :  { %p5998_p7 = pnand %p5997_p6, %p5991_p3 }
  0xa9   :  { %6001 = shalt.err (!%p5998_p7)
}
  0xaa   :  { %65 = dma.hbm_to_vmem [thread:$0]  %s7035_s23, 128, %s63_s25, [#allocation6]  }
  0xab   :  { %s7036_s18 = sld [smem:[#allocation39_spill]] }
  0xb1   :  { %s6002_s13 = scalar_lea.hbm %s7036_s18, 32768 }
  0xb2   :  { %p6003_p8 = scmp.ne.s32.totalorder %s7036_s18, %s6002_s13  ;;  %p6006_p9 = scmp.lt.u32.totalorder %s6002_s13, %s7036_s18 }
  0xb4   :  { %p6008_p10 = pnand %p6006_p9, %p6003_p8 }
  0xb6   :  { %6011 = shalt.err (!%p6008_p10)
}
  0xb7   :  { %s6012_s11 = scalar_lea.vmem %s82_s21, 32768  ;;  %p6017_p12 = scmp.lt.s32.totalorder %s82_s21, %s82_s21 }
  0xb8   :  { %p6013_p11 = scmp.ne.s32.totalorder %s82_s21, %s6012_s11  ;;  %p6018_p13 = scmp.lt.s32.totalorder %s6012_s11, %s6012_s11 }
  0xba   :  { %p6019_p0 = por %p6018_p13, %p6017_p12 }
  0xbc   :  { %p6020_p1 = pnand %p6019_p0, %p6013_p11 }
  0xbe   :  { %6023 = shalt.err (!%p6020_p1)
}
  0xbf   :  { %87 = dma.hbm_to_vmem [thread:$0]  %s7036_s18, 32768, %s82_s21, [#allocation9], %s6183_s4, %s6183_s4, %s6184_s24  }
  0xc0   :  { %s6187_s3 = smov [#allocation13]   ;;  %s6188_s28 = smov [#allocation16]  }
  0xc1   :  { %s105_s26 = sshll.u32 %s6187_s3, 4  ;;  %s129_s8 = sshll.u32 %s6188_s28, 4  ;;  %s106_s26 = int_to_ptr.vmem [resolvable:$true] %s105_s26  ;;  %s130_s8 = int_to_ptr.vmem [resolvable:$true] %s129_s8 }
  0xc2   :  { %s6024_s22 = scalar_lea.hbm %s7004_s7, 32768 }
  0xc3   :  { %p6025_p2 = scmp.ne.s32.totalorder %s7004_s7, %s6024_s22  ;;  %p6028_p3 = scmp.lt.u32.totalorder %s6024_s22, %s7004_s7 }
  0xc5   :  { %p6030_p4 = pnand %p6028_p3, %p6025_p2 }
  0xc7   :  { %6033 = shalt.err (!%p6030_p4)
}
  0xc8   :  { %s6034_s21 = scalar_lea.vmem %s106_s26, 32768  ;;  %p6039_p6 = scmp.lt.s32.totalorder %s106_s26, %s106_s26 }
  0xc9   :  { %p6035_p5 = scmp.ne.s32.totalorder %s106_s26, %s6034_s21  ;;  %p6040_p7 = scmp.lt.s32.totalorder %s6034_s21, %s6034_s21 }
  0xcb   :  { %p6041_p8 = por %p6040_p7, %p6039_p6 }
  0xcd   :  { %p6042_p9 = pnand %p6041_p8, %p6035_p5 }
  0xcf   :  { %6045 = shalt.err (!%p6042_p9)
}
  0xd0   :  { %111 = dma.hbm_to_vmem [thread:$0]  %s7004_s7, 32768, %s106_s26, [#allocation12], %s6183_s4, %s6183_s4, %s6184_s24  }
  0xd1   :  { %s6046_s1 = scalar_lea.hbm %s7007_s10, 32768 }
  0xd2   :  { %p6047_p10 = scmp.ne.s32.totalorder %s7007_s10, %s6046_s1  ;;  %p6050_p11 = scmp.lt.u32.totalorder %s6046_s1, %s7007_s10 }
  0xd4   :  { %p6052_p12 = pnand %p6050_p11, %p6047_p10 }
  0xd6   :  { %6055 = shalt.err (!%p6052_p12)
}
  0xd7   :  { %s6056_s28 = scalar_lea.vmem %s130_s8, 32768  ;;  %p6061_p0 = scmp.lt.s32.totalorder %s130_s8, %s130_s8 }
  0xd8   :  { %p6057_p13 = scmp.ne.s32.totalorder %s130_s8, %s6056_s28  ;;  %p6062_p1 = scmp.lt.s32.totalorder %s6056_s28, %s6056_s28 }
  0xda   :  { %p6063_p2 = por %p6062_p1, %p6061_p0 }
  0xdc   :  { %p6064_p3 = pnand %p6063_p2, %p6057_p13 }
  0xde   :  { %6067 = shalt.err (!%p6064_p3)
}
  0xdf   :  { %135 = dma.hbm_to_vmem [thread:$0]  %s7007_s10, 32768, %s130_s8, [#allocation15], %s6183_s4, %s6183_s4, %s6184_s24  }
  0xe0   :  { %s6189_s27 = smov [#allocation19]   ;;  %s6190_s22 = smov [#allocation22]  }
  0xe1   :  { %s152_s30 = sshll.u32 %s6189_s27, 4  ;;  %s177_s2 = sshll.u32 %s6190_s22, 4  ;;  %s153_s30 = int_to_ptr.vmem [resolvable:$true] %s152_s30  ;;  %s178_s2 = int_to_ptr.vmem [resolvable:$true] %s177_s2 }
  0xe2   :  { %s6068_s13 = scalar_lea.hbm %s7009_s12, 256 }
  0xe3   :  { %p6069_p4 = scmp.ne.s32.totalorder %s7009_s12, %s6068_s13  ;;  %p6072_p5 = scmp.lt.u32.totalorder %s6068_s13, %s7009_s12 }
  0xe5   :  { %p6074_p6 = pnand %p6072_p5, %p6069_p4 }
  0xe7   :  { %6077 = shalt.err (!%p6074_p6)
}
  0xe8   :  { %s6078_s10 = scalar_lea.vmem %s153_s30, 256  ;;  %p6083_p8 = scmp.lt.s32.totalorder %s153_s30, %s153_s30 }
  0xe9   :  { %p6079_p7 = scmp.ne.s32.totalorder %s153_s30, %s6078_s10  ;;  %p6084_p9 = scmp.lt.s32.totalorder %s6078_s10, %s6078_s10 }
  0xeb   :  { %p6085_p10 = por %p6084_p9, %p6083_p8 }
  0xed   :  { %p6086_p11 = pnand %p6085_p10, %p6079_p7 }
  0xef   :  { %6089 = shalt.err (!%p6086_p11)
}
  0xf0   :  { %155 = dma.hbm_to_vmem [thread:$0]  %s7009_s12, 256, %s153_s30, [#allocation18]  }
  0xf1   :  { %s6090_s1 = scalar_lea.hbm %s7013_s16, 8192 }
  0xf2   :  { %p6091_p12 = scmp.ne.s32.totalorder %s7013_s16, %s6090_s1  ;;  %p6094_p13 = scmp.lt.u32.totalorder %s6090_s1, %s7013_s16 }
  0xf4   :  { %p6096_p0 = pnand %p6094_p13, %p6091_p12 }
  0xf6   :  { %6099 = shalt.err (!%p6096_p0)
}
  0xf7   :  { %s6100_s28 = scalar_lea.vmem %s178_s2, 8192  ;;  %p6105_p2 = scmp.lt.s32.totalorder %s178_s2, %s178_s2 }
  0xf8   :  { %p6101_p1 = scmp.ne.s32.totalorder %s178_s2, %s6100_s28  ;;  %p6106_p3 = scmp.lt.s32.totalorder %s6100_s28, %s6100_s28 }
  0xfa   :  { %p6107_p4 = por %p6106_p3, %p6105_p2 }
  0xfc   :  { %p6108_p5 = pnand %p6107_p4, %p6101_p1 }
  0xfe   :  { %6111 = shalt.err (!%p6108_p5)
}
  0xff   :  { %s6191_s12 = smov 128   ;;  %s6192_s7 = smov 8  }
 0x100   :  { %183 = dma.hbm_to_vmem [thread:$0]  %s7013_s16, 8192, %s178_s2, [#allocation21], %s6191_s12, %s6191_s12, %s6192_s7  }
 0x101   :  { %s6193_s30 = smov [#allocation23]   ;;  %s6112_s13 = scalar_lea.hbm %s7014_s17, 8192 }
 0x102   :  { %s189_s22 = sshll.u32 %s6193_s30, 4  ;;  %p6113_p6 = scmp.ne.s32.totalorder %s7014_s17, %s6112_s13  ;;  %s190_s22 = int_to_ptr.vmem [resolvable:$true] %s189_s22 }
 0x103   :  { %p6116_p7 = scmp.lt.u32.totalorder %s6112_s13, %s7014_s17 }
 0x105   :  { %p6118_p8 = pnand %p6116_p7, %p6113_p6 }
 0x107   :  { %6121 = shalt.err (!%p6118_p8)
}
 0x108   :  { %s6122_s10 = scalar_lea.vmem %s190_s22, 8192  ;;  %p6127_p10 = scmp.lt.s32.totalorder %s190_s22, %s190_s22 }
 0x109   :  { %p6123_p9 = scmp.ne.s32.totalorder %s190_s22, %s6122_s10  ;;  %p6128_p11 = scmp.lt.s32.totalorder %s6122_s10, %s6122_s10 }
 0x10b   :  { %p6129_p12 = por %p6128_p11, %p6127_p10 }
 0x10d   :  { %p6130_p13 = pnand %p6129_p12, %p6123_p9 }
 0x10f   :  { %6133 = shalt.err (!%p6130_p13)
}
 0x110   :  { %195 = dma.hbm_to_vmem [thread:$0]  %s7014_s17, 8192, %s190_s22, [#allocation24], %s6191_s12, %s6191_s12, %s6192_s7  }
 0x111   :  { %6156 = dma.done.wait [#allocation3], 128  }
 0x112   :  { %6157 = vsyncadd [#allocation3], 4294967168 }
 0x113   :  { %6158 = dma.done.wait [#allocation6], 8320  }
 0x114   :  { %6159 = vsyncadd [#allocation6], 4294958976 }
 0x115   :  { %6160 = dma.done.wait [#allocation9], 33280  }
 0x116   :  { %6161 = vsyncadd [#allocation9], 4294934016 }
 0x117   :  { %6162 = dma.done.wait [#allocation12], 32832  }
 0x118   :  { %6163 = vsyncadd [#allocation12], 4294934464 }
 0x119   :  { %6164 = dma.done.wait [#allocation15], 32832  }
 0x11a   :  { %6165 = vsyncadd [#allocation15], 4294934464 }
 0x11b   :  { %6166 = dma.done.wait [#allocation18], 320  }
 0x11c   :  { %6167 = vsyncadd [#allocation18], 4294966976 }
 0x11d   :  { %6168 = dma.done.wait [#allocation21], 40960  }
 0x11e   :  { %6169 = vsyncadd [#allocation21], 4294926336 }
 0x11f   :  { %6170 = dma.done.wait [#allocation24], 8192  }
 0x120   :  { %6171 = vsyncadd [#allocation24], 4294959104  ;;  %v6194_v0 = vmov 0.0   ;;  %v6195_v1 = vmov 0   ;;  %v244_v2 = vld [vmem:[#allocation5 + $0x8] sm:$0xff]  ;;  %v246_v4 = vld [vmem:[#allocation5 + $0x18] sm:$0xff] }
 0x121   :  { %417 = vmatprep.mubr.f32.mxu0 %v6194_v0  ;;  %488 = vmatprep.mubr.f32.mxu1 %v6194_v0  ;;  %v252_v3 = vld [vmem:[#allocation5 + $0x48] sm:$0xff]  ;;  %v254_v6 = vld [vmem:[#allocation5 + $0x58] sm:$0xff]  ;;  %v243_v7 = vld [vmem:[#allocation5] sm:$0xff]  ;;  %vm349_vm0 = vcmask 523264   ;;  %s7037_s27 = sld [smem:[#allocation41_spill]]  ;;  %s7038_s20 = sld [smem:[#allocation40_spill]] }
 0x122   :  { %5823 = vset.pattern.permute.xlu0 %v6195_v1  ;;  %v4552_v5 = vpack.c.bf16 %v252_v3, %v244_v2  ;;  %v251_v8 = vld [vmem:[#allocation5 + $0x40] sm:$0xff]  ;;  %v4568_v9 = vpack.c.bf16 %v254_v6, %v246_v4  ;;  %v245_v11 = vld [vmem:[#allocation5 + $0x10] sm:$0xff]  ;;  %v260_v13 = vld [vmem:[#allocation5 + $0x88] sm:$0xff]  ;;  %s6196_s0 = smov [#allocation25]  }
 0x123   :  { %v4554_v10 = vpack.c.bf16 %v251_v8, %v243_v7  ;;  %v253_v12 = vld [vmem:[#allocation5 + $0x50] sm:$0xff]  ;;  %v268_v15 = vld [vmem:[#allocation5 + $0xc8] sm:$0xff]  ;;  %v262_v16 = vld [vmem:[#allocation5 + $0x98] sm:$0xff]  ;;  %s4391_s13 = sshll.u32 %s6196_s0, 4  ;;  %s4392_s13 = int_to_ptr.vmem [resolvable:$true] %s4391_s13 }
 0x124   :  { %4553 = vmatprep.subr.bf16.mxu0 %v4552_v5  ;;  %v4570_v14 = vpack.c.bf16 %v253_v12, %v245_v11  ;;  %v270_v17 = vld [vmem:[#allocation5 + $0xd8] sm:$0xff]  ;;  %4569 = vmatprep.subr.bf16.mxu1 %v4568_v9  ;;  %v4556_v18 = vpack.c.bf16 %v268_v15, %v260_v13  ;;  %v259_v20 = vld [vmem:[#allocation5 + $0x80] sm:$0xff]  ;;  %v261_v22 = vld [vmem:[#allocation5 + $0x90] sm:$0xff]  ;;  %s6134_s21 = scalar_lea.vmem %s4392_s13, 128  ;;  %p6139_p1 = scmp.lt.s32.totalorder %s4392_s13, %s4392_s13 }
 0x125   :  { %4555 = vmatpush1.bf16.msra.mxu0 %v4554_v10  ;;  %v4572_v19 = vpack.c.bf16 %v270_v17, %v262_v16  ;;  %v267_v21 = vld [vmem:[#allocation5 + $0xc0] sm:$0xff]  ;;  %v269_v24 = vld [vmem:[#allocation5 + $0xd0] sm:$0xff]  ;;  %v276_v25 = vld [vmem:[#allocation5 + $0x108] sm:$0xff]  ;;  %p6135_p0 = scmp.ne.s32.totalorder %s4392_s13, %s6134_s21  ;;  %p6140_p2 = scmp.lt.s32.totalorder %s6134_s21, %s6134_s21 }
 0x126   :  { %4571 = vmatpush1.bf16.msra.mxu1 %v4570_v14  ;;  %v4558_v23 = vpack.c.bf16 %v267_v21, %v259_v20  ;;  %v284_v26 = vld [vmem:[#allocation5 + $0x148] sm:$0xff]  ;;  %4557 = vmatprep.subr.bf16.mxu0 %v4556_v18  ;;  %v4574_v27 = vpack.c.bf16 %v269_v24, %v261_v22  ;;  %v278_v29 = vld [vmem:[#allocation5 + $0x118] sm:$0xff]  ;;  %v275_v31 = vld [vmem:[#allocation5 + $0x100] sm:$0xff] }
 0x127   :  { %4573 = vmatprep.subr.bf16.mxu1 %v4572_v19  ;;  %v4560_v28 = vpack.c.bf16 %v284_v26, %v276_v25  ;;  %v286_v30 = vld [vmem:[#allocation5 + $0x158] sm:$0xff]  ;;  %v283_v33 = vld [vmem:[#allocation5 + $0x140] sm:$0xff]  ;;  %v277_v34 = vld [vmem:[#allocation5 + $0x110] sm:$0xff]  ;;  %p6141_p3 = por %p6140_p2, %p6139_p1 }
 0x128   :  { %v4576_v32 = vpack.c.bf16 %v286_v30, %v278_v29  ;;  %v285_v35 = vld [vmem:[#allocation5 + $0x150] sm:$0xff]  ;;  %v4562_v36 = vpack.c.bf16 %v283_v33, %v275_v31  ;;  %v292_v37 = vld [vmem:[#allocation5 + $0x188] sm:$0xff]  ;;  %v294_v39 = vld [vmem:[#allocation5 + $0x198] sm:$0xff] }
 0x129   :  { %4559 = vmatpush1.bf16.msra.mxu0 %v4558_v23  ;;  %v300_v38 = vld [vmem:[#allocation5 + $0x1c8] sm:$0xff]  ;;  %v4578_v40 = vpack.c.bf16 %v285_v35, %v277_v34  ;;  %v302_v42 = vld [vmem:[#allocation5 + $0x1d8] sm:$0xff]  ;;  %v291_v43 = vld [vmem:[#allocation5 + $0x180] sm:$0xff]  ;;  %p6142_p4 = pnand %p6141_p3, %p6135_p0 }
 0x12a   :  { %4575 = vmatpush1.bf16.msra.mxu1 %v4574_v27  ;;  %4561 = vmatprep.subr.bf16.mxu0 %v4560_v28  ;;  %v4564_v41 = vpack.c.bf16 %v300_v38, %v292_v37  ;;  %v299_v44 = vld [vmem:[#allocation5 + $0x1c0] sm:$0xff]  ;;  %v4580_v45 = vpack.c.bf16 %v302_v42, %v294_v39  ;;  %v293_v46 = vld [vmem:[#allocation5 + $0x190] sm:$0xff]  ;;  %v6484_v48 = vld [vmem:[#allocation2] sm:$0xff] }
 0x12b   :  { %4577 = vmatprep.subr.bf16.mxu1 %v4576_v32  ;;  %v301_v47 = vld [vmem:[#allocation5 + $0x1d0] sm:$0xff]  ;;  %v248_v49 = vld [vmem:[#allocation5 + $0x28] sm:$0xff]  ;;  %v250_v51 = vld [vmem:[#allocation5 + $0x38] sm:$0xff]  ;;  %642 = vperm.xlu0 %5823, %v6484_v48   ;;  %v4566_v52 = vpack.c.bf16 %v299_v44, %v291_v43 }
 0x12c   :  { %v256_v50 = vld [vmem:[#allocation5 + $0x68] sm:$0xff]  ;;  %v258_v53 = vld [vmem:[#allocation5 + $0x78] sm:$0xff]  ;;  %v4582_v54 = vpack.c.bf16 %v301_v47, %v293_v46  ;;  %v247_v56 = vld [vmem:[#allocation5 + $0x20] sm:$0xff] }
 0x12d   :  { %4563 = vmatpush1.bf16.msra.mxu0 %v4562_v36  ;;  %v4584_v55 = vpack.c.bf16 %v256_v50, %v248_v49  ;;  %v255_v57 = vld [vmem:[#allocation5 + $0x60] sm:$0xff]  ;;  %v249_v58 = vld [vmem:[#allocation5 + $0x30] sm:$0xff]  ;;  %v4600_v59 = vpack.c.bf16 %v258_v53, %v250_v51  ;;  %v264_v61 = vld [vmem:[#allocation5 + $0xa8] sm:$0xff] }
 0x12e   :  { %4579 = vmatpush1.bf16.msra.mxu1 %v4578_v40  ;;  %4565 = vmatprep.subr.bf16.mxu0 %v4564_v41  ;;  %v257_v60 = vld [vmem:[#allocation5 + $0x70] sm:$0xff]  ;;  %v272_v62 = vld [vmem:[#allocation5 + $0xe8] sm:$0xff]  ;;  %v266_v63 = vld [vmem:[#allocation5 + $0xb8] sm:$0xff]  ;;  %v4586_v2 = vpack.c.bf16 %v255_v57, %v247_v56 }
 0x12f   :  { %4581 = vmatprep.subr.bf16.mxu1 %v4580_v45  ;;  %v274_v1 = vld [vmem:[#allocation5 + $0xf8] sm:$0xff]  ;;  %v4602_v3 = vpack.c.bf16 %v257_v60, %v249_v58  ;;  %v4588_v4 = vpack.c.bf16 %v272_v62, %v264_v61  ;;  %v263_v5 = vld [vmem:[#allocation5 + $0xa0] sm:$0xff]  ;;  %v265_v7 = vld [vmem:[#allocation5 + $0xb0] sm:$0xff] }
 0x130   :  { %v271_v6 = vld [vmem:[#allocation5 + $0xe0] sm:$0xff]  ;;  %v4604_v8 = vpack.c.bf16 %v274_v1, %v266_v63  ;;  %v273_v9 = vld [vmem:[#allocation5 + $0xf0] sm:$0xff]  ;;  %v280_v10 = vld [vmem:[#allocation5 + $0x128] sm:$0xff] }
 0x131   :  { %4567 = vmatpush1.bf16.msra.mxu0 %v4566_v52  ;;  %v288_v11 = vld [vmem:[#allocation5 + $0x168] sm:$0xff]  ;;  %v282_v12 = vld [vmem:[#allocation5 + $0x138] sm:$0xff]  ;;  %v4590_v14 = vpack.c.bf16 %v271_v6, %v263_v5  ;;  %v4606_v15 = vpack.c.bf16 %v273_v9, %v265_v7  ;;  %v279_v17 = vld [vmem:[#allocation5 + $0x120] sm:$0xff] }
 0x132   :  { %4583 = vmatpush1.bf16.msra.mxu1 %v4582_v54  ;;  %4585 = vmatprep.subr.bf16.mxu0 %v4584_v55  ;;  %v290_v13 = vld [vmem:[#allocation5 + $0x178] sm:$0xff]  ;;  %v4592_v16 = vpack.c.bf16 %v288_v11, %v280_v10  ;;  %v287_v18 = vld [vmem:[#allocation5 + $0x160] sm:$0xff]  ;;  %v281_v19 = vld [vmem:[#allocation5 + $0x130] sm:$0xff] }
 0x133   :  { %4601 = vmatprep.subr.bf16.mxu1 %v4600_v59  ;;  %v4608_v20 = vpack.c.bf16 %v290_v13, %v282_v12  ;;  %v289_v21 = vld [vmem:[#allocation5 + $0x170] sm:$0xff]  ;;  %v296_v22 = vld [vmem:[#allocation5 + $0x1a8] sm:$0xff]  ;;  %v298_v24 = vld [vmem:[#allocation5 + $0x1b8] sm:$0xff]  ;;  %v4594_v26 = vpack.c.bf16 %v287_v18, %v279_v17 }
 0x134   :  { %4407 = vmatmul.mubr.msk.f32.vlgmr.msra.gmra.mrb[0].mxu0 %vm349_vm0, %v6484_v48  ;;  %v304_v23 = vld [vmem:[#allocation5 + $0x1e8] sm:$0xff]  ;;  %v306_v25 = vld [vmem:[#allocation5 + $0x1f8] sm:$0xff]  ;;  %v4610_v27 = vpack.c.bf16 %v289_v21, %v281_v19  ;;  %v295_v29 = vld [vmem:[#allocation5 + $0x1a0] sm:$0xff] }
 0x135   :  { %4408 = vmatmul.mubr.msk.f32.vlgmr.msra.gmra.mrb[0].mxu1 %vm349_vm0, %v6484_v48  ;;  %4587 = vmatpush1.bf16.msra.mxu0 %v4586_v2  ;;  %v4596_v28 = vpack.c.bf16 %v304_v23, %v296_v22  ;;  %v303_v30 = vld [vmem:[#allocation5 + $0x1e0] sm:$0xff]  ;;  %v297_v31 = vld [vmem:[#allocation5 + $0x1b0] sm:$0xff]  ;;  %v4612_v32 = vpack.c.bf16 %v306_v25, %v298_v24  ;;  %v993_v40 = vld [vmem:[#allocation10] sm:$0xff] }
 0x136   :  { %4603 = vmatpush1.bf16.msra.mxu1 %v4602_v3  ;;  %4589 = vmatprep.subr.bf16.mxu0 %v4588_v4  ;;  %v305_v33 = vld [vmem:[#allocation5 + $0x1f0] sm:$0xff]  ;;  %v996_v36 = vld [vmem:[#allocation10 + $0x18] sm:$0xff]  ;;  %v4598_v38 = vpack.c.bf16 %v303_v30, %v295_v29  ;;  %v997_v41 = vld [vmem:[#allocation10 + $0x20] sm:$0xff] }
 0x137   :  { %4605 = vmatprep.subr.bf16.mxu1 %v4604_v8  ;;  %559 = vmatprep.mubr.f32.mxu0 %v6194_v0  ;;  %v994_v34 = vld [vmem:[#allocation10 + $0x8] sm:$0xff]  ;;  %v1000_v37 = vld [vmem:[#allocation10 + $0x38] sm:$0xff]  ;;  %v995_v42 = vld [vmem:[#allocation10 + $0x10] sm:$0xff]  ;;  %v4618_v50 = vpack.c.bf16 %v997_v41, %v993_v40 }
 0x138   :  { %630 = vmatprep.mubr.f32.mxu1 %v6194_v0  ;;  %v998_v35 = vld [vmem:[#allocation10 + $0x28] sm:$0xff]  ;;  %v4614_v0 = vpack.c.bf16 %v305_v33, %v297_v31  ;;  %v4744_v43 = vpack.c.bf16 %v1000_v37, %v996_v36  ;;  %v999_v44 = vld [vmem:[#allocation10 + $0x30] sm:$0xff]  ;;  %v1004_v47 = vld [vmem:[#allocation10 + $0x58] sm:$0xff] }
 0x139   :  { %4591 = vmatpush1.bf16.msra.mxu0 %v4590_v14  ;;  %v4616_v39 = vpack.c.bf16 %v998_v35, %v994_v34  ;;  %v1002_v45 = vld [vmem:[#allocation10 + $0x48] sm:$0xff]  ;;  %v1008_v49 = vld [vmem:[#allocation10 + $0x78] sm:$0xff]  ;;  %v4746_v51 = vpack.c.bf16 %v999_v44, %v995_v42  ;;  %v1001_v53 = vld [vmem:[#allocation10 + $0x40] sm:$0xff] }
 0x13a   :  { %4607 = vmatpush1.bf16.msra.mxu1 %v4606_v15  ;;  %4593 = vmatprep.subr.bf16.mxu0 %v4592_v16  ;;  %v1006_v46 = vld [vmem:[#allocation10 + $0x68] sm:$0xff]  ;;  %v1005_v54 = vld [vmem:[#allocation10 + $0x60] sm:$0xff]  ;;  %v1003_v55 = vld [vmem:[#allocation10 + $0x50] sm:$0xff]  ;;  %v4748_v56 = vpack.c.bf16 %v1008_v49, %v1004_v47 }
 0x13b   :  { %4609 = vmatprep.subr.bf16.mxu1 %v4608_v20  ;;  %v4620_v52 = vpack.c.bf16 %v1006_v46, %v1002_v45  ;;  %v1007_v57 = vld [vmem:[#allocation10 + $0x70] sm:$0xff]  ;;  %v1010_v58 = vld [vmem:[#allocation10 + $0x88] sm:$0xff]  ;;  %v1012_v60 = vld [vmem:[#allocation10 + $0x98] sm:$0xff]  ;;  %v4622_v62 = vpack.c.bf16 %v1005_v54, %v1001_v53 }
 0x13c   :  { %v1014_v59 = vld [vmem:[#allocation10 + $0xa8] sm:$0xff]  ;;  %v1016_v61 = vld [vmem:[#allocation10 + $0xb8] sm:$0xff]  ;;  %v4750_v63 = vpack.c.bf16 %v1007_v57, %v1003_v55  ;;  %v1009_v2 = vld [vmem:[#allocation10 + $0x80] sm:$0xff] }
 0x13d   :  { %4595 = vmatpush1.bf16.msra.mxu0 %v4594_v26  ;;  %v4624_v1 = vpack.c.bf16 %v1014_v59, %v1010_v58  ;;  %v1013_v3 = vld [vmem:[#allocation10 + $0xa0] sm:$0xff]  ;;  %v1011_v4 = vld [vmem:[#allocation10 + $0x90] sm:$0xff]  ;;  %v4752_v5 = vpack.c.bf16 %v1016_v61, %v1012_v60  ;;  %v1018_v7 = vld [vmem:[#allocation10 + $0xc8] sm:$0xff] }
 0x13e   :  { %4611 = vmatpush1.bf16.msra.mxu1 %v4610_v27  ;;  %4597 = vmatprep.subr.bf16.mxu0 %v4596_v28  ;;  %v1015_v6 = vld [vmem:[#allocation10 + $0xb0] sm:$0xff]  ;;  %v1022_v8 = vld [vmem:[#allocation10 + $0xe8] sm:$0xff]  ;;  %v1020_v9 = vld [vmem:[#allocation10 + $0xd8] sm:$0xff]  ;;  %v4626_v11 = vpack.c.bf16 %v1013_v3, %v1009_v2 }
 0x13f   :  { %4613 = vmatprep.subr.bf16.mxu1 %v4612_v32  ;;  %v1024_v10 = vld [vmem:[#allocation10 + $0xf8] sm:$0xff]  ;;  %v4628_v12 = vpack.c.bf16 %v1022_v8, %v1018_v7  ;;  %v1017_v13 = vld [vmem:[#allocation10 + $0xc0] sm:$0xff]  ;;  %v1019_v15 = vld [vmem:[#allocation10 + $0xd0] sm:$0xff] }
 0x140   :  { %v1021_v14 = vld [vmem:[#allocation10 + $0xe0] sm:$0xff]  ;;  %v4756_v16 = vpack.c.bf16 %v1024_v10, %v1020_v9  ;;  %v1023_v17 = vld [vmem:[#allocation10 + $0xf0] sm:$0xff]  ;;  %v1026_v18 = vld [vmem:[#allocation10 + $0x108] sm:$0xff] }
 0x141   :  { %4599 = vmatpush1.bf16.msra.mxu0 %v4598_v38  ;;  %v1030_v19 = vld [vmem:[#allocation10 + $0x128] sm:$0xff]  ;;  %v1028_v20 = vld [vmem:[#allocation10 + $0x118] sm:$0xff]  ;;  %v4630_v22 = vpack.c.bf16 %v1021_v14, %v1017_v13  ;;  %v4758_v23 = vpack.c.bf16 %v1023_v17, %v1019_v15  ;;  %v1025_v25 = vld [vmem:[#allocation10 + $0x100] sm:$0xff] }
 0x142   :  { %4615 = vmatpush1.bf16.msra.mxu1 %v4614_v0  ;;  %4617 = vmatprep.subr.bf16.mxu0 %v4616_v39  ;;  %v1032_v21 = vld [vmem:[#allocation10 + $0x138] sm:$0xff]  ;;  %v4632_v24 = vpack.c.bf16 %v1030_v19, %v1026_v18  ;;  %v1029_v26 = vld [vmem:[#allocation10 + $0x120] sm:$0xff]  ;;  %v1027_v27 = vld [vmem:[#allocation10 + $0x110] sm:$0xff] }
 0x143   :  { %4745 = vmatprep.subr.bf16.mxu1 %v4744_v43  ;;  %v4760_v28 = vpack.c.bf16 %v1032_v21, %v1028_v20  ;;  %v1031_v29 = vld [vmem:[#allocation10 + $0x130] sm:$0xff]  ;;  %v1034_v30 = vld [vmem:[#allocation10 + $0x148] sm:$0xff]  ;;  %v1036_v32 = vld [vmem:[#allocation10 + $0x158] sm:$0xff]  ;;  %v4634_v34 = vpack.c.bf16 %v1029_v26, %v1025_v25 }
 0x144   :  { %4409 = vmatmul.mubr.msk.f32.vlgmr.msra.gmra.mrb[2].mxu0 %vm349_vm0, %v6484_v48  ;;  %v1038_v31 = vld [vmem:[#allocation10 + $0x168] sm:$0xff]  ;;  %v1040_v33 = vld [vmem:[#allocation10 + $0x178] sm:$0xff]  ;;  %v4762_v35 = vpack.c.bf16 %v1031_v29, %v1027_v27  ;;  %v1033_v37 = vld [vmem:[#allocation10 + $0x140] sm:$0xff] }
 0x145   :  { %4410 = vmatmul.mubr.msk.f32.vlgmr.msra.gmra.mrb[2].mxu1 %vm349_vm0, %v6484_v48  ;;  %4619 = vmatpush1.bf16.msra.mxu0 %v4618_v50  ;;  %v4754_v48 = vpack.c.bf16 %v1015_v6, %v1011_v4  ;;  %v4636_v36 = vpack.c.bf16 %v1038_v31, %v1034_v30  ;;  %v1037_v38 = vld [vmem:[#allocation10 + $0x160] sm:$0xff]  ;;  %v1035_v0 = vld [vmem:[#allocation10 + $0x150] sm:$0xff]  ;;  %v4764_v39 = vpack.c.bf16 %v1040_v33, %v1036_v32  ;;  %v1042_v41 = vld [vmem:[#allocation10 + $0x188] sm:$0xff] }
 0x146   :  { %4747 = vmatpush1.bf16.msra.mxu1 %v4746_v51  ;;  %4621 = vmatprep.subr.bf16.mxu0 %v4620_v52  ;;  %v1039_v40 = vld [vmem:[#allocation10 + $0x170] sm:$0xff]  ;;  %v1046_v42 = vld [vmem:[#allocation10 + $0x1a8] sm:$0xff]  ;;  %v1044_v43 = vld [vmem:[#allocation10 + $0x198] sm:$0xff]  ;;  %v4638_v45 = vpack.c.bf16 %v1037_v38, %v1033_v37 }
 0x147   :  { %4749 = vmatprep.subr.bf16.mxu1 %v4748_v56  ;;  %v1048_v44 = vld [vmem:[#allocation10 + $0x1b8] sm:$0xff]  ;;  %v4766_v46 = vpack.c.bf16 %v1039_v40, %v1035_v0  ;;  %v4640_v47 = vpack.c.bf16 %v1046_v42, %v1042_v41  ;;  %v1041_v49 = vld [vmem:[#allocation10 + $0x180] sm:$0xff]  ;;  %v1043_v51 = vld [vmem:[#allocation10 + $0x190] sm:$0xff] }
 0x148   :  { %v1045_v50 = vld [vmem:[#allocation10 + $0x1a0] sm:$0xff]  ;;  %v4768_v52 = vpack.c.bf16 %v1048_v44, %v1044_v43  ;;  %v1047_v53 = vld [vmem:[#allocation10 + $0x1b0] sm:$0xff]  ;;  %v1050_v54 = vld [vmem:[#allocation10 + $0x1c8] sm:$0xff] }
 0x149   :  { %4623 = vmatpush1.bf16.msra.mxu0 %v4622_v62  ;;  %v1054_v55 = vld [vmem:[#allocation10 + $0x1e8] sm:$0xff]  ;;  %v1052_v56 = vld [vmem:[#allocation10 + $0x1d8] sm:$0xff]  ;;  %v4642_v58 = vpack.c.bf16 %v1045_v50, %v1041_v49  ;;  %v4770_v59 = vpack.c.bf16 %v1047_v53, %v1043_v51  ;;  %v1049_v61 = vld [vmem:[#allocation10 + $0x1c0] sm:$0xff] }
 0x14a   :  { %4751 = vmatpush1.bf16.msra.mxu1 %v4750_v63  ;;  %4625 = vmatprep.subr.bf16.mxu0 %v4624_v1  ;;  %v1056_v57 = vld [vmem:[#allocation10 + $0x1f8] sm:$0xff]  ;;  %v4644_v60 = vpack.c.bf16 %v1054_v55, %v1050_v54  ;;  %v1053_v62 = vld [vmem:[#allocation10 + $0x1e0] sm:$0xff]  ;;  %v1051_v63 = vld [vmem:[#allocation10 + $0x1d0] sm:$0xff] }
 0x14b   :  { %4753 = vmatprep.subr.bf16.mxu1 %v4752_v5  ;;  %v4772_v1 = vpack.c.bf16 %v1056_v57, %v1052_v56  ;;  %v1055_v2 = vld [vmem:[#allocation10 + $0x1f0] sm:$0xff]  ;;  %v1058_v3 = vld [vmem:[#allocation10 + $0x208] sm:$0xff]  ;;  %v1060_v5 = vld [vmem:[#allocation10 + $0x218] sm:$0xff]  ;;  %v4646_v7 = vpack.c.bf16 %v1053_v62, %v1049_v61 }
 0x14c   :  { %v1062_v4 = vld [vmem:[#allocation10 + $0x228] sm:$0xff]  ;;  %v1064_v6 = vld [vmem:[#allocation10 + $0x238] sm:$0xff]  ;;  %v4774_v8 = vpack.c.bf16 %v1055_v2, %v1051_v63  ;;  %v1057_v10 = vld [vmem:[#allocation10 + $0x200] sm:$0xff] }
 0x14d   :  { %4627 = vmatpush1.bf16.msra.mxu0 %v4626_v11  ;;  %v4648_v9 = vpack.c.bf16 %v1062_v4, %v1058_v3  ;;  %v1061_v11 = vld [vmem:[#allocation10 + $0x220] sm:$0xff]  ;;  %v1063_v13 = vld [vmem:[#allocation10 + $0x230] sm:$0xff]  ;;  %v1066_v14 = vld [vmem:[#allocation10 + $0x248] sm:$0xff] }
 0x14e   :  { %4755 = vmatpush1.bf16.msra.mxu1 %v4754_v48  ;;  %4629 = vmatprep.subr.bf16.mxu0 %v4628_v12  ;;  %v1059_v48 = vld [vmem:[#allocation10 + $0x210] sm:$0xff]  ;;  %v4776_v12 = vpack.c.bf16 %v1064_v6, %v1060_v5  ;;  %v1070_v15 = vld [vmem:[#allocation10 + $0x268] sm:$0xff]  ;;  %v1072_v17 = vld [vmem:[#allocation10 + $0x278] sm:$0xff]  ;;  %v4650_v18 = vpack.c.bf16 %v1061_v11, %v1057_v10 }
 0x14f   :  { %4757 = vmatprep.subr.bf16.mxu1 %v4756_v16  ;;  %v1068_v16 = vld [vmem:[#allocation10 + $0x258] sm:$0xff]  ;;  %v4778_v19 = vpack.c.bf16 %v1063_v13, %v1059_v48  ;;  %v4652_v20 = vpack.c.bf16 %v1070_v15, %v1066_v14  ;;  %v1065_v21 = vld [vmem:[#allocation10 + $0x240] sm:$0xff]  ;;  %v1071_v25 = vld [vmem:[#allocation10 + $0x270] sm:$0xff] }
 0x150   :  { %v1074_v26 = vld [vmem:[#allocation10 + $0x288] sm:$0xff]  ;;  %v1080_v29 = vld [vmem:[#allocation10 + $0x2b8] sm:$0xff]  ;;  %v1073_v33 = vld [vmem:[#allocation10 + $0x280] sm:$0xff] }
 0x151   :  { %4631 = vmatpush1.bf16.msra.mxu0 %v4630_v22  ;;  %v1069_v22 = vld [vmem:[#allocation10 + $0x260] sm:$0xff]  ;;  %v1078_v27 = vld [vmem:[#allocation10 + $0x2a8] sm:$0xff]  ;;  %v1079_v37 = vld [vmem:[#allocation10 + $0x2b0] sm:$0xff] }
 0x152   :  { %4759 = vmatpush1.bf16.msra.mxu1 %v4758_v23  ;;  %4633 = vmatprep.subr.bf16.mxu0 %v4632_v24  ;;  %v1067_v23 = vld [vmem:[#allocation10 + $0x250] sm:$0xff]  ;;  %v4780_v24 = vpack.c.bf16 %v1072_v17, %v1068_v16  ;;  %v4654_v30 = vpack.c.bf16 %v1069_v22, %v1065_v21  ;;  %v4656_v32 = vpack.c.bf16 %v1078_v27, %v1074_v26  ;;  %v1082_v38 = vld [vmem:[#allocation10 + $0x2c8] sm:$0xff]  ;;  %v1088_v40 = vld [vmem:[#allocation10 + $0x2f8] sm:$0xff] }
 0x153   :  { %4761 = vmatprep.subr.bf16.mxu1 %v4760_v28  ;;  %v1076_v28 = vld [vmem:[#allocation10 + $0x298] sm:$0xff]  ;;  %v4782_v31 = vpack.c.bf16 %v1071_v25, %v1067_v23  ;;  %v1086_v0 = vld [vmem:[#allocation10 + $0x2e8] sm:$0xff]  ;;  %v1081_v44 = vld [vmem:[#allocation10 + $0x2c0] sm:$0xff] }
 0x154   :  { %v4660_v43 = vpack.c.bf16 %v1086_v0, %v1082_v38  ;;  %v1087_v49 = vld [vmem:[#allocation10 + $0x2f0] sm:$0xff]  ;;  %v1090_v50 = vld [vmem:[#allocation10 + $0x308] sm:$0xff]  ;;  %v1096_v53 = vld [vmem:[#allocation10 + $0x338] sm:$0xff] }
 0x155   :  { %4635 = vmatpush1.bf16.msra.mxu0 %v4634_v34  ;;  %v1077_v34 = vld [vmem:[#allocation10 + $0x2a0] sm:$0xff]  ;;  %v1094_v51 = vld [vmem:[#allocation10 + $0x328] sm:$0xff]  ;;  %v1095_v61 = vld [vmem:[#allocation10 + $0x330] sm:$0xff] }
 0x156   :  { %4763 = vmatpush1.bf16.msra.mxu1 %v4762_v35  ;;  %4637 = vmatprep.subr.bf16.mxu0 %v4636_v36  ;;  %v1075_v35 = vld [vmem:[#allocation10 + $0x290] sm:$0xff]  ;;  %v4784_v36 = vpack.c.bf16 %v1080_v29, %v1076_v28  ;;  %v4658_v41 = vpack.c.bf16 %v1077_v34, %v1073_v33  ;;  %v4664_v56 = vpack.c.bf16 %v1094_v51, %v1090_v50  ;;  %v1089_v57 = vld [vmem:[#allocation10 + $0x300] sm:$0xff]  ;;  %v1098_v62 = vld [vmem:[#allocation10 + $0x348] sm:$0xff] }
 0x157   :  { %4765 = vmatprep.subr.bf16.mxu1 %v4764_v39  ;;  %v1084_v39 = vld [vmem:[#allocation10 + $0x2d8] sm:$0xff]  ;;  %v4786_v42 = vpack.c.bf16 %v1079_v37, %v1075_v35  ;;  %v1102_v63 = vld [vmem:[#allocation10 + $0x368] sm:$0xff]  ;;  %v1097_v6 = vld [vmem:[#allocation10 + $0x340] sm:$0xff] }
 0x158   :  { %v1104_v2 = vld [vmem:[#allocation10 + $0x378] sm:$0xff]  ;;  %v4668_v5 = vpack.c.bf16 %v1102_v63, %v1098_v62  ;;  %v1103_v10 = vld [vmem:[#allocation10 + $0x370] sm:$0xff]  ;;  %v1110_v13 = vld [vmem:[#allocation10 + $0x3a8] sm:$0xff] }
 0x159   :  { %4639 = vmatpush1.bf16.msra.mxu0 %v4638_v45  ;;  %v1085_v45 = vld [vmem:[#allocation10 + $0x2e0] sm:$0xff]  ;;  %v1108_v14 = vld [vmem:[#allocation10 + $0x398] sm:$0xff]  ;;  %v1118_v25 = vld [vmem:[#allocation10 + $0x3e8] sm:$0xff] }
 0x15a   :  { %4767 = vmatpush1.bf16.msra.mxu1 %v4766_v46  ;;  %4641 = vmatprep.subr.bf16.mxu0 %v4640_v47  ;;  %v1083_v46 = vld [vmem:[#allocation10 + $0x2d0] sm:$0xff]  ;;  %v4788_v47 = vpack.c.bf16 %v1088_v40, %v1084_v39  ;;  %v4662_v54 = vpack.c.bf16 %v1085_v45, %v1081_v44  ;;  %v1112_v15 = vld [vmem:[#allocation10 + $0x3b8] sm:$0xff]  ;;  %v1105_v16 = vld [vmem:[#allocation10 + $0x380] sm:$0xff] }
 0x15b   :  { %4769 = vmatprep.subr.bf16.mxu1 %v4768_v52  ;;  %v1092_v52 = vld [vmem:[#allocation10 + $0x318] sm:$0xff]  ;;  %v4790_v55 = vpack.c.bf16 %v1087_v49, %v1083_v46  ;;  %v1109_v17 = vld [vmem:[#allocation10 + $0x3a0] sm:$0xff]  ;;  %v4800_v21 = vpack.c.bf16 %v1112_v15, %v1108_v14  ;;  %v1115_v33 = vld [vmem:[#allocation10 + $0x3d0] sm:$0xff] }
 0x15c   :  { %v4674_v22 = vpack.c.bf16 %v1109_v17, %v1105_v16  ;;  %v1116_v26 = vld [vmem:[#allocation10 + $0x3d8] sm:$0xff]  ;;  %v1113_v29 = vld [vmem:[#allocation10 + $0x3c0] sm:$0xff]  ;;  %v1119_v34 = vld [vmem:[#allocation10 + $0x3f0] sm:$0xff] }
 0x15d   :  { %4643 = vmatpush1.bf16.msra.mxu0 %v4642_v58  ;;  %v1093_v58 = vld [vmem:[#allocation10 + $0x320] sm:$0xff]  ;;  %v1120_v28 = vld [vmem:[#allocation10 + $0x3f8] sm:$0xff]  ;;  %v4806_v35 = vpack.c.bf16 %v1119_v34, %v1115_v33  ;;  %v1126_v37 = vld [vmem:[#allocation10 + $0x428] sm:$0xff] }
 0x15e   :  { %4771 = vmatpush1.bf16.msra.mxu1 %v4770_v59  ;;  %4645 = vmatprep.subr.bf16.mxu0 %v4644_v60  ;;  %v1091_v59 = vld [vmem:[#allocation10 + $0x310] sm:$0xff]  ;;  %v4792_v60 = vpack.c.bf16 %v1096_v53, %v1092_v52  ;;  %v4666_v3 = vpack.c.bf16 %v1093_v58, %v1089_v57  ;;  %v1124_v38 = vld [vmem:[#allocation10 + $0x418] sm:$0xff]  ;;  %v6505_v45 = vld [vmem:[#allocation8 + $0x8] sm:$0xff] }
 0x15f   :  { %4773 = vmatprep.subr.bf16.mxu1 %v4772_v1  ;;  %v1100_v1 = vld [vmem:[#allocation10 + $0x358] sm:$0xff]  ;;  %v4794_v4 = vpack.c.bf16 %v1095_v61, %v1091_v59  ;;  %v6517_v51 = vld [vmem:[#allocation8 + $0x10] sm:$0xff] }
 0x160   :  { %v1128_v39 = vld [vmem:[#allocation10 + $0x438] sm:$0xff] }
 0x161   :  { %4647 = vmatpush1.bf16.msra.mxu0 %v4646_v7  ;;  %v1101_v7 = vld [vmem:[#allocation10 + $0x360] sm:$0xff]  ;;  %v4808_v40 = vpack.c.bf16 %v1128_v39, %v1124_v38  ;;  %v6519_v52 = vld [vmem:[#allocation8 + $0x18] sm:$0xff] }
 0x162   :  { %4775 = vmatpush1.bf16.msra.mxu1 %v4774_v8  ;;  %4649 = vmatprep.subr.bf16.mxu0 %v4648_v9  ;;  %v4796_v8 = vpack.c.bf16 %v1104_v2, %v1100_v1  ;;  %v1099_v9 = vld [vmem:[#allocation10 + $0x350] sm:$0xff]  ;;  %v4670_v11 = vpack.c.bf16 %v1101_v7, %v1097_v6 }
 0x163   :  { %4777 = vmatprep.subr.bf16.mxu1 %v4776_v12  ;;  %v4798_v48 = vpack.c.bf16 %v1103_v10, %v1099_v9  ;;  %v1106_v12 = vld [vmem:[#allocation10 + $0x388] sm:$0xff] }
 0x165   :  { %4651 = vmatpush1.bf16.msra.mxu0 %v4650_v18  ;;  %v4672_v18 = vpack.c.bf16 %v1110_v13, %v1106_v12 }
 0x166   :  { %4779 = vmatpush1.bf16.msra.mxu1 %v4778_v19  ;;  %4653 = vmatprep.subr.bf16.mxu0 %v4652_v20  ;;  %v1107_v19 = vld [vmem:[#allocation10 + $0x390] sm:$0xff] }
 0x167   :  { %4781 = vmatprep.subr.bf16.mxu1 %v4780_v24  ;;  %v1111_v20 = vld [vmem:[#allocation10 + $0x3b0] sm:$0xff]  ;;  %v1114_v24 = vld [vmem:[#allocation10 + $0x3c8] sm:$0xff] }
 0x168   :  { %v4802_v23 = vpack.c.bf16 %v1111_v20, %v1107_v19  ;;  %v4676_v27 = vpack.c.bf16 %v1118_v25, %v1114_v24 }
 0x169   :  { %4655 = vmatpush1.bf16.msra.mxu0 %v4654_v30  ;;  %v1117_v30 = vld [vmem:[#allocation10 + $0x3e0] sm:$0xff] }
 0x16a   :  { %4783 = vmatpush1.bf16.msra.mxu1 %v4782_v31  ;;  %4657 = vmatprep.subr.bf16.mxu0 %v4656_v32  ;;  %v4804_v31 = vpack.c.bf16 %v1120_v28, %v1116_v26  ;;  %v4678_v32 = vpack.c.bf16 %v1117_v30, %v1113_v29 }
 0x16b   :  { %4785 = vmatprep.subr.bf16.mxu1 %v4784_v36  ;;  %v1122_v36 = vld [vmem:[#allocation10 + $0x408] sm:$0xff] }
 0x16c   :  { %v4680_v0 = vpack.c.bf16 %v1126_v37, %v1122_v36  ;;  %v3032_v37 = vld [vmem:[#allocation19 + $0x8] sm:$0xff] }
 0x16d   :  { %4659 = vmatpush1.bf16.msra.mxu0 %v4658_v41  ;;  %v309_v41 = vlaneseq }
 0x16e   :  { %4787 = vmatpush1.bf16.msra.mxu1 %v4786_v42  ;;  %4661 = vmatprep.subr.bf16.mxu0 %v4660_v43 }
 0x16f   :  { %4789 = vmatprep.subr.bf16.mxu1 %v4788_v47  ;;  %v6497_v42 = vshrl.u32 %v309_v41, 7 }
 0x171   :  { %4663 = vmatpush1.bf16.msra.mxu0 %v4662_v54  ;;  %v6500_v43 = vsub.s32 0, %v6497_v42  ;;  %v6503_v44 = vsub.s32 2, %v6497_v42  ;;  %v6508_v46 = vsub.s32 1, %v6497_v42  ;;  %v6511_v47 = vsub.s32 3, %v6497_v42 }
 0x172   :  { %4791 = vmatpush1.bf16.msra.mxu1 %v4790_v55  ;;  %4665 = vmatprep.subr.bf16.mxu0 %v4664_v56 }
 0x173   :  { %4793 = vmatprep.subr.bf16.mxu1 %v4792_v60  ;;  %v660_v49 = vrot.slane %v6505_v45, %v6500_v43  ;;  %v820_v50 = vrot.slane %v6505_v45, %v6503_v44  ;;  %v740_v53 = vrot.slane %v6505_v45, %v6508_v46  ;;  %v900_v54 = vrot.slane %v6505_v45, %v6511_v47 }
 0x174   :  { %v668_v55 = vrot.slane %v6517_v51, %v6500_v43  ;;  %v828_v56 = vrot.slane %v6517_v51, %v6503_v44  ;;  %v676_v59 = vrot.slane %v6519_v52, %v6500_v43  ;;  %v836_v60 = vrot.slane %v6519_v52, %v6503_v44 }
 0x175   :  { %4667 = vmatpush1.bf16.msra.mxu0 %v4666_v3  ;;  %v700_v57 = vrot.slane %v660_v49, %v6500_v43  ;;  %v860_v58 = vrot.slane %v820_v50, %v6503_v44  ;;  %v748_v61 = vrot.slane %v6517_v51, %v6508_v46  ;;  %v908_v62 = vrot.slane %v6517_v51, %v6511_v47 }
 0x176   :  { %4795 = vmatpush1.bf16.msra.mxu1 %v4794_v4  ;;  %4669 = vmatprep.subr.bf16.mxu0 %v4668_v5  ;;  %v780_v63 = vrot.slane %v740_v53, %v6508_v46  ;;  %v940_v1 = vrot.slane %v900_v54, %v6511_v47  ;;  %v756_v2 = vrot.slane %v6519_v52, %v6508_v46  ;;  %v1556_v4 = vld [vmem:[%s7003_s6 + $0x8] sm:$0xff] }
 0x177   :  { %4797 = vmatprep.subr.bf16.mxu1 %v4796_v8  ;;  %v916_v3 = vrot.slane %v6519_v52, %v6511_v47  ;;  %v708_v6 = vrot.slane %v668_v55, %v6500_v43  ;;  %v868_v7 = vrot.slane %v828_v56, %v6503_v44  ;;  %v716_v10 = vrot.slane %v676_v59, %v6500_v43 }
 0x178   :  { %v948_v12 = vrot.slane %v908_v62, %v6511_v47  ;;  %v1570_v13 = vrot.slane %v1556_v4, %v6500_v43  ;;  %v1650_v14 = vrot.slane %v1556_v4, %v6503_v44  ;;  %v796_v17 = vrot.slane %v756_v2, %v6508_v46 }
 0x179   :  { %4671 = vmatpush1.bf16.msra.mxu0 %v4670_v11  ;;  %v876_v11 = vrot.slane %v836_v60, %v6503_v44  ;;  %v1610_v19 = vrot.slane %v1556_v4, %v6508_v46  ;;  %v1690_v20 = vrot.slane %v1556_v4, %v6511_v47  ;;  %v3046_v38 = vrot.slane %v3032_v37, %v6500_v43 }
 0x17a   :  { %4799 = vmatpush1.bf16.msra.mxu1 %v4798_v48  ;;  %4673 = vmatprep.subr.bf16.mxu0 %v4672_v18  ;;  %v788_v48 = vrot.slane %v748_v61, %v6508_v46  ;;  %v956_v18 = vrot.slane %v916_v3, %v6511_v47  ;;  %v1590_v25 = vrot.slane %v1570_v13, %v6500_v43  ;;  %v6605_v59 = vsub.s32 4, %v6497_v42  ;;  %v6618_v3 = vld [vmem:[#allocation7] sm:$0xff] }
 0x17b   :  { %4801 = vmatprep.subr.bf16.mxu1 %v4800_v21  ;;  %v1670_v26 = vrot.slane %v1650_v14, %v6503_v44  ;;  %v3066_v39 = vrot.slane %v3046_v38, %v6500_v43  ;;  %v3126_v41 = vrot.slane %v3032_v37, %v6503_v44  ;;  %v3166_v50 = vrot.slane %v3032_v37, %v6511_v47 }
 0x17c   :  { %v6609_v61 = vsub.s32 5, %v6497_v42  ;;  %v664_v2 = vrot.slane %v6505_v45, %v6605_v59  ;;  %v324_v38 = vrot.slane %v6618_v3, %v6511_v47 }
 0x17d   :  { %4675 = vmatpush1.bf16.msra.mxu0 %v4674_v22  ;;  %v3146_v53 = vrot.slane %v3126_v41, %v6503_v44  ;;  %v3186_v55 = vrot.slane %v3166_v50, %v6511_v47  ;;  %v6658_v41 = vld [vmem:[#allocation10 + $0x400] sm:$0xff] }
 0x17e   :  { %4803 = vmatpush1.bf16.msra.mxu1 %v4802_v23  ;;  %4677 = vmatprep.subr.bf16.mxu0 %v4676_v27  ;;  %v744_v13 = vrot.slane %v6505_v45, %v6609_v61 }
 0x17f   :  { %4805 = vmatprep.subr.bf16.mxu1 %v4804_v31  ;;  %v1630_v31 = vrot.slane %v1610_v19, %v6508_v46 }
 0x181   :  { %4679 = vmatpush1.bf16.msra.mxu0 %v4678_v32  ;;  %v1710_v32 = vrot.slane %v1690_v20, %v6511_v47 }
 0x182   :  { %4807 = vmatpush1.bf16.msra.mxu1 %v4806_v35  ;;  %4681 = vmatprep.subr.bf16.mxu0 %v4680_v0  ;;  %v3086_v0 = vrot.slane %v3032_v37, %v6508_v46 }
 0x183   :  { %4809 = vmatprep.subr.bf16.mxu1 %v4808_v40 }
 0x184   :  { %v3106_v40 = vrot.slane %v3086_v0, %v6508_v46 }
 0x1aa   :  { %v6548_v5 = vpop.permute.xlu0 %642 }
 0x1ab   :  { %v723_v8 = vmul.f32 %v700_v57, %v6548_v5  ;;  %v883_v9 = vmul.f32 %v860_v58, %v6548_v5  ;;  %v725_v21 = vmul.f32 %v708_v6, %v6548_v5  ;;  %v885_v22 = vmul.f32 %v868_v7, %v6548_v5  ;;  %v637_v58 = vld [vmem:[#allocation8] sm:$0xff] }
 0x1ac   :  { %v727_v23 = vmul.f32 %v716_v10, %v6548_v5  ;;  %v887_v24 = vmul.f32 %v876_v11, %v6548_v5  ;;  %v1597_v33 = vmul.f32 %v1590_v25, %v6548_v5  ;;  %v1677_v34 = vmul.f32 %v1670_v26, %v6548_v5 }
 0x1ad   :  { %v6560_v15 = vadd.f32 %v780_v63, %v723_v8  ;;  %v6562_v16 = vadd.f32 %v940_v1, %v883_v9  ;;  %v6574_v27 = vadd.f32 %v788_v48, %v725_v21  ;;  %v6576_v28 = vadd.f32 %v948_v12, %v885_v22 }
 0x1ae   :  { %v6578_v29 = vadd.f32 %v796_v17, %v727_v23  ;;  %v6580_v30 = vadd.f32 %v956_v18, %v887_v24  ;;  %v6586_v35 = vadd.f32 %v1630_v31, %v1597_v33  ;;  %v6588_v36 = vadd.f32 %v1710_v32, %v1677_v34 }
 0x1af   :  { %v3073_v49 = vmul.f32 %v3066_v39, %v6548_v5  ;;  %v3153_v56 = vmul.f32 %v3146_v53, %v6548_v5  ;;  %v652_v60 = vrot.slane %v637_v58, %v6500_v43  ;;  %v656_v62 = vrot.slane %v637_v58, %v6605_v59 }
 0x1b0   :  { %v6613_v63 = vsub.s32 6, %v6497_v42  ;;  %v812_v1 = vrot.slane %v637_v58, %v6503_v44  ;;  %v732_v6 = vrot.slane %v637_v58, %v6508_v46  ;;  %v892_v7 = vrot.slane %v637_v58, %v6511_v47 }
 0x1b1   :  { %v6598_v54 = vadd.f32 %v3106_v40, %v3073_v49  ;;  %v6602_v57 = vadd.f32 %v3186_v55, %v3153_v56  ;;  %v692_v4 = vrot.slane %v652_v60, %v6500_v43  ;;  %v736_v8 = vrot.slane %v637_v58, %v6609_v61  ;;  %v6660_v49 = vld [vmem:[#allocation10 + $0x420] sm:$0xff] }
 0x1b2   :  { %v696_v9 = vrot.slane %v656_v62, %v6500_v43  ;;  %v6626_v10 = vsub.s32 7, %v6497_v42  ;;  %v816_v11 = vrot.slane %v637_v58, %v6613_v63  ;;  %v852_v48 = vrot.slane %v812_v1, %v6503_v44 }
 0x1b3   :  { %v704_v12 = vrot.slane %v664_v2, %v6500_v43  ;;  %v824_v14 = vrot.slane %v6505_v45, %v6613_v63  ;;  %v312_v17 = vrot.slane %v6618_v3, %v6500_v43  ;;  %v721_v18 = vmul.f32 %v692_v4, %v6548_v5 }
 0x1b4   :  { %v772_v42 = vrot.slane %v732_v6, %v6508_v46  ;;  %v932_v19 = vrot.slane %v892_v7, %v6511_v47  ;;  %v776_v20 = vrot.slane %v736_v8, %v6508_v46  ;;  %v722_v21 = vmul.f32 %v696_v9, %v6548_v5  ;;  %v1123_v6 = vld [vmem:[#allocation10 + $0x410] sm:$0xff] }
 0x1b5   :  { %v856_v22 = vrot.slane %v816_v11, %v6503_v44  ;;  %v896_v23 = vrot.slane %v637_v58, %v6626_v10  ;;  %v904_v24 = vrot.slane %v6505_v45, %v6626_v10  ;;  %v881_v25 = vmul.f32 %v852_v48, %v6548_v5  ;;  %v1127_v11 = vld [vmem:[#allocation10 + $0x430] sm:$0xff]  ;;  %v6666_v48 = vld [vmem:[#allocation10 + $0x448] sm:$0xff] }
 0x1b6   :  { %v724_v26 = vmul.f32 %v704_v12, %v6548_v5  ;;  %v784_v31 = vrot.slane %v744_v13, %v6508_v46  ;;  %v864_v32 = vrot.slane %v824_v14, %v6503_v44  ;;  %v320_v33 = vrot.slane %v6618_v3, %v6503_v44  ;;  %v6668_v12 = vld [vmem:[#allocation10 + $0x468] sm:$0xff] }
 0x1b7   :  { %v316_v34 = vrot.slane %v6618_v3, %v6508_v46  ;;  %v801_v37 = vadd.f32 %v772_v42, %v721_v18  ;;  %v802_v45 = vadd.f32 %v776_v20, %v722_v21  ;;  %v882_v39 = vmul.f32 %v856_v22, %v6548_v5  ;;  %v6671_v18 = vld [vmem:[#allocation10 + $0x458] sm:$0xff] }
 0x1b8   :  { %v936_v40 = vrot.slane %v896_v23, %v6511_v47  ;;  %v944_v50 = vrot.slane %v904_v24, %v6511_v47  ;;  %v961_v55 = vadd.f32 %v932_v19, %v881_v25  ;;  %v804_v60 = vadd.f32 %v784_v31, %v724_v26  ;;  %v6673_v42 = vld [vmem:[#allocation10 + $0x478] sm:$0xff]  ;;  %v6675_v19 = vld [vmem:[#allocation10 + $0x440] sm:$0xff]  ;;  %v6681_v25 = vld [vmem:[#allocation10 + $0x450] sm:$0xff] }
 0x1b9   :  { %v884_v62 = vmul.f32 %v864_v32, %v6548_v5  ;;  %v4682_v9 = vpack.c.bf16 %v6660_v49, %v6658_v41  ;;  %v672_v20 = vrot.slane %v6517_v51, %v6605_v59  ;;  %v6679_v24 = vld [vmem:[#allocation10 + $0x460] sm:$0xff]  ;;  %v6683_v26 = vld [vmem:[#allocation10 + $0x470] sm:$0xff]  ;;  %v6702_v41 = vld [vmem:[#allocation10 + $0x488] sm:$0xff] }
 0x1ba   :  { %v6704_v49 = vld [vmem:[#allocation10 + $0x4a8] sm:$0xff] }
 0x1bb   :  { %v964_v23 = vadd.f32 %v944_v50, %v884_v62  ;;  %v832_v50 = vrot.slane %v6517_v51, %v6613_v63  ;;  %v6712_v62 = vld [vmem:[#allocation10 + $0x480] sm:$0xff] }
 0x207   :  { %v419_v0 = vpop.f32.mrb[0].mxu0 }
 0x208   :  { %v420_v53 = vadd.f32 %v419_v0, %v312_v17  ;;  %v490_v56 = vpop.f32.mrb[0].mxu1  ;;  %v421_v58 = vpop.f32.mrb[1].mxu0  ;;  %v962_v17 = vadd.f32 %v936_v40, %v882_v39  ;;  %v4812_v0 = vpack.c.bf16 %v6673_v42, %v6671_v18  ;;  %v4814_v40 = vpack.c.bf16 %v6683_v26, %v6681_v25  ;;  %v1150_v18 = vld [vmem:[#allocation10 + $0x4e8] sm:$0xff]  ;;  %v1148_v42 = vld [vmem:[#allocation10 + $0x4d8] sm:$0xff]  ;;  %v1147_v25 = vld [vmem:[#allocation10 + $0x4d0] sm:$0xff] }
 0x209   :  { %v491_v1 = vadd.f32 %v490_v56, %v320_v33  ;;  %v422_v2 = vadd.f32 %v421_v58, %v316_v34  ;;  %v492_v4 = vpop.f32.mrb[1].mxu1  ;;  %v4810_v33 = vpack.c.bf16 %v1127_v11, %v1123_v6  ;;  %v680_v34 = vrot.slane %v6519_v52, %v6605_v59  ;;  %v1140_v58 = vld [vmem:[#allocation10 + $0x498] sm:$0xff]  ;;  %v6725_v11 = vld [vmem:[#allocation10 + $0x4b0] sm:$0xff] }
 0x20a   :  { %v969_v7 = vmul.f32 %v801_v37, %v420_v53  ;;  %v493_v8 = vadd.f32 %v492_v4, %v324_v38  ;;  %v4684_v38 = vpack.c.bf16 %v6668_v12, %v6666_v48  ;;  %v336_v4 = vrot.slane %v6618_v3, %v6613_v63  ;;  %v1151_v26 = vld [vmem:[#allocation10 + $0x4f0] sm:$0xff] }
 0x20b   :  { %v971_v13 = vmul.f32 %v6560_v15, %v491_v1  ;;  %v970_v14 = vmul.f32 %v802_v45, %v422_v2  ;;  %v752_v15 = vrot.slane %v6517_v51, %v6609_v61  ;;  %v760_v45 = vrot.slane %v6519_v52, %v6609_v61 }
 0x20c   :  { %v977_v21 = vadd.f32 %v969_v7, %v961_v55  ;;  %v972_v22 = vmul.f32 %v804_v60, %v493_v8  ;;  %v712_v55 = vrot.slane %v672_v20, %v6500_v43  ;;  %v1144_v60 = vld [vmem:[#allocation10 + $0x4b8] sm:$0xff]  ;;  %v840_v1 = vrot.slane %v6519_v52, %v6613_v63  ;;  %v6721_v7 = vld [vmem:[#allocation10 + $0x4a0] sm:$0xff]  ;;  %v6723_v8 = vld [vmem:[#allocation10 + $0x490] sm:$0xff] }
 0x20d   :  { %v6688_v31 = vadd.f32 %v971_v13, %v6562_v16  ;;  %v978_v32 = vadd.f32 %v970_v14, %v962_v17  ;;  %v4686_v16 = vpack.c.bf16 %v6679_v24, %v6675_v19  ;;  %v6710_v56 = vrot.slane %v752_v15, %v6508_v46  ;;  %v1146_v17 = vld [vmem:[#allocation10 + $0x4c8] sm:$0xff]  ;;  %v1152_v20 = vld [vmem:[#allocation10 + $0x4f8] sm:$0xff] }
 0x20e   :  { %v980_v37 = vadd.f32 %v972_v22, %v964_v23  ;;  %v985_v53 = vmax.f32 %v977_v21, 0.0  ;;  %v328_v2 = vrot.slane %v6618_v3, %v6605_v59  ;;  %v720_v6 = vrot.slane %v680_v34, %v6500_v43  ;;  %v6734_v21 = vld [vmem:[#allocation10 + $0x4c0] sm:$0xff] }
 0x20f   :  { %v986_v39 = vmax.f32 %v978_v32, 0.0  ;;  %v332_v12 = vrot.slane %v6618_v3, %v6609_v61  ;;  %v340_v13 = vrot.slane %v6618_v3, %v6626_v10  ;;  %v800_v14 = vrot.slane %v760_v45, %v6508_v46  ;;  %v6736_v22 = vld [vmem:[#allocation10 + $0x4e0] sm:$0xff] }
 0x210   :  { %v988_v48 = vmax.f32 %v980_v37, 0.0  ;;  %v4688_v19 = vpack.c.bf16 %v6704_v49, %v6702_v41  ;;  %v872_v23 = vrot.slane %v832_v50, %v6503_v44  ;;  %v912_v3 = vrot.slane %v6517_v51, %v6626_v10  ;;  %v1154_v41 = vld [vmem:[#allocation10 + $0x508] sm:$0xff]  ;;  %v1160_v50 = vld [vmem:[#allocation10 + $0x538] sm:$0xff] }
 0x211   :  { %1335 = vmatprep.mubr.f32.mxu0 %v986_v39  ;;  %1477 = vmatprep.mubr.f32.mxu1 %v986_v39  ;;  %v4816_v24 = vpack.c.bf16 %v1144_v60, %v1140_v58  ;;  %v920_v15 = vrot.slane %v6519_v52, %v6626_v10  ;;  %v726_v32 = vmul.f32 %v712_v55, %v6548_v5  ;;  %v1158_v49 = vld [vmem:[#allocation10 + $0x528] sm:$0xff] }
 0x212   :  { %1336 = vmatmul.mubr.f32.vlgmr.msra.gmra.mrb[4].mxu0 %v985_v53  ;;  %1478 = vmatmul.mubr.f32.vlgmr.msra.gmra.mrb[4].mxu1 %v985_v53  ;;  %v4818_v51 = vpack.c.bf16 %v6725_v11, %v6723_v8  ;;  %v728_v34 = vmul.f32 %v720_v6, %v6548_v5  ;;  %v4692_v37 = vpack.c.bf16 %v1150_v18, %v1146_v17 }
 0x213   :  { %4683 = vmatpush1.bf16.msra.mxu0 %v4682_v9  ;;  %4811 = vmatpush1.bf16.msra.mxu1 %v4810_v33  ;;  %v880_v9 = vrot.slane %v840_v1, %v6503_v44  ;;  %v4690_v33 = vpack.c.bf16 %v6721_v7, %v6712_v62  ;;  %v4820_v45 = vpack.c.bf16 %v1152_v20, %v1148_v42 }
 0x214   :  { %1406 = vmatprep.mubr.f32.mxu0 %v988_v48  ;;  %1548 = vmatprep.mubr.f32.mxu1 %v988_v48  ;;  %v4694_v39 = vpack.c.bf16 %v6736_v22, %v6734_v21  ;;  %v886_v53 = vmul.f32 %v872_v23, %v6548_v5  ;;  %v952_v55 = vrot.slane %v912_v3, %v6511_v47  ;;  %v1157_v21 = vld [vmem:[#allocation10 + $0x520] sm:$0xff]  ;;  %v1159_v23 = vld [vmem:[#allocation10 + $0x530] sm:$0xff]  ;;  %v1164_v3 = vld [vmem:[#allocation10 + $0x558] sm:$0xff] }
 0x215   :  { %4685 = vmatprep.subr.bf16.mxu0 %v4684_v38  ;;  %4813 = vmatprep.subr.bf16.mxu1 %v4812_v0  ;;  %v4822_v38 = vpack.c.bf16 %v1151_v26, %v1147_v25  ;;  %v1156_v0 = vld [vmem:[#allocation10 + $0x518] sm:$0xff]  ;;  %v888_v1 = vmul.f32 %v880_v9, %v6548_v5  ;;  %v960_v6 = vrot.slane %v920_v15, %v6511_v47  ;;  %v1161_v15 = vld [vmem:[#allocation10 + $0x540] sm:$0xff] }
 0x216   :  { %v4696_v11 = vpack.c.bf16 %v1158_v49, %v1154_v41  ;;  %v808_v18 = vadd.f32 %v800_v14, %v728_v34  ;;  %v4824_v42 = vpack.c.bf16 %v1160_v50, %v1156_v0  ;;  %v966_v22 = vadd.f32 %v952_v55, %v886_v53  ;;  %v1163_v34 = vld [vmem:[#allocation10 + $0x550] sm:$0xff]  ;;  %v1172_v41 = vld [vmem:[#allocation10 + $0x598] sm:$0xff] }
 0x217   :  { %4687 = vmatpush1.bf16.msra.mxu0 %v4686_v16  ;;  %4815 = vmatpush1.bf16.msra.mxu1 %v4814_v40  ;;  %v561_v52 = vpop.f32.mrb[2].mxu0  ;;  %v806_v40 = vadd.f32 %v6710_v56, %v726_v32  ;;  %v1155_v56 = vld [vmem:[#allocation10 + $0x510] sm:$0xff]  ;;  %v1165_v32 = vld [vmem:[#allocation10 + $0x560] sm:$0xff]  ;;  %v1176_v49 = vld [vmem:[#allocation10 + $0x5b8] sm:$0xff] }
 0x218   :  { %v562_v58 = vadd.f32 %v561_v52, %v328_v2  ;;  %v632_v60 = vpop.f32.mrb[2].mxu1  ;;  %v563_v62 = vpop.f32.mrb[3].mxu0  ;;  %4689 = vmatprep.subr.bf16.mxu0 %v4688_v19  ;;  %4817 = vmatprep.subr.bf16.mxu1 %v4816_v24  ;;  %v1153_v19 = vld [vmem:[#allocation10 + $0x500] sm:$0xff]  ;;  %v1168_v24 = vld [vmem:[#allocation10 + $0x578] sm:$0xff]  ;;  %v4826_v9 = vpack.c.bf16 %v1159_v23, %v1155_v56  ;;  %v4702_v52 = vpack.c.bf16 %v1165_v32, %v1161_v15  ;;  %v1171_v55 = vld [vmem:[#allocation10 + $0x590] sm:$0xff] }
 0x219   :  { %v633_v7 = vadd.f32 %v632_v60, %v336_v4  ;;  %v564_v16 = vadd.f32 %v563_v62, %v332_v12  ;;  %v634_v8 = vpop.f32.mrb[3].mxu1  ;;  %v4832_v53 = vpack.c.bf16 %v1176_v49, %v1172_v41  ;;  %v1178_v60 = vld [vmem:[#allocation10 + $0x5c8] sm:$0xff]  ;;  %v1189_v56 = vld [vmem:[#allocation10 + $0x620] sm:$0xff] }
 0x21a   :  { %v973_v48 = vmul.f32 %v6574_v27, %v562_v58  ;;  %v635_v17 = vadd.f32 %v634_v8, %v340_v13  ;;  %v1162_v27 = vld [vmem:[#allocation10 + $0x548] sm:$0xff]  ;;  %v968_v13 = vadd.f32 %v960_v6, %v888_v1  ;;  %v1175_v58 = vld [vmem:[#allocation10 + $0x5b0] sm:$0xff]  ;;  %v1180_v1 = vld [vmem:[#allocation10 + $0x5d8] sm:$0xff] }
 0x21b   :  { %v975_v2 = vmul.f32 %v6578_v29, %v633_v7  ;;  %v974_v20 = vmul.f32 %v806_v40, %v564_v16  ;;  %4691 = vmatpush1.bf16.msra.mxu0 %v4690_v33  ;;  %4819 = vmatpush1.bf16.msra.mxu1 %v4818_v51  ;;  %v1166_v29 = vld [vmem:[#allocation10 + $0x568] sm:$0xff]  ;;  %v4828_v51 = vpack.c.bf16 %v1168_v24, %v1164_v3  ;;  %v1184_v6 = vld [vmem:[#allocation10 + $0x5f8] sm:$0xff]  ;;  %v1177_v40 = vld [vmem:[#allocation10 + $0x5c0] sm:$0xff] }
 0x21c   :  { %v6760_v4 = vadd.f32 %v973_v48, %v6576_v28  ;;  %v976_v12 = vmul.f32 %v808_v18, %v635_v17  ;;  %4693 = vmatprep.subr.bf16.mxu0 %v4692_v37  ;;  %4821 = vmatprep.subr.bf16.mxu1 %v4820_v45  ;;  %v4698_v28 = vpack.c.bf16 %v1157_v21, %v1153_v19  ;;  %v1170_v37 = vld [vmem:[#allocation10 + $0x588] sm:$0xff]  ;;  %v1181_v8 = vld [vmem:[#allocation10 + $0x5e0] sm:$0xff]  ;;  %v1179_v17 = vld [vmem:[#allocation10 + $0x5d0] sm:$0xff] }
 0x21d   :  { %v6763_v14 = vadd.f32 %v975_v2, %v6580_v30  ;;  %v6765_v25 = vadd.f32 %v974_v20, %v966_v22  ;;  %v4700_v33 = vpack.c.bf16 %v1166_v29, %v1162_v27  ;;  %v1167_v30 = vld [vmem:[#allocation10 + $0x570] sm:$0xff]  ;;  %v1174_v45 = vld [vmem:[#allocation10 + $0x5a8] sm:$0xff]  ;;  %v4834_v16 = vpack.c.bf16 %v1175_v58, %v1171_v55  ;;  %v1188_v20 = vld [vmem:[#allocation10 + $0x618] sm:$0xff] }
 0x21e   :  { %v6767_v26 = vadd.f32 %v976_v12, %v968_v13  ;;  %v4830_v0 = vpack.c.bf16 %v1167_v30, %v1163_v34  ;;  %v4704_v50 = vpack.c.bf16 %v1174_v45, %v1170_v37  ;;  %v1182_v62 = vld [vmem:[#allocation10 + $0x5e8] sm:$0xff]  ;;  %v4836_v48 = vpack.c.bf16 %v1184_v6, %v1180_v1  ;;  %v1183_v18 = vld [vmem:[#allocation10 + $0x5f0] sm:$0xff]  ;;  %v1192_v19 = vld [vmem:[#allocation10 + $0x638] sm:$0xff] }
 0x21f   :  { %4695 = vmatpush1.bf16.msra.mxu0 %v4694_v39  ;;  %4823 = vmatpush1.bf16.msra.mxu1 %v4822_v38  ;;  %v1169_v39 = vld [vmem:[#allocation10 + $0x580] sm:$0xff]  ;;  %v1190_v2 = vld [vmem:[#allocation10 + $0x628] sm:$0xff]  ;;  %v4710_v21 = vpack.c.bf16 %v1181_v8, %v1177_v40  ;;  %v4838_v22 = vpack.c.bf16 %v1183_v18, %v1179_v17  ;;  %v4840_v27 = vpack.c.bf16 %v1192_v19, %v1188_v20  ;;  %v1187_v13 = vld [vmem:[#allocation10 + $0x610] sm:$0xff] }
 0x220   :  { %4697 = vmatprep.subr.bf16.mxu0 %v4696_v11  ;;  %4825 = vmatprep.subr.bf16.mxu1 %v4824_v42  ;;  %v1173_v38 = vld [vmem:[#allocation10 + $0x5a0] sm:$0xff]  ;;  %v4708_v11 = vpack.c.bf16 %v1182_v62, %v1178_v60  ;;  %v1186_v42 = vld [vmem:[#allocation10 + $0x608] sm:$0xff]  ;;  %v1191_v29 = vld [vmem:[#allocation10 + $0x630] sm:$0xff] }
 0x221   :  { %v4706_v7 = vpack.c.bf16 %v1173_v38, %v1169_v39  ;;  %v1185_v12 = vld [vmem:[#allocation10 + $0x600] sm:$0xff]  ;;  %v4712_v23 = vpack.c.bf16 %v1190_v2, %v1186_v42  ;;  %v1194_v3 = vld [vmem:[#allocation10 + $0x648] sm:$0xff]  ;;  %v4842_v32 = vpack.c.bf16 %v1191_v29, %v1187_v13  ;;  %v1195_v37 = vld [vmem:[#allocation10 + $0x650] sm:$0xff] }
 0x222   :  { %v1198_v24 = vld [vmem:[#allocation10 + $0x668] sm:$0xff]  ;;  %v4714_v15 = vpack.c.bf16 %v1189_v56, %v1185_v12  ;;  %v1199_v45 = vld [vmem:[#allocation10 + $0x670] sm:$0xff] }
 0x223   :  { %4699 = vmatpush1.bf16.msra.mxu0 %v4698_v28  ;;  %4827 = vmatpush1.bf16.msra.mxu1 %v4826_v9  ;;  %v1196_v28 = vld [vmem:[#allocation10 + $0x658] sm:$0xff]  ;;  %v4716_v34 = vpack.c.bf16 %v1198_v24, %v1194_v3  ;;  %v1202_v41 = vld [vmem:[#allocation10 + $0x688] sm:$0xff]  ;;  %v4846_v38 = vpack.c.bf16 %v1199_v45, %v1195_v37  ;;  %v1203_v60 = vld [vmem:[#allocation10 + $0x690] sm:$0xff] }
 0x224   :  { %4701 = vmatprep.subr.bf16.mxu0 %v4700_v33  ;;  %4829 = vmatprep.subr.bf16.mxu1 %v4828_v51  ;;  %v1200_v9 = vld [vmem:[#allocation10 + $0x678] sm:$0xff]  ;;  %v1193_v33 = vld [vmem:[#allocation10 + $0x640] sm:$0xff]  ;;  %v1206_v49 = vld [vmem:[#allocation10 + $0x6a8] sm:$0xff] }
 0x225   :  { %v1197_v51 = vld [vmem:[#allocation10 + $0x660] sm:$0xff]  ;;  %v4844_v30 = vpack.c.bf16 %v1200_v9, %v1196_v28  ;;  %v4720_v55 = vpack.c.bf16 %v1206_v49, %v1202_v41  ;;  %v1207_v62 = vld [vmem:[#allocation10 + $0x6b0] sm:$0xff]  ;;  %v1210_v1 = vld [vmem:[#allocation10 + $0x6c8] sm:$0xff] }
 0x226   :  { %v4718_v39 = vpack.c.bf16 %v1197_v51, %v1193_v33  ;;  %v1214_v6 = vld [vmem:[#allocation10 + $0x6e8] sm:$0xff]  ;;  %v4850_v8 = vpack.c.bf16 %v1207_v62, %v1203_v60  ;;  %v1211_v42 = vld [vmem:[#allocation10 + $0x6d0] sm:$0xff] }
 0x227   :  { %4703 = vmatpush1.bf16.msra.mxu0 %v4702_v52  ;;  %4831 = vmatpush1.bf16.msra.mxu1 %v4830_v0  ;;  %v1204_v52 = vld [vmem:[#allocation10 + $0x698] sm:$0xff]  ;;  %v4724_v17 = vpack.c.bf16 %v1214_v6, %v1210_v1  ;;  %v1215_v2 = vld [vmem:[#allocation10 + $0x6f0] sm:$0xff]  ;;  %v1218_v20 = vld [vmem:[#allocation10 + $0x708] sm:$0xff] }
 0x228   :  { %4705 = vmatprep.subr.bf16.mxu0 %v4704_v50  ;;  %4833 = vmatprep.subr.bf16.mxu1 %v4832_v53  ;;  %v1208_v0 = vld [vmem:[#allocation10 + $0x6b8] sm:$0xff]  ;;  %v1201_v50 = vld [vmem:[#allocation10 + $0x680] sm:$0xff]  ;;  %v1222_v19 = vld [vmem:[#allocation10 + $0x728] sm:$0xff]  ;;  %v4854_v56 = vpack.c.bf16 %v1215_v2, %v1211_v42 }
 0x229   :  { %v1205_v53 = vld [vmem:[#allocation10 + $0x6a0] sm:$0xff]  ;;  %v4848_v58 = vpack.c.bf16 %v1208_v0, %v1204_v52  ;;  %v4728_v13 = vpack.c.bf16 %v1222_v19, %v1218_v20  ;;  %v1219_v3 = vld [vmem:[#allocation10 + $0x710] sm:$0xff]  ;;  %v1226_v28 = vld [vmem:[#allocation10 + $0x748] sm:$0xff] }
 0x22a   :  { %v4722_v40 = vpack.c.bf16 %v1205_v53, %v1201_v50  ;;  %v1223_v24 = vld [vmem:[#allocation10 + $0x730] sm:$0xff]  ;;  %v1230_v9 = vld [vmem:[#allocation10 + $0x768] sm:$0xff] }
 0x22b   :  { %4707 = vmatpush1.bf16.msra.mxu0 %v4706_v7  ;;  %4835 = vmatpush1.bf16.msra.mxu1 %v4834_v16  ;;  %v1212_v7 = vld [vmem:[#allocation10 + $0x6d8] sm:$0xff]  ;;  %v4858_v51 = vpack.c.bf16 %v1223_v24, %v1219_v3  ;;  %v4732_v37 = vpack.c.bf16 %v1230_v9, %v1226_v28  ;;  %v1227_v41 = vld [vmem:[#allocation10 + $0x750] sm:$0xff]  ;;  %v1234_v52 = vld [vmem:[#allocation10 + $0x788] sm:$0xff] }
 0x22c   :  { %4709 = vmatprep.subr.bf16.mxu0 %v4708_v11  ;;  %4837 = vmatprep.subr.bf16.mxu1 %v4836_v48  ;;  %v1216_v16 = vld [vmem:[#allocation10 + $0x6f8] sm:$0xff]  ;;  %v1209_v11 = vld [vmem:[#allocation10 + $0x6c0] sm:$0xff]  ;;  %v1231_v49 = vld [vmem:[#allocation10 + $0x770] sm:$0xff] }
 0x22d   :  { %v1213_v48 = vld [vmem:[#allocation10 + $0x6e0] sm:$0xff]  ;;  %v4852_v18 = vpack.c.bf16 %v1216_v16, %v1212_v7  ;;  %v1238_v0 = vld [vmem:[#allocation10 + $0x7a8] sm:$0xff]  ;;  %v4862_v53 = vpack.c.bf16 %v1231_v49, %v1227_v41  ;;  %v1235_v1 = vld [vmem:[#allocation10 + $0x790] sm:$0xff]  ;;  %v987_v41 = vmax.f32 %v6688_v31, 0.0 }
 0x22e   :  { %v4726_v12 = vpack.c.bf16 %v1213_v48, %v1209_v11  ;;  %v4736_v60 = vpack.c.bf16 %v1238_v0, %v1234_v52  ;;  %v1239_v6 = vld [vmem:[#allocation10 + $0x7b0] sm:$0xff]  ;;  %v1242_v7 = vld [vmem:[#allocation10 + $0x7c8] sm:$0xff] }
 0x22f   :  { %4711 = vmatpush1.bf16.msra.mxu0 %v4710_v21  ;;  %4839 = vmatpush1.bf16.msra.mxu1 %v4838_v22  ;;  %v1220_v21 = vld [vmem:[#allocation10 + $0x718] sm:$0xff]  ;;  %v1246_v16 = vld [vmem:[#allocation10 + $0x7e8] sm:$0xff]  ;;  %v4866_v48 = vpack.c.bf16 %v1239_v6, %v1235_v1  ;;  %v1243_v20 = vld [vmem:[#allocation10 + $0x7d0] sm:$0xff] }
 0x230   :  { %4713 = vmatprep.subr.bf16.mxu0 %v4712_v23  ;;  %4841 = vmatprep.subr.bf16.mxu1 %v4840_v27  ;;  %v1224_v22 = vld [vmem:[#allocation10 + $0x738] sm:$0xff]  ;;  %v1217_v23 = vld [vmem:[#allocation10 + $0x700] sm:$0xff]  ;;  %v4740_v42 = vpack.c.bf16 %v1246_v16, %v1242_v7  ;;  %v1247_v19 = vld [vmem:[#allocation10 + $0x7f0] sm:$0xff] }
 0x231   :  { %v1221_v27 = vld [vmem:[#allocation10 + $0x720] sm:$0xff]  ;;  %v4856_v29 = vpack.c.bf16 %v1224_v22, %v1220_v21  ;;  %v1732_v21 = vld [vmem:[#allocation13 + $0x8] sm:$0xff]  ;;  %v1733_v28 = vld [vmem:[#allocation13 + $0x10] sm:$0xff] }
 0x232   :  { %v4730_v33 = vpack.c.bf16 %v1221_v27, %v1217_v23  ;;  %v1736_v22 = vld [vmem:[#allocation13 + $0x28] sm:$0xff]  ;;  %v4870_v27 = vpack.c.bf16 %v1247_v19, %v1243_v20  ;;  %v1737_v9 = vld [vmem:[#allocation13 + $0x30] sm:$0xff]  ;;  %v1751_v1 = vld [vmem:[#allocation13 + $0xa0] sm:$0xff] }
 0x233   :  { %4715 = vmatpush1.bf16.msra.mxu0 %v4714_v15  ;;  %4843 = vmatpush1.bf16.msra.mxu1 %v4842_v32  ;;  %v1228_v15 = vld [vmem:[#allocation10 + $0x758] sm:$0xff]  ;;  %v4872_v3 = vpack.c.bf16 %v1736_v22, %v1732_v21 }
 0x234   :  { %4717 = vmatprep.subr.bf16.mxu0 %v4716_v34  ;;  %4845 = vmatprep.subr.bf16.mxu1 %v4844_v30  ;;  %v1232_v32 = vld [vmem:[#allocation10 + $0x778] sm:$0xff]  ;;  %v1225_v34 = vld [vmem:[#allocation10 + $0x740] sm:$0xff] }
 0x235   :  { %v1229_v30 = vld [vmem:[#allocation10 + $0x760] sm:$0xff]  ;;  %v4860_v45 = vpack.c.bf16 %v1232_v32, %v1228_v15  ;;  %v1740_v15 = vld [vmem:[#allocation13 + $0x48] sm:$0xff]  ;;  %v1741_v0 = vld [vmem:[#allocation13 + $0x50] sm:$0xff] }
 0x236   :  { %v4734_v50 = vpack.c.bf16 %v1229_v30, %v1225_v34  ;;  %v1744_v32 = vld [vmem:[#allocation13 + $0x68] sm:$0xff]  ;;  %v5002_v30 = vpack.c.bf16 %v1737_v9, %v1733_v28  ;;  %v1749_v7 = vld [vmem:[#allocation13 + $0x90] sm:$0xff] }
 0x237   :  { %4719 = vmatpush1.bf16.msra.mxu0 %v4718_v39  ;;  %4847 = vmatpush1.bf16.msra.mxu1 %v4846_v38  ;;  %v1236_v39 = vld [vmem:[#allocation10 + $0x798] sm:$0xff]  ;;  %v4876_v49 = vpack.c.bf16 %v1744_v32, %v1740_v15 }
 0x238   :  { %4721 = vmatprep.subr.bf16.mxu0 %v4720_v55  ;;  %4849 = vmatprep.subr.bf16.mxu1 %v4848_v58  ;;  %v1240_v38 = vld [vmem:[#allocation10 + $0x7b8] sm:$0xff]  ;;  %v1233_v55 = vld [vmem:[#allocation10 + $0x780] sm:$0xff] }
 0x239   :  { %v1237_v58 = vld [vmem:[#allocation10 + $0x7a0] sm:$0xff]  ;;  %v4864_v62 = vpack.c.bf16 %v1240_v38, %v1236_v39  ;;  %v1745_v39 = vld [vmem:[#allocation13 + $0x70] sm:$0xff]  ;;  %v1748_v38 = vld [vmem:[#allocation13 + $0x88] sm:$0xff] }
 0x23a   :  { %v4738_v11 = vpack.c.bf16 %v1237_v58, %v1233_v55  ;;  %v1754_v55 = vld [vmem:[#allocation13 + $0xb8] sm:$0xff]  ;;  %v1753_v16 = vld [vmem:[#allocation13 + $0xb0] sm:$0xff] }
 0x23b   :  { %4723 = vmatpush1.bf16.msra.mxu0 %v4722_v40  ;;  %4851 = vmatpush1.bf16.msra.mxu1 %v4850_v8  ;;  %v1244_v40 = vld [vmem:[#allocation10 + $0x7d8] sm:$0xff] }
 0x23c   :  { %4725 = vmatprep.subr.bf16.mxu0 %v4724_v17  ;;  %4853 = vmatprep.subr.bf16.mxu1 %v4852_v18  ;;  %v1248_v8 = vld [vmem:[#allocation10 + $0x7f8] sm:$0xff]  ;;  %v1241_v17 = vld [vmem:[#allocation10 + $0x7c0] sm:$0xff] }
 0x23d   :  { %v1245_v18 = vld [vmem:[#allocation10 + $0x7e0] sm:$0xff]  ;;  %v4868_v2 = vpack.c.bf16 %v1248_v8, %v1244_v40  ;;  %v1756_v40 = vld [vmem:[#allocation13 + $0xc8] sm:$0xff]  ;;  %v1757_v21 = vld [vmem:[#allocation13 + $0xd0] sm:$0xff] }
 0x23e   :  { %v4742_v23 = vpack.c.bf16 %v1245_v18, %v1241_v17  ;;  %v1760_v8 = vld [vmem:[#allocation13 + $0xe8] sm:$0xff]  ;;  %v5010_v18 = vpack.c.bf16 %v1753_v16, %v1749_v7  ;;  %v1761_v22 = vld [vmem:[#allocation13 + $0xf0] sm:$0xff] }
 0x23f   :  { %4727 = vmatpush1.bf16.msra.mxu0 %v4726_v12  ;;  %4855 = vmatpush1.bf16.msra.mxu1 %v4854_v56  ;;  %v1734_v12 = vld [vmem:[#allocation13 + $0x18] sm:$0xff]  ;;  %v4884_v20 = vpack.c.bf16 %v1760_v8, %v1756_v40  ;;  %v1765_v15 = vld [vmem:[#allocation13 + $0x110] sm:$0xff]  ;;  %v1788_v8 = vld [vmem:[#allocation13 + $0x1c8] sm:$0xff] }
 0x240   :  { %4729 = vmatprep.subr.bf16.mxu0 %v4728_v13  ;;  %4857 = vmatprep.subr.bf16.mxu1 %v4856_v29  ;;  %v1738_v56 = vld [vmem:[#allocation13 + $0x38] sm:$0xff]  ;;  %v1731_v13 = vld [vmem:[#allocation13] sm:$0xff]  ;;  %v1769_v32 = vld [vmem:[#allocation13 + $0x130] sm:$0xff] }
 0x241   :  { %v1735_v29 = vld [vmem:[#allocation13 + $0x20] sm:$0xff]  ;;  %v5000_v24 = vpack.c.bf16 %v1738_v56, %v1734_v12  ;;  %v1764_v12 = vld [vmem:[#allocation13 + $0x108] sm:$0xff]  ;;  %v1781_v16 = vld [vmem:[#allocation13 + $0x190] sm:$0xff] }
 0x242   :  { %v4874_v34 = vpack.c.bf16 %v1735_v29, %v1731_v13  ;;  %v1768_v56 = vld [vmem:[#allocation13 + $0x128] sm:$0xff]  ;;  %v5014_v29 = vpack.c.bf16 %v1761_v22, %v1757_v21  ;;  %v1785_v40 = vld [vmem:[#allocation13 + $0x1b0] sm:$0xff] }
 0x243   :  { %4731 = vmatpush1.bf16.msra.mxu0 %v4730_v33  ;;  %4859 = vmatpush1.bf16.msra.mxu1 %v4858_v51  ;;  %v1742_v33 = vld [vmem:[#allocation13 + $0x58] sm:$0xff]  ;;  %v4888_v28 = vpack.c.bf16 %v1768_v56, %v1764_v12  ;;  %v1789_v22 = vld [vmem:[#allocation13 + $0x1d0] sm:$0xff]  ;;  %v1796_v56 = vld [vmem:[#allocation13 + $0x208] sm:$0xff] }
 0x244   :  { %4733 = vmatprep.subr.bf16.mxu0 %v4732_v37  ;;  %4861 = vmatprep.subr.bf16.mxu1 %v4860_v45  ;;  %v1746_v51 = vld [vmem:[#allocation13 + $0x78] sm:$0xff]  ;;  %v1739_v37 = vld [vmem:[#allocation13 + $0x40] sm:$0xff]  ;;  %v1793_v12 = vld [vmem:[#allocation13 + $0x1f0] sm:$0xff] }
 0x245   :  { %v1743_v45 = vld [vmem:[#allocation13 + $0x60] sm:$0xff]  ;;  %v5004_v52 = vpack.c.bf16 %v1746_v51, %v1742_v33  ;;  %v1772_v33 = vld [vmem:[#allocation13 + $0x148] sm:$0xff] }
 0x246   :  { %v4878_v58 = vpack.c.bf16 %v1743_v45, %v1739_v37  ;;  %v1776_v51 = vld [vmem:[#allocation13 + $0x168] sm:$0xff]  ;;  %v5018_v45 = vpack.c.bf16 %v1769_v32, %v1765_v15  ;;  %v1797_v32 = vld [vmem:[#allocation13 + $0x210] sm:$0xff] }
 0x247   :  { %4735 = vmatpush1.bf16.msra.mxu0 %v4734_v50  ;;  %4863 = vmatpush1.bf16.msra.mxu1 %v4862_v53  ;;  %v1752_v50 = vld [vmem:[#allocation13 + $0xa8] sm:$0xff]  ;;  %v1750_v53 = vld [vmem:[#allocation13 + $0x98] sm:$0xff] }
 0x248   :  { %4737 = vmatprep.subr.bf16.mxu0 %v4736_v60  ;;  %4865 = vmatprep.subr.bf16.mxu1 %v4864_v62  ;;  %v5006_v60 = vpack.c.bf16 %v1745_v39, %v1741_v0  ;;  %v1747_v62 = vld [vmem:[#allocation13 + $0x80] sm:$0xff]  ;;  %v4880_v31 = vpack.c.bf16 %v1752_v50, %v1748_v38  ;;  %v5008_v6 = vpack.c.bf16 %v1754_v55, %v1750_v53  ;;  %v1773_v39 = vld [vmem:[#allocation13 + $0x150] sm:$0xff]  ;;  %v1780_v50 = vld [vmem:[#allocation13 + $0x188] sm:$0xff] }
 0x249   :  { %v4882_v17 = vpack.c.bf16 %v1751_v1, %v1747_v62  ;;  %v1777_v38 = vld [vmem:[#allocation13 + $0x170] sm:$0xff]  ;;  %v1784_v53 = vld [vmem:[#allocation13 + $0x1a8] sm:$0xff]  ;;  %v1782_v55 = vld [vmem:[#allocation13 + $0x198] sm:$0xff] }
 0x24a   :  { %v5022_v62 = vpack.c.bf16 %v1777_v38, %v1773_v39  ;;  %v1779_v1 = vld [vmem:[#allocation13 + $0x180] sm:$0xff]  ;;  %v1805_v38 = vld [vmem:[#allocation13 + $0x250] sm:$0xff] }
 0x24b   :  { %4739 = vmatpush1.bf16.msra.mxu0 %v4738_v11  ;;  %4867 = vmatpush1.bf16.msra.mxu1 %v4866_v48  ;;  %v1758_v11 = vld [vmem:[#allocation13 + $0xd8] sm:$0xff] }
 0x24c   :  { %4741 = vmatprep.subr.bf16.mxu0 %v4740_v42  ;;  %4869 = vmatprep.subr.bf16.mxu1 %v4868_v2  ;;  %v1762_v48 = vld [vmem:[#allocation13 + $0xf8] sm:$0xff]  ;;  %v1755_v42 = vld [vmem:[#allocation13 + $0xc0] sm:$0xff] }
 0x24d   :  { %v1759_v2 = vld [vmem:[#allocation13 + $0xe0] sm:$0xff]  ;;  %v5012_v19 = vpack.c.bf16 %v1762_v48, %v1758_v11  ;;  %v1792_v11 = vld [vmem:[#allocation13 + $0x1e8] sm:$0xff]  ;;  %v1790_v48 = vld [vmem:[#allocation13 + $0x1d8] sm:$0xff] }
 0x24e   :  { %v4886_v13 = vpack.c.bf16 %v1759_v2, %v1755_v42  ;;  %v5026_v42 = vpack.c.bf16 %v1785_v40, %v1781_v16  ;;  %v1787_v2 = vld [vmem:[#allocation13 + $0x1c0] sm:$0xff]  ;;  %v1813_v40 = vld [vmem:[#allocation13 + $0x290] sm:$0xff] }
 0x24f   :  { %4743 = vmatpush1.bf16.msra.mxu0 %v4742_v23  ;;  %4871 = vmatpush1.bf16.msra.mxu1 %v4870_v27  ;;  %v1766_v23 = vld [vmem:[#allocation13 + $0x118] sm:$0xff] }
 0x250   :  { %4873 = vmatprep.subr.bf16.mxu0 %v4872_v3  ;;  %5001 = vmatprep.subr.bf16.mxu1 %v5000_v24  ;;  %v1770_v27 = vld [vmem:[#allocation13 + $0x138] sm:$0xff]  ;;  %v1763_v3 = vld [vmem:[#allocation13 + $0x100] sm:$0xff] }
 0x251   :  { %v1767_v24 = vld [vmem:[#allocation13 + $0x120] sm:$0xff]  ;;  %v5016_v9 = vpack.c.bf16 %v1770_v27, %v1766_v23  ;;  %v1800_v23 = vld [vmem:[#allocation13 + $0x228] sm:$0xff]  ;;  %v1798_v27 = vld [vmem:[#allocation13 + $0x218] sm:$0xff] }
 0x252   :  { %1407 = vmatmul.mubr.f32.vlgmr.msra.gmra.mrb[4].mxu0 %v987_v41  ;;  %1549 = vmatmul.mubr.f32.vlgmr.msra.gmra.mrb[4].mxu1 %v987_v41  ;;  %v4890_v37 = vpack.c.bf16 %v1767_v24, %v1763_v3  ;;  %v1771_v41 = vld [vmem:[#allocation13 + $0x140] sm:$0xff]  ;;  %v5030_v3 = vpack.c.bf16 %v1793_v12, %v1789_v22  ;;  %v1821_v12 = vld [vmem:[#allocation13 + $0x2d0] sm:$0xff] }
 0x253   :  { %4875 = vmatpush1.bf16.msra.mxu0 %v4874_v34  ;;  %5003 = vmatpush1.bf16.msra.mxu1 %v5002_v30  ;;  %v1774_v34 = vld [vmem:[#allocation13 + $0x158] sm:$0xff]  ;;  %v1795_v24 = vld [vmem:[#allocation13 + $0x200] sm:$0xff] }
 0x254   :  { %4877 = vmatprep.subr.bf16.mxu0 %v4876_v49  ;;  %5005 = vmatprep.subr.bf16.mxu1 %v5004_v52  ;;  %v1778_v30 = vld [vmem:[#allocation13 + $0x178] sm:$0xff]  ;;  %v1775_v49 = vld [vmem:[#allocation13 + $0x160] sm:$0xff]  ;;  %v4892_v52 = vpack.c.bf16 %v1776_v51, %v1772_v33  ;;  %v1801_v33 = vld [vmem:[#allocation13 + $0x230] sm:$0xff] }
 0x255   :  { %v5020_v0 = vpack.c.bf16 %v1778_v30, %v1774_v34  ;;  %v1804_v51 = vld [vmem:[#allocation13 + $0x248] sm:$0xff]  ;;  %v1806_v30 = vld [vmem:[#allocation13 + $0x258] sm:$0xff] }
 0x256   :  { %v1808_v34 = vld [vmem:[#allocation13 + $0x268] sm:$0xff] }
 0x257   :  { %4879 = vmatpush1.bf16.msra.mxu0 %v4878_v58  ;;  %5007 = vmatpush1.bf16.msra.mxu1 %v5006_v60  ;;  %v1786_v58 = vld [vmem:[#allocation13 + $0x1b8] sm:$0xff]  ;;  %v4894_v60 = vpack.c.bf16 %v1775_v49, %v1771_v41  ;;  %v5034_v41 = vpack.c.bf16 %v1801_v33, %v1797_v32  ;;  %v1803_v49 = vld [vmem:[#allocation13 + $0x240] sm:$0xff]  ;;  %v1829_v33 = vld [vmem:[#allocation13 + $0x310] sm:$0xff] }
 0x258   :  { %4881 = vmatprep.subr.bf16.mxu0 %v4880_v31  ;;  %5009 = vmatprep.subr.bf16.mxu1 %v5008_v6  ;;  %v1783_v31 = vld [vmem:[#allocation13 + $0x1a0] sm:$0xff]  ;;  %v4896_v6 = vpack.c.bf16 %v1784_v53, %v1780_v50  ;;  %v5024_v7 = vpack.c.bf16 %v1786_v58, %v1782_v55  ;;  %v1809_v50 = vld [vmem:[#allocation13 + $0x270] sm:$0xff]  ;;  %v1812_v53 = vld [vmem:[#allocation13 + $0x288] sm:$0xff] }
 0x259   :  { %v1816_v55 = vld [vmem:[#allocation13 + $0x2a8] sm:$0xff]  ;;  %v1814_v58 = vld [vmem:[#allocation13 + $0x298] sm:$0xff] }
 0x25b   :  { %4883 = vmatpush1.bf16.msra.mxu0 %v4882_v17  ;;  %5011 = vmatpush1.bf16.msra.mxu1 %v5010_v18  ;;  %v1794_v17 = vld [vmem:[#allocation13 + $0x1f8] sm:$0xff]  ;;  %v4898_v18 = vpack.c.bf16 %v1783_v31, %v1779_v1  ;;  %v5038_v1 = vpack.c.bf16 %v1809_v50, %v1805_v38  ;;  %v1811_v31 = vld [vmem:[#allocation13 + $0x280] sm:$0xff]  ;;  %v1837_v50 = vld [vmem:[#allocation13 + $0x350] sm:$0xff] }
 0x25c   :  { %4885 = vmatprep.subr.bf16.mxu0 %v4884_v20  ;;  %5013 = vmatprep.subr.bf16.mxu1 %v5012_v19  ;;  %v1791_v20 = vld [vmem:[#allocation13 + $0x1e0] sm:$0xff]  ;;  %v4900_v19 = vpack.c.bf16 %v1792_v11, %v1788_v8  ;;  %v5028_v21 = vpack.c.bf16 %v1794_v17, %v1790_v48  ;;  %v1817_v8 = vld [vmem:[#allocation13 + $0x2b0] sm:$0xff]  ;;  %v1820_v11 = vld [vmem:[#allocation13 + $0x2c8] sm:$0xff] }
 0x25d   :  { %v1824_v48 = vld [vmem:[#allocation13 + $0x2e8] sm:$0xff]  ;;  %v1822_v17 = vld [vmem:[#allocation13 + $0x2d8] sm:$0xff]  ;;  %v1839_v38 = vld [vmem:[#allocation13 + $0x360] sm:$0xff] }
 0x25f   :  { %4887 = vmatpush1.bf16.msra.mxu0 %v4886_v13  ;;  %5015 = vmatpush1.bf16.msra.mxu1 %v5014_v29  ;;  %v1802_v13 = vld [vmem:[#allocation13 + $0x238] sm:$0xff]  ;;  %v4902_v29 = vpack.c.bf16 %v1791_v20, %v1787_v2  ;;  %v5042_v2 = vpack.c.bf16 %v1817_v8, %v1813_v40  ;;  %v1819_v20 = vld [vmem:[#allocation13 + $0x2c0] sm:$0xff] }
 0x260   :  { %4889 = vmatprep.subr.bf16.mxu0 %v4888_v28  ;;  %5017 = vmatprep.subr.bf16.mxu1 %v5016_v9  ;;  %v1799_v28 = vld [vmem:[#allocation13 + $0x220] sm:$0xff]  ;;  %v4904_v9 = vpack.c.bf16 %v1800_v23, %v1796_v56  ;;  %v5032_v15 = vpack.c.bf16 %v1802_v13, %v1798_v27  ;;  %v1825_v56 = vld [vmem:[#allocation13 + $0x2f0] sm:$0xff]  ;;  %v1828_v23 = vld [vmem:[#allocation13 + $0x308] sm:$0xff] }
 0x261   :  { %v1832_v27 = vld [vmem:[#allocation13 + $0x328] sm:$0xff]  ;;  %v1830_v13 = vld [vmem:[#allocation13 + $0x318] sm:$0xff] }
 0x263   :  { %4891 = vmatpush1.bf16.msra.mxu0 %v4890_v37  ;;  %5019 = vmatpush1.bf16.msra.mxu1 %v5018_v45  ;;  %v1810_v37 = vld [vmem:[#allocation13 + $0x278] sm:$0xff]  ;;  %v4906_v45 = vpack.c.bf16 %v1799_v28, %v1795_v24  ;;  %v5046_v24 = vpack.c.bf16 %v1825_v56, %v1821_v12  ;;  %v1827_v28 = vld [vmem:[#allocation13 + $0x300] sm:$0xff] }
 0x264   :  { %4893 = vmatprep.subr.bf16.mxu0 %v4892_v52  ;;  %5021 = vmatprep.subr.bf16.mxu1 %v5020_v0  ;;  %v1807_v52 = vld [vmem:[#allocation13 + $0x260] sm:$0xff]  ;;  %v4908_v0 = vpack.c.bf16 %v1808_v34, %v1804_v51  ;;  %v5036_v39 = vpack.c.bf16 %v1810_v37, %v1806_v30  ;;  %v1833_v51 = vld [vmem:[#allocation13 + $0x330] sm:$0xff]  ;;  %v1836_v34 = vld [vmem:[#allocation13 + $0x348] sm:$0xff] }
 0x265   :  { %v1840_v30 = vld [vmem:[#allocation13 + $0x368] sm:$0xff]  ;;  %v1838_v37 = vld [vmem:[#allocation13 + $0x358] sm:$0xff] }
 0x267   :  { %4895 = vmatpush1.bf16.msra.mxu0 %v4894_v60  ;;  %5023 = vmatpush1.bf16.msra.mxu1 %v5022_v62  ;;  %v1818_v60 = vld [vmem:[#allocation13 + $0x2b8] sm:$0xff]  ;;  %v4910_v62 = vpack.c.bf16 %v1807_v52, %v1803_v49  ;;  %v5050_v49 = vpack.c.bf16 %v1833_v51, %v1829_v33  ;;  %v1835_v52 = vld [vmem:[#allocation13 + $0x340] sm:$0xff] }
 0x268   :  { %4897 = vmatprep.subr.bf16.mxu0 %v4896_v6  ;;  %5025 = vmatprep.subr.bf16.mxu1 %v5024_v7  ;;  %v1815_v6 = vld [vmem:[#allocation13 + $0x2a0] sm:$0xff]  ;;  %v4912_v7 = vpack.c.bf16 %v1816_v55, %v1812_v53  ;;  %v5040_v16 = vpack.c.bf16 %v1818_v60, %v1814_v58  ;;  %v1841_v53 = vld [vmem:[#allocation13 + $0x370] sm:$0xff]  ;;  %v4926_v55 = vpack.c.bf16 %v1839_v38, %v1835_v52  ;;  %v1844_v60 = vld [vmem:[#allocation13 + $0x388] sm:$0xff] }
 0x269   :  { %v5054_v58 = vpack.c.bf16 %v1841_v53, %v1837_v50  ;;  %v1249_v38 = vld [vmem:[#allocation11] sm:$0xf] }
 0x26b   :  { %4899 = vmatpush1.bf16.msra.mxu0 %v4898_v18  ;;  %5027 = vmatpush1.bf16.msra.mxu1 %v5026_v42  ;;  %v1826_v18 = vld [vmem:[#allocation13 + $0x2f8] sm:$0xff]  ;;  %v4914_v42 = vpack.c.bf16 %v1815_v6, %v1811_v31 }
 0x26c   :  { %4901 = vmatprep.subr.bf16.mxu0 %v4900_v19  ;;  %5029 = vmatprep.subr.bf16.mxu1 %v5028_v21  ;;  %v1823_v19 = vld [vmem:[#allocation13 + $0x2e0] sm:$0xff]  ;;  %v4916_v21 = vpack.c.bf16 %v1824_v48, %v1820_v11  ;;  %v5044_v22 = vpack.c.bf16 %v1826_v18, %v1822_v17  ;;  %v1850_v6 = vld [vmem:[#allocation13 + $0x3b8] sm:$0xff]  ;;  %v1845_v11 = vld [vmem:[#allocation13 + $0x390] sm:$0xff] }
 0x26d   :  { %v1849_v48 = vld [vmem:[#allocation13 + $0x3b0] sm:$0xff]  ;;  %v1852_v18 = vld [vmem:[#allocation13 + $0x3c8] sm:$0xff] }
 0x26e   :  { %v5058_v17 = vpack.c.bf16 %v1849_v48, %v1845_v11  ;;  %v1258_v48 = vrot.slane %v1249_v38, %v6508_v46 }
 0x26f   :  { %4903 = vmatpush1.bf16.msra.mxu0 %v4902_v29  ;;  %5031 = vmatpush1.bf16.msra.mxu1 %v5030_v3  ;;  %v1834_v29 = vld [vmem:[#allocation13 + $0x338] sm:$0xff]  ;;  %v4918_v3 = vpack.c.bf16 %v1823_v19, %v1819_v20 }
 0x270   :  { %4905 = vmatprep.subr.bf16.mxu0 %v4904_v9  ;;  %5033 = vmatprep.subr.bf16.mxu1 %v5032_v15  ;;  %v1831_v9 = vld [vmem:[#allocation13 + $0x320] sm:$0xff]  ;;  %v4920_v15 = vpack.c.bf16 %v1832_v27, %v1828_v23  ;;  %v5048_v32 = vpack.c.bf16 %v1834_v29, %v1830_v13  ;;  %v1858_v19 = vld [vmem:[#allocation13 + $0x3f8] sm:$0xff]  ;;  %v1853_v23 = vld [vmem:[#allocation13 + $0x3d0] sm:$0xff] }
 0x271   :  { %v1857_v27 = vld [vmem:[#allocation13 + $0x3f0] sm:$0xff]  ;;  %v1860_v29 = vld [vmem:[#allocation13 + $0x408] sm:$0xff] }
 0x272   :  { %v5062_v13 = vpack.c.bf16 %v1857_v27, %v1853_v23 }
 0x273   :  { %4907 = vmatpush1.bf16.msra.mxu0 %v4906_v45  ;;  %5035 = vmatpush1.bf16.msra.mxu1 %v5034_v41  ;;  %v1842_v45 = vld [vmem:[#allocation13 + $0x378] sm:$0xff]  ;;  %v4922_v41 = vpack.c.bf16 %v1831_v9, %v1827_v28 }
 0x274   :  { %4909 = vmatprep.subr.bf16.mxu0 %v4908_v0  ;;  %5037 = vmatprep.subr.bf16.mxu1 %v5036_v39  ;;  %v4924_v0 = vpack.c.bf16 %v1840_v30, %v1836_v34  ;;  %v5052_v39 = vpack.c.bf16 %v1842_v45, %v1838_v37  ;;  %v1866_v9 = vld [vmem:[#allocation13 + $0x438] sm:$0xff]  ;;  %v5824_v34 = vld [vmem:[%s7003_s6 + $0x8] sm:$0xff] }
 0x275   :  { %v1574_v30 = vrot.slane %v5824_v34, %v6605_v59  ;;  %v1654_v52 = vrot.slane %v5824_v34, %v6613_v63 }
 0x277   :  { %4911 = vmatpush1.bf16.msra.mxu0 %v4910_v62  ;;  %5039 = vmatpush1.bf16.msra.mxu1 %v5038_v1  ;;  %v1848_v62 = vld [vmem:[#allocation13 + $0x3a8] sm:$0xff]  ;;  %v1846_v1 = vld [vmem:[#allocation13 + $0x398] sm:$0xff]  ;;  %v1594_v53 = vrot.slane %v1574_v30, %v6500_v43 }
 0x278   :  { %4913 = vmatprep.subr.bf16.mxu0 %v4912_v7  ;;  %5041 = vmatprep.subr.bf16.mxu1 %v5040_v16  ;;  %v4928_v31 = vpack.c.bf16 %v1848_v62, %v1844_v60  ;;  %v1843_v7 = vld [vmem:[#allocation13 + $0x380] sm:$0xff]  ;;  %v5056_v40 = vpack.c.bf16 %v1850_v6, %v1846_v1  ;;  %v1674_v6 = vrot.slane %v1654_v52, %v6503_v44 }
 0x279   :  { %v1847_v16 = vld [vmem:[#allocation13 + $0x3a0] sm:$0xff] }
 0x27a   :  { %v4930_v8 = vpack.c.bf16 %v1847_v16, %v1843_v7  ;;  %v1694_v7 = vrot.slane %v5824_v34, %v6626_v10  ;;  %v1254_v16 = vrot.slane %v1249_v38, %v6500_v43 }
 0x27b   :  { %4915 = vmatpush1.bf16.msra.mxu0 %v4914_v42  ;;  %5043 = vmatpush1.bf16.msra.mxu1 %v5042_v2  ;;  %v1856_v42 = vld [vmem:[#allocation13 + $0x3e8] sm:$0xff]  ;;  %v1854_v2 = vld [vmem:[#allocation13 + $0x3d8] sm:$0xff] }
 0x27c   :  { %4917 = vmatprep.subr.bf16.mxu0 %v4916_v21  ;;  %5045 = vmatprep.subr.bf16.mxu1 %v5044_v22  ;;  %v4932_v20 = vpack.c.bf16 %v1856_v42, %v1852_v18  ;;  %v1851_v21 = vld [vmem:[#allocation13 + $0x3c0] sm:$0xff]  ;;  %v5060_v12 = vpack.c.bf16 %v1858_v19, %v1854_v2  ;;  %v1266_v18 = vrot.slane %v1249_v38, %v6511_v47 }
 0x27d   :  { %v1855_v22 = vld [vmem:[#allocation13 + $0x3e0] sm:$0xff]  ;;  %v1598_v42 = vmul.f32 %v1594_v53, %v6548_v5  ;;  %v1714_v23 = vrot.slane %v1694_v7, %v6511_v47 }
 0x27e   :  { %v4934_v56 = vpack.c.bf16 %v1855_v22, %v1851_v21  ;;  %v1867_v7 = vld [vmem:[#allocation13 + $0x440] sm:$0xff] }
 0x27f   :  { %4919 = vmatpush1.bf16.msra.mxu0 %v4918_v3  ;;  %5047 = vmatpush1.bf16.msra.mxu1 %v5046_v24  ;;  %v1864_v3 = vld [vmem:[#allocation13 + $0x428] sm:$0xff]  ;;  %v1862_v24 = vld [vmem:[#allocation13 + $0x418] sm:$0xff] }
 0x280   :  { %4921 = vmatprep.subr.bf16.mxu0 %v4920_v15  ;;  %5049 = vmatprep.subr.bf16.mxu1 %v5048_v32  ;;  %v4936_v28 = vpack.c.bf16 %v1864_v3, %v1860_v29  ;;  %v5064_v15 = vpack.c.bf16 %v1866_v9, %v1862_v24  ;;  %v1555_v32 = vld [vmem:[%s7003_s6] sm:$0xff] }
 0x281   :  { %v1562_v33 = vrot.slane %v1555_v32, %v6500_v43  ;;  %v1566_v51 = vrot.slane %v1555_v32, %v6605_v59  ;;  %v1602_v37 = vrot.slane %v1555_v32, %v6508_v46  ;;  %v1642_v45 = vrot.slane %v1555_v32, %v6503_v44 }
 0x282   :  { %v1682_v60 = vrot.slane %v1555_v32, %v6511_v47  ;;  %v1686_v62 = vrot.slane %v1555_v32, %v6626_v10 }
 0x283   :  { %4923 = vmatpush1.bf16.msra.mxu0 %v4922_v41  ;;  %5051 = vmatpush1.bf16.msra.mxu1 %v5050_v49  ;;  %v1606_v41 = vrot.slane %v1555_v32, %v6609_v61  ;;  %v1646_v49 = vrot.slane %v1555_v32, %v6613_v63  ;;  %v1586_v50 = vrot.slane %v1566_v51, %v6500_v43 }
 0x284   :  { %4925 = vmatprep.subr.bf16.mxu0 %v4924_v0  ;;  %5053 = vmatprep.subr.bf16.mxu1 %v5052_v39  ;;  %v1582_v0 = vrot.slane %v1562_v33, %v6500_v43  ;;  %v1614_v39 = vrot.slane %v5824_v34, %v6609_v61 }
 0x285   :  { %v1626_v1 = vrot.slane %v1606_v41, %v6508_v46  ;;  %v1859_v41 = vld [vmem:[#allocation13 + $0x400] sm:$0xff] }
 0x286   :  { %v1634_v11 = vrot.slane %v1614_v39, %v6508_v46  ;;  %v1863_v39 = vld [vmem:[#allocation13 + $0x420] sm:$0xff] }
 0x287   :  { %4927 = vmatpush1.bf16.msra.mxu0 %v4926_v55  ;;  %5055 = vmatpush1.bf16.msra.mxu1 %v5054_v58  ;;  %v1622_v55 = vrot.slane %v1602_v37, %v6508_v46  ;;  %v1662_v58 = vrot.slane %v1642_v45, %v6503_v44 }
 0x288   :  { %4929 = vmatprep.subr.bf16.mxu0 %v4928_v31  ;;  %5057 = vmatprep.subr.bf16.mxu1 %v5056_v40  ;;  %v1666_v31 = vrot.slane %v1646_v49, %v6503_v44  ;;  %v1595_v40 = vmul.f32 %v1582_v0, %v6548_v5  ;;  %v1638_v32 = vadd.f32 %v1634_v11, %v1598_v42  ;;  %v1873_v11 = vld [vmem:[#allocation13 + $0x470] sm:$0xff]  ;;  %v1878_v42 = vld [vmem:[#allocation13 + $0x498] sm:$0xff] }
 0x289   :  { %v1675_v2 = vmul.f32 %v1662_v58, %v6548_v5  ;;  %v1868_v58 = vld [vmem:[#allocation13 + $0x448] sm:$0xff] }
 0x28a   :  { %v1676_v22 = vmul.f32 %v1666_v31, %v6548_v5 }
 0x28b   :  { %4931 = vmatpush1.bf16.msra.mxu0 %v4930_v8  ;;  %5059 = vmatpush1.bf16.msra.mxu1 %v5058_v17  ;;  %v1262_v8 = vrot.slane %v1249_v38, %v6503_v44  ;;  %v1596_v17 = vmul.f32 %v1586_v50, %v6548_v5  ;;  %v1861_v38 = vld [vmem:[#allocation13 + $0x410] sm:$0xff] }
 0x28c   :  { %4933 = vmatprep.subr.bf16.mxu0 %v4932_v20  ;;  %5061 = vmatprep.subr.bf16.mxu1 %v5060_v12  ;;  %v1702_v20 = vrot.slane %v1682_v60, %v6511_v47  ;;  %v1706_v12 = vrot.slane %v1686_v62, %v6511_v47  ;;  %v1865_v50 = vld [vmem:[#allocation13 + $0x430] sm:$0xff]  ;;  %v1872_v60 = vld [vmem:[#allocation13 + $0x468] sm:$0xff]  ;;  %v1870_v62 = vld [vmem:[#allocation13 + $0x458] sm:$0xff] }
 0x28d   :  { %v1636_v9 = vadd.f32 %v1626_v1, %v1596_v17  ;;  %v1874_v1 = vld [vmem:[#allocation13 + $0x478] sm:$0xff] }
 0x28e   :  { %v1715_v33 = vadd.f32 %v1702_v20, %v1675_v2  ;;  %v1716_v45 = vadd.f32 %v1706_v12, %v1676_v22  ;;  %v5068_v17 = vpack.c.bf16 %v1874_v1, %v1870_v62  ;;  %v1882_v2 = vld [vmem:[#allocation13 + $0x4b8] sm:$0xff]  ;;  %v1875_v22 = vld [vmem:[#allocation13 + $0x480] sm:$0xff]  ;;  %v1897_v62 = vld [vmem:[#allocation13 + $0x530] sm:$0xff] }
 0x28f   :  { %4935 = vmatpush1.bf16.msra.mxu0 %v4934_v56  ;;  %5063 = vmatpush1.bf16.msra.mxu1 %v5062_v13  ;;  %v1678_v56 = vmul.f32 %v1674_v6, %v6548_v5  ;;  %v1635_v13 = vadd.f32 %v1622_v55, %v1595_v40  ;;  %v5066_v6 = vpack.c.bf16 %v1865_v50, %v1861_v38  ;;  %v1879_v12 = vld [vmem:[#allocation13 + $0x4a0] sm:$0xff]  ;;  %v1900_v1 = vld [vmem:[#allocation13 + $0x548] sm:$0xff] }
 0x290   :  { %4937 = vmatprep.subr.bf16.mxu0 %v4936_v28  ;;  %5065 = vmatprep.subr.bf16.mxu1 %v5064_v15  ;;  %v1891_v50 = vld [vmem:[#allocation13 + $0x500] sm:$0xff] }
 0x291   :  { %v1718_v49 = vadd.f32 %v1714_v23, %v1678_v56  ;;  %v5072_v23 = vpack.c.bf16 %v1882_v2, %v1878_v42  ;;  %v1912_v42 = vld [vmem:[#allocation13 + $0x5a8] sm:$0xff]  ;;  %v1910_v2 = vld [vmem:[#allocation13 + $0x598] sm:$0xff] }
 0x325   :  { %v1408_v19 = vpop.f32.mrb[4].mxu0  ;;  %v1550_v21 = vpop.f32.mrb[4].mxu1 }
 0x326   :  { %v5768_v27 = vadd.f32 %v1408_v19, %v1254_v16  ;;  %v5770_v29 = vadd.f32 %v1550_v21, %v1262_v8  ;;  %v1410_v3 = vpop.f32.mrb[5].mxu0  ;;  %v1552_v24 = vpop.f32.mrb[5].mxu1  ;;  %v1871_v16 = vld [vmem:[#allocation13 + $0x460] sm:$0xff]  ;;  %v1869_v8 = vld [vmem:[#allocation13 + $0x450] sm:$0xff] }
 0x327   :  { %v5769_v28 = vadd.f32 %v1410_v3, %v1258_v48  ;;  %v5771_v15 = vadd.f32 %v1552_v24, %v1266_v18  ;;  %v1876_v48 = vld [vmem:[#allocation13 + $0x488] sm:$0xff]  ;;  %v4942_v19 = vpack.c.bf16 %v1871_v16, %v1867_v7  ;;  %v5070_v21 = vpack.c.bf16 %v1873_v11, %v1869_v8  ;;  %v1886_v24 = vld [vmem:[#allocation13 + $0x4d8] sm:$0xff]  ;;  %v1903_v8 = vld [vmem:[#allocation13 + $0x560] sm:$0xff] }
 0x328   :  { %v1719_v51 = vmul.f32 %v5768_v27, %v1635_v13  ;;  %v1721_v34 = vmul.f32 %v5770_v29, %v6586_v35  ;;  %v4938_v35 = vpack.c.bf16 %v1863_v39, %v1859_v41  ;;  %v1880_v18 = vld [vmem:[#allocation13 + $0x4a8] sm:$0xff]  ;;  %v1877_v27 = vld [vmem:[#allocation13 + $0x490] sm:$0xff] }
 0x329   :  { %v1720_v30 = vmul.f32 %v5769_v28, %v1636_v9  ;;  %v1722_v37 = vmul.f32 %v5771_v15, %v1638_v32  ;;  %v4944_v56 = vpack.c.bf16 %v1880_v18, %v1876_v48  ;;  %v1881_v13 = vld [vmem:[#allocation13 + $0x4b0] sm:$0xff]  ;;  %v1884_v29 = vld [vmem:[#allocation13 + $0x4c8] sm:$0xff]  ;;  %v1890_v28 = vld [vmem:[#allocation13 + $0x4f8] sm:$0xff]  ;;  %v4946_v9 = vpack.c.bf16 %v1879_v12, %v1875_v22 }
 0x32a   :  { %v1723_v52 = vadd.f32 %v1719_v51, %v1715_v33  ;;  %v6812_v0 = vadd.f32 %v1721_v34, %v6588_v36  ;;  %v4940_v36 = vpack.c.bf16 %v1872_v60, %v1868_v58  ;;  %v1888_v3 = vld [vmem:[#allocation13 + $0x4e8] sm:$0xff]  ;;  %v5074_v15 = vpack.c.bf16 %v1881_v13, %v1877_v27  ;;  %v1883_v32 = vld [vmem:[#allocation13 + $0x4c0] sm:$0xff]  ;;  %v1893_v60 = vld [vmem:[#allocation13 + $0x510] sm:$0xff] }
 0x32b   :  { %v1724_v53 = vadd.f32 %v1720_v30, %v1716_v45  ;;  %v1726_v55 = vadd.f32 %v1722_v37, %v1718_v49  ;;  %v1887_v33 = vld [vmem:[#allocation13 + $0x4e0] sm:$0xff]  ;;  %v4948_v51 = vpack.c.bf16 %v1888_v3, %v1884_v29  ;;  %v5076_v34 = vpack.c.bf16 %v1890_v28, %v1886_v24  ;;  %v1885_v30 = vld [vmem:[#allocation13 + $0x4d0] sm:$0xff]  ;;  %v1892_v45 = vld [vmem:[#allocation13 + $0x508] sm:$0xff] }
 0x32c   :  { %v1727_v40 = vmax.f32 %v1723_v52, 0.0  ;;  %v1889_v37 = vld [vmem:[#allocation13 + $0x4f0] sm:$0xff]  ;;  %v1896_v41 = vld [vmem:[#allocation13 + $0x528] sm:$0xff]  ;;  %v1894_v49 = vld [vmem:[#allocation13 + $0x518] sm:$0xff]  ;;  %v4950_v39 = vpack.c.bf16 %v1887_v33, %v1883_v32  ;;  %v5082_v16 = vpack.c.bf16 %v1897_v62, %v1893_v60 }
 0x32d   :  { %v1728_v31 = vmax.f32 %v1724_v53, 0.0  ;;  %v1730_v20 = vmax.f32 %v1726_v55, 0.0  ;;  %v1898_v52 = vld [vmem:[#allocation13 + $0x538] sm:$0xff]  ;;  %v5078_v38 = vpack.c.bf16 %v1889_v37, %v1885_v30  ;;  %v1895_v53 = vld [vmem:[#allocation13 + $0x520] sm:$0xff]  ;;  %v4952_v55 = vpack.c.bf16 %v1896_v41, %v1892_v45  ;;  %v1908_v18 = vld [vmem:[#allocation13 + $0x588] sm:$0xff] }
 0x32e   :  { %v5080_v58 = vpack.c.bf16 %v1898_v52, %v1894_v49  ;;  %v4954_v7 = vpack.c.bf16 %v1895_v53, %v1891_v50  ;;  %v1907_v22 = vld [vmem:[#allocation13 + $0x580] sm:$0xff]  ;;  %v1909_v27 = vld [vmem:[#allocation13 + $0x590] sm:$0xff]  ;;  %v1916_v29 = vld [vmem:[#allocation13 + $0x5c8] sm:$0xff] }
 0x32f   :  { %2073 = vmatprep.mubr.f32.mxu0 %v1728_v31  ;;  %2215 = vmatprep.mubr.f32.mxu1 %v1728_v31  ;;  %v1904_v31 = vld [vmem:[#allocation13 + $0x568] sm:$0xff]  ;;  %v1911_v12 = vld [vmem:[#allocation13 + $0x5a0] sm:$0xff]  ;;  %v1913_v13 = vld [vmem:[#allocation13 + $0x5b0] sm:$0xff] }
 0x330   :  { %2074 = vmatmul.mubr.f32.vlgmr.msra.gmra.mrb[6].mxu0 %v1727_v40  ;;  %2216 = vmatmul.mubr.f32.vlgmr.msra.gmra.mrb[6].mxu1 %v1727_v40  ;;  %v1899_v40 = vld [vmem:[#allocation13 + $0x540] sm:$0xff]  ;;  %v4956_v11 = vpack.c.bf16 %v1904_v31, %v1900_v1  ;;  %v1920_v3 = vld [vmem:[#allocation13 + $0x5e8] sm:$0xff]  ;;  %v1918_v24 = vld [vmem:[#allocation13 + $0x5d8] sm:$0xff] }
 0x331   :  { %4939 = vmatpush1.bf16.msra.mxu0 %v4938_v35  ;;  %5067 = vmatpush1.bf16.msra.mxu1 %v5066_v6  ;;  %v1902_v35 = vld [vmem:[#allocation13 + $0x558] sm:$0xff]  ;;  %v1915_v32 = vld [vmem:[#allocation13 + $0x5c0] sm:$0xff]  ;;  %v1917_v30 = vld [vmem:[#allocation13 + $0x5d0] sm:$0xff] }
 0x332   :  { %2144 = vmatprep.mubr.f32.mxu0 %v1730_v20  ;;  %2286 = vmatprep.mubr.f32.mxu1 %v1730_v20  ;;  %v1906_v6 = vld [vmem:[#allocation13 + $0x578] sm:$0xff]  ;;  %v1919_v33 = vld [vmem:[#allocation13 + $0x5e0] sm:$0xff]  ;;  %v1921_v37 = vld [vmem:[#allocation13 + $0x5f0] sm:$0xff] }
 0x333   :  { %4941 = vmatprep.subr.bf16.mxu0 %v4940_v36  ;;  %5069 = vmatprep.subr.bf16.mxu1 %v5068_v17  ;;  %v5084_v48 = vpack.c.bf16 %v1906_v6, %v1902_v35  ;;  %v1901_v36 = vld [vmem:[#allocation13 + $0x550] sm:$0xff]  ;;  %v1914_v20 = vld [vmem:[#allocation13 + $0x5b8] sm:$0xff]  ;;  %v1924_v45 = vld [vmem:[#allocation13 + $0x608] sm:$0xff] }
 0x334   :  { %v1905_v17 = vld [vmem:[#allocation13 + $0x570] sm:$0xff]  ;;  %v1922_v28 = vld [vmem:[#allocation13 + $0x5f8] sm:$0xff]  ;;  %v1928_v41 = vld [vmem:[#allocation13 + $0x628] sm:$0xff] }
 0x335   :  { %4943 = vmatpush1.bf16.msra.mxu0 %v4942_v19  ;;  %5071 = vmatpush1.bf16.msra.mxu1 %v5070_v21  ;;  %v4958_v19 = vpack.c.bf16 %v1903_v8, %v1899_v40  ;;  %v5086_v21 = vpack.c.bf16 %v1905_v17, %v1901_v36  ;;  %v1926_v49 = vld [vmem:[#allocation13 + $0x618] sm:$0xff]  ;;  %v1923_v50 = vld [vmem:[#allocation13 + $0x600] sm:$0xff]  ;;  %v1925_v60 = vld [vmem:[#allocation13 + $0x610] sm:$0xff] }
 0x336   :  { %4945 = vmatprep.subr.bf16.mxu0 %v4944_v56  ;;  %5073 = vmatprep.subr.bf16.mxu1 %v5072_v23  ;;  %v4960_v56 = vpack.c.bf16 %v1912_v42, %v1908_v18  ;;  %v5088_v23 = vpack.c.bf16 %v1914_v20, %v1910_v2  ;;  %v1930_v52 = vld [vmem:[#allocation13 + $0x638] sm:$0xff]  ;;  %v1927_v53 = vld [vmem:[#allocation13 + $0x620] sm:$0xff]  ;;  %v1929_v62 = vld [vmem:[#allocation13 + $0x630] sm:$0xff] }
 0x337   :  { %v1932_v1 = vld [vmem:[#allocation13 + $0x648] sm:$0xff]  ;;  %v1934_v35 = vld [vmem:[#allocation13 + $0x658] sm:$0xff]  ;;  %v1931_v40 = vld [vmem:[#allocation13 + $0x640] sm:$0xff] }
 0x338   :  { %v1936_v31 = vld [vmem:[#allocation13 + $0x668] sm:$0xff]  ;;  %v1938_v6 = vld [vmem:[#allocation13 + $0x678] sm:$0xff]  ;;  %v1935_v8 = vld [vmem:[#allocation13 + $0x660] sm:$0xff] }
 0x339   :  { %4947 = vmatpush1.bf16.msra.mxu0 %v4946_v9  ;;  %5075 = vmatpush1.bf16.msra.mxu1 %v5074_v15  ;;  %v4962_v9 = vpack.c.bf16 %v1911_v12, %v1907_v22  ;;  %v5090_v15 = vpack.c.bf16 %v1913_v13, %v1909_v27  ;;  %v1933_v36 = vld [vmem:[#allocation13 + $0x650] sm:$0xff]  ;;  %v1940_v18 = vld [vmem:[#allocation13 + $0x688] sm:$0xff]  ;;  %v1942_v2 = vld [vmem:[#allocation13 + $0x698] sm:$0xff] }
 0x33a   :  { %4949 = vmatprep.subr.bf16.mxu0 %v4948_v51  ;;  %5077 = vmatprep.subr.bf16.mxu1 %v5076_v34  ;;  %v4964_v51 = vpack.c.bf16 %v1920_v3, %v1916_v29  ;;  %v5092_v34 = vpack.c.bf16 %v1922_v28, %v1918_v24  ;;  %v1937_v17 = vld [vmem:[#allocation13 + $0x670] sm:$0xff]  ;;  %v1944_v42 = vld [vmem:[#allocation13 + $0x6a8] sm:$0xff]  ;;  %v1946_v20 = vld [vmem:[#allocation13 + $0x6b8] sm:$0xff] }
 0x33b   :  { %v1939_v22 = vld [vmem:[#allocation13 + $0x680] sm:$0xff]  ;;  %v1941_v27 = vld [vmem:[#allocation13 + $0x690] sm:$0xff]  ;;  %v1948_v29 = vld [vmem:[#allocation13 + $0x6c8] sm:$0xff] }
 0x33c   :  { %v1943_v12 = vld [vmem:[#allocation13 + $0x6a0] sm:$0xff]  ;;  %v1945_v13 = vld [vmem:[#allocation13 + $0x6b0] sm:$0xff]  ;;  %v1952_v3 = vld [vmem:[#allocation13 + $0x6e8] sm:$0xff] }
 0x33d   :  { %4951 = vmatpush1.bf16.msra.mxu0 %v4950_v39  ;;  %5079 = vmatpush1.bf16.msra.mxu1 %v5078_v38  ;;  %v4966_v39 = vpack.c.bf16 %v1919_v33, %v1915_v32  ;;  %v5094_v38 = vpack.c.bf16 %v1921_v37, %v1917_v30  ;;  %v1950_v24 = vld [vmem:[#allocation13 + $0x6d8] sm:$0xff]  ;;  %v1947_v32 = vld [vmem:[#allocation13 + $0x6c0] sm:$0xff]  ;;  %v1949_v30 = vld [vmem:[#allocation13 + $0x6d0] sm:$0xff] }
 0x33e   :  { %4953 = vmatprep.subr.bf16.mxu0 %v4952_v55  ;;  %5081 = vmatprep.subr.bf16.mxu1 %v5080_v58  ;;  %v4968_v55 = vpack.c.bf16 %v1928_v41, %v1924_v45  ;;  %v5096_v58 = vpack.c.bf16 %v1930_v52, %v1926_v49  ;;  %v1954_v28 = vld [vmem:[#allocation13 + $0x6f8] sm:$0xff]  ;;  %v1951_v33 = vld [vmem:[#allocation13 + $0x6e0] sm:$0xff]  ;;  %v1953_v37 = vld [vmem:[#allocation13 + $0x6f0] sm:$0xff] }
 0x33f   :  { %v1956_v45 = vld [vmem:[#allocation13 + $0x708] sm:$0xff]  ;;  %v1958_v49 = vld [vmem:[#allocation13 + $0x718] sm:$0xff] }
 0x340   :  { %v1960_v41 = vld [vmem:[#allocation13 + $0x728] sm:$0xff]  ;;  %v1962_v52 = vld [vmem:[#allocation13 + $0x738] sm:$0xff] }
 0x341   :  { %4955 = vmatpush1.bf16.msra.mxu0 %v4954_v7  ;;  %5083 = vmatpush1.bf16.msra.mxu1 %v5082_v16  ;;  %v4970_v7 = vpack.c.bf16 %v1927_v53, %v1923_v50  ;;  %v5098_v16 = vpack.c.bf16 %v1929_v62, %v1925_v60  ;;  %v1955_v50 = vld [vmem:[#allocation13 + $0x700] sm:$0xff]  ;;  %v1957_v60 = vld [vmem:[#allocation13 + $0x710] sm:$0xff] }
 0x342   :  { %4957 = vmatprep.subr.bf16.mxu0 %v4956_v11  ;;  %5085 = vmatprep.subr.bf16.mxu1 %v5084_v48  ;;  %v4972_v11 = vpack.c.bf16 %v1936_v31, %v1932_v1  ;;  %v5100_v48 = vpack.c.bf16 %v1938_v6, %v1934_v35  ;;  %v1959_v53 = vld [vmem:[#allocation13 + $0x720] sm:$0xff]  ;;  %v1961_v62 = vld [vmem:[#allocation13 + $0x730] sm:$0xff]  ;;  %v1964_v1 = vld [vmem:[#allocation13 + $0x748] sm:$0xff] }
 0x343   :  { %v1968_v31 = vld [vmem:[#allocation13 + $0x768] sm:$0xff]  ;;  %v1966_v35 = vld [vmem:[#allocation13 + $0x758] sm:$0xff] }
 0x344   :  { %v1970_v6 = vld [vmem:[#allocation13 + $0x778] sm:$0xff] }
 0x345   :  { %4959 = vmatpush1.bf16.msra.mxu0 %v4958_v19  ;;  %5087 = vmatpush1.bf16.msra.mxu1 %v5086_v21  ;;  %v4974_v19 = vpack.c.bf16 %v1935_v8, %v1931_v40  ;;  %v5102_v21 = vpack.c.bf16 %v1937_v17, %v1933_v36  ;;  %v1963_v40 = vld [vmem:[#allocation13 + $0x740] sm:$0xff]  ;;  %v1965_v36 = vld [vmem:[#allocation13 + $0x750] sm:$0xff] }
 0x346   :  { %4961 = vmatprep.subr.bf16.mxu0 %v4960_v56  ;;  %5089 = vmatprep.subr.bf16.mxu1 %v5088_v23  ;;  %v4976_v56 = vpack.c.bf16 %v1944_v42, %v1940_v18  ;;  %v5104_v23 = vpack.c.bf16 %v1946_v20, %v1942_v2  ;;  %v1967_v8 = vld [vmem:[#allocation13 + $0x760] sm:$0xff]  ;;  %v1969_v17 = vld [vmem:[#allocation13 + $0x770] sm:$0xff]  ;;  %v1972_v18 = vld [vmem:[#allocation13 + $0x788] sm:$0xff] }
 0x347   :  { %v1976_v42 = vld [vmem:[#allocation13 + $0x7a8] sm:$0xff]  ;;  %v1974_v2 = vld [vmem:[#allocation13 + $0x798] sm:$0xff] }
 0x348   :  { %v1978_v20 = vld [vmem:[#allocation13 + $0x7b8] sm:$0xff] }
 0x349   :  { %4963 = vmatpush1.bf16.msra.mxu0 %v4962_v9  ;;  %5091 = vmatpush1.bf16.msra.mxu1 %v5090_v15  ;;  %v4978_v9 = vpack.c.bf16 %v1943_v12, %v1939_v22  ;;  %v5106_v15 = vpack.c.bf16 %v1945_v13, %v1941_v27  ;;  %v1971_v22 = vld [vmem:[#allocation13 + $0x780] sm:$0xff]  ;;  %v1973_v27 = vld [vmem:[#allocation13 + $0x790] sm:$0xff] }
 0x34a   :  { %4965 = vmatprep.subr.bf16.mxu0 %v4964_v51  ;;  %5093 = vmatprep.subr.bf16.mxu1 %v5092_v34  ;;  %v4980_v51 = vpack.c.bf16 %v1952_v3, %v1948_v29  ;;  %v5108_v34 = vpack.c.bf16 %v1954_v28, %v1950_v24  ;;  %v1975_v12 = vld [vmem:[#allocation13 + $0x7a0] sm:$0xff]  ;;  %v1977_v13 = vld [vmem:[#allocation13 + $0x7b0] sm:$0xff]  ;;  %v1980_v29 = vld [vmem:[#allocation13 + $0x7c8] sm:$0xff] }
 0x34b   :  { %v1984_v3 = vld [vmem:[#allocation13 + $0x7e8] sm:$0xff]  ;;  %v1982_v24 = vld [vmem:[#allocation13 + $0x7d8] sm:$0xff] }
 0x34c   :  { %v1986_v28 = vld [vmem:[#allocation13 + $0x7f8] sm:$0xff] }
 0x34d   :  { %4967 = vmatpush1.bf16.msra.mxu0 %v4966_v39  ;;  %5095 = vmatpush1.bf16.msra.mxu1 %v5094_v38  ;;  %v4982_v39 = vpack.c.bf16 %v1951_v33, %v1947_v32  ;;  %v5110_v38 = vpack.c.bf16 %v1953_v37, %v1949_v30  ;;  %v1979_v32 = vld [vmem:[#allocation13 + $0x7c0] sm:$0xff]  ;;  %v1981_v30 = vld [vmem:[#allocation13 + $0x7d0] sm:$0xff] }
 0x34e   :  { %4969 = vmatprep.subr.bf16.mxu0 %v4968_v55  ;;  %5097 = vmatprep.subr.bf16.mxu1 %v5096_v58  ;;  %v4984_v55 = vpack.c.bf16 %v1960_v41, %v1956_v45  ;;  %v5112_v58 = vpack.c.bf16 %v1962_v52, %v1958_v49  ;;  %v1983_v33 = vld [vmem:[#allocation13 + $0x7e0] sm:$0xff]  ;;  %v1985_v37 = vld [vmem:[#allocation13 + $0x7f0] sm:$0xff] }
 0x34f   :  { %v2470_v45 = vld [vmem:[#allocation16 + $0x8] sm:$0xff]  ;;  %v2472_v49 = vld [vmem:[#allocation16 + $0x18] sm:$0xff] }
 0x350   :  { %v2474_v41 = vld [vmem:[#allocation16 + $0x28] sm:$0xff]  ;;  %v2476_v52 = vld [vmem:[#allocation16 + $0x38] sm:$0xff] }
 0x351   :  { %4971 = vmatpush1.bf16.msra.mxu0 %v4970_v7  ;;  %5099 = vmatpush1.bf16.msra.mxu1 %v5098_v16  ;;  %v4986_v7 = vpack.c.bf16 %v1959_v53, %v1955_v50  ;;  %v5114_v16 = vpack.c.bf16 %v1961_v62, %v1957_v60  ;;  %v5128_v50 = vpack.c.bf16 %v2474_v41, %v2470_v45  ;;  %v2471_v60 = vld [vmem:[#allocation16 + $0x10] sm:$0xff]  ;;  %v2502_v45 = vld [vmem:[#allocation16 + $0x108] sm:$0xff] }
 0x352   :  { %4973 = vmatprep.subr.bf16.mxu0 %v4972_v11  ;;  %5101 = vmatprep.subr.bf16.mxu1 %v5100_v48  ;;  %v4988_v11 = vpack.c.bf16 %v1968_v31, %v1964_v1  ;;  %v5116_v48 = vpack.c.bf16 %v1970_v6, %v1966_v35  ;;  %v5256_v53 = vpack.c.bf16 %v2476_v52, %v2472_v49  ;;  %v2475_v62 = vld [vmem:[#allocation16 + $0x30] sm:$0xff]  ;;  %v2478_v1 = vld [vmem:[#allocation16 + $0x48] sm:$0xff]  ;;  %v2480_v35 = vld [vmem:[#allocation16 + $0x58] sm:$0xff] }
 0x353   :  { %v2482_v31 = vld [vmem:[#allocation16 + $0x68] sm:$0xff]  ;;  %v2484_v6 = vld [vmem:[#allocation16 + $0x78] sm:$0xff] }
 0x354   :  { %v2506_v41 = vld [vmem:[#allocation16 + $0x128] sm:$0xff]  ;;  %v2504_v49 = vld [vmem:[#allocation16 + $0x118] sm:$0xff] }
 0x355   :  { %4975 = vmatpush1.bf16.msra.mxu0 %v4974_v19  ;;  %5103 = vmatpush1.bf16.msra.mxu1 %v5102_v21  ;;  %v4990_v19 = vpack.c.bf16 %v1967_v8, %v1963_v40  ;;  %v5118_v21 = vpack.c.bf16 %v1969_v17, %v1965_v36  ;;  %v5258_v40 = vpack.c.bf16 %v2475_v62, %v2471_v60  ;;  %v2477_v8 = vld [vmem:[#allocation16 + $0x40] sm:$0xff]  ;;  %v990_v36 = vmax.f32 %v6765_v25, 0.0  ;;  %v2508_v52 = vld [vmem:[#allocation16 + $0x138] sm:$0xff]  ;;  %v2507_v62 = vld [vmem:[#allocation16 + $0x130] sm:$0xff] }
 0x356   :  { %4977 = vmatprep.subr.bf16.mxu0 %v4976_v56  ;;  %5105 = vmatprep.subr.bf16.mxu1 %v5104_v23  ;;  %v4992_v56 = vpack.c.bf16 %v1976_v42, %v1972_v18  ;;  %v5120_v23 = vpack.c.bf16 %v1978_v20, %v1974_v2  ;;  %v5132_v17 = vpack.c.bf16 %v2482_v31, %v2478_v1  ;;  %v2483_v42 = vld [vmem:[#allocation16 + $0x70] sm:$0xff]  ;;  %v2486_v2 = vld [vmem:[#allocation16 + $0x88] sm:$0xff] }
 0x357   :  { %v5260_v18 = vpack.c.bf16 %v2484_v6, %v2480_v35  ;;  %v2490_v20 = vld [vmem:[#allocation16 + $0xa8] sm:$0xff]  ;;  %v5272_v60 = vpack.c.bf16 %v2508_v52, %v2504_v49  ;;  %v2512_v35 = vld [vmem:[#allocation16 + $0x158] sm:$0xff] }
 0x358   :  { %v2510_v1 = vld [vmem:[#allocation16 + $0x148] sm:$0xff]  ;;  %v2516_v6 = vld [vmem:[#allocation16 + $0x178] sm:$0xff] }
 0x359   :  { %4979 = vmatpush1.bf16.msra.mxu0 %v4978_v9  ;;  %5107 = vmatpush1.bf16.msra.mxu1 %v5106_v15  ;;  %v4994_v9 = vpack.c.bf16 %v1975_v12, %v1971_v22  ;;  %v5122_v15 = vpack.c.bf16 %v1977_v13, %v1973_v27  ;;  %v5136_v12 = vpack.c.bf16 %v2490_v20, %v2486_v2  ;;  %v2487_v27 = vld [vmem:[#allocation16 + $0x90] sm:$0xff]  ;;  %v2514_v31 = vld [vmem:[#allocation16 + $0x168] sm:$0xff]  ;;  %v2520_v2 = vld [vmem:[#allocation16 + $0x198] sm:$0xff] }
 0x35a   :  { %4981 = vmatprep.subr.bf16.mxu0 %v4980_v51  ;;  %5109 = vmatprep.subr.bf16.mxu1 %v5108_v34  ;;  %v4996_v51 = vpack.c.bf16 %v1984_v3, %v1980_v29  ;;  %v5124_v34 = vpack.c.bf16 %v1986_v28, %v1982_v24  ;;  %v2491_v13 = vld [vmem:[#allocation16 + $0xb0] sm:$0xff]  ;;  %v2494_v29 = vld [vmem:[#allocation16 + $0xc8] sm:$0xff]  ;;  %v2496_v24 = vld [vmem:[#allocation16 + $0xd8] sm:$0xff] }
 0x35b   :  { %v2498_v3 = vld [vmem:[#allocation16 + $0xe8] sm:$0xff]  ;;  %v2500_v28 = vld [vmem:[#allocation16 + $0xf8] sm:$0xff] }
 0x35c   :  { %v2524_v20 = vld [vmem:[#allocation16 + $0x1b8] sm:$0xff] }
 0x35d   :  { %4983 = vmatpush1.bf16.msra.mxu0 %v4982_v39  ;;  %5111 = vmatpush1.bf16.msra.mxu1 %v5110_v38  ;;  %v4998_v39 = vpack.c.bf16 %v1983_v33, %v1979_v32  ;;  %v5126_v38 = vpack.c.bf16 %v1985_v37, %v1981_v30  ;;  %v5140_v32 = vpack.c.bf16 %v2498_v3, %v2494_v29  ;;  %v2493_v33 = vld [vmem:[#allocation16 + $0xc0] sm:$0xff]  ;;  %v2499_v37 = vld [vmem:[#allocation16 + $0xf0] sm:$0xff]  ;;  %v2528_v29 = vld [vmem:[#allocation16 + $0x1d8] sm:$0xff] }
 0x35e   :  { %4985 = vmatprep.subr.bf16.mxu0 %v4984_v55  ;;  %5113 = vmatprep.subr.bf16.mxu1 %v5112_v58  ;;  %v2469_v55 = vld [vmem:[#allocation16] sm:$0xff]  ;;  %v5268_v30 = vpack.c.bf16 %v2500_v28, %v2496_v24  ;;  %v2532_v3 = vld [vmem:[#allocation16 + $0x1f8] sm:$0xff] }
 0x35f   :  { %v2473_v58 = vld [vmem:[#allocation16 + $0x20] sm:$0xff] }
 0x361   :  { %4987 = vmatpush1.bf16.msra.mxu0 %v4986_v7  ;;  %5115 = vmatpush1.bf16.msra.mxu1 %v5114_v16  ;;  %v5130_v7 = vpack.c.bf16 %v2473_v58, %v2469_v55  ;;  %v1729_v16 = vmax.f32 %v6812_v0, 0.0  ;;  %v2505_v55 = vld [vmem:[#allocation16 + $0x120] sm:$0xff]  ;;  %v2503_v58 = vld [vmem:[#allocation16 + $0x110] sm:$0xff] }
 0x362   :  { %4989 = vmatprep.subr.bf16.mxu0 %v4988_v11  ;;  %5117 = vmatprep.subr.bf16.mxu1 %v5116_v48  ;;  %v2481_v11 = vld [vmem:[#allocation16 + $0x60] sm:$0xff]  ;;  %v2479_v48 = vld [vmem:[#allocation16 + $0x50] sm:$0xff] }
 0x363   :  { %v5134_v0 = vpack.c.bf16 %v2481_v11, %v2477_v8  ;;  %v5262_v22 = vpack.c.bf16 %v2483_v42, %v2479_v48  ;;  %v2509_v8 = vld [vmem:[#allocation16 + $0x140] sm:$0xff]  ;;  %v2511_v48 = vld [vmem:[#allocation16 + $0x150] sm:$0xff]  ;;  %v2522_v42 = vld [vmem:[#allocation16 + $0x1a8] sm:$0xff] }
 0x364   :  { %v2513_v11 = vld [vmem:[#allocation16 + $0x160] sm:$0xff] }
 0x365   :  { %4991 = vmatpush1.bf16.msra.mxu0 %v4990_v19  ;;  %5119 = vmatpush1.bf16.msra.mxu1 %v5118_v21  ;;  %v2488_v19 = vld [vmem:[#allocation16 + $0x98] sm:$0xff] }
 0x366   :  { %4993 = vmatprep.subr.bf16.mxu0 %v4992_v56  ;;  %5121 = vmatprep.subr.bf16.mxu1 %v5120_v23  ;;  %v2492_v21 = vld [vmem:[#allocation16 + $0xb8] sm:$0xff]  ;;  %v2485_v56 = vld [vmem:[#allocation16 + $0x80] sm:$0xff] }
 0x367   :  { %v2489_v23 = vld [vmem:[#allocation16 + $0xa0] sm:$0xff]  ;;  %v5264_v25 = vpack.c.bf16 %v2492_v21, %v2488_v19  ;;  %v5150_v19 = vpack.c.bf16 %v2513_v11, %v2509_v8  ;;  %v2543_v8 = vld [vmem:[#allocation16 + $0x250] sm:$0xff] }
 0x369   :  { %4995 = vmatpush1.bf16.msra.mxu0 %v4994_v9  ;;  %5123 = vmatpush1.bf16.msra.mxu1 %v5122_v15  ;;  %v5138_v9 = vpack.c.bf16 %v2489_v23, %v2485_v56  ;;  %v5266_v15 = vpack.c.bf16 %v2491_v13, %v2487_v27  ;;  %v2519_v56 = vld [vmem:[#allocation16 + $0x190] sm:$0xff]  ;;  %v5280_v23 = vpack.c.bf16 %v2524_v20, %v2520_v2  ;;  %v2530_v13 = vld [vmem:[#allocation16 + $0x1e8] sm:$0xff] }
 0x36a   :  { %4997 = vmatprep.subr.bf16.mxu0 %v4996_v51  ;;  %5125 = vmatprep.subr.bf16.mxu1 %v5124_v34  ;;  %v2497_v51 = vld [vmem:[#allocation16 + $0xe0] sm:$0xff]  ;;  %v2495_v34 = vld [vmem:[#allocation16 + $0xd0] sm:$0xff] }
 0x36b   :  { %v2523_v27 = vld [vmem:[#allocation16 + $0x1b0] sm:$0xff] }
 0x36c   :  { %v5282_v28 = vpack.c.bf16 %v2523_v27, %v2519_v56  ;;  %v2555_v56 = vld [vmem:[#allocation16 + $0x2b0] sm:$0xff]  ;;  %v2562_v27 = vld [vmem:[#allocation16 + $0x2e8] sm:$0xff] }
 0x36d   :  { %4999 = vmatpush1.bf16.msra.mxu0 %v4998_v39  ;;  %5127 = vmatpush1.bf16.msra.mxu1 %v5126_v38  ;;  %v5142_v39 = vpack.c.bf16 %v2497_v51, %v2493_v33  ;;  %v5270_v38 = vpack.c.bf16 %v2499_v37, %v2495_v34  ;;  %v2527_v33 = vld [vmem:[#allocation16 + $0x1d0] sm:$0xff]  ;;  %v5284_v51 = vpack.c.bf16 %v2532_v3, %v2528_v29  ;;  %v2538_v37 = vld [vmem:[#allocation16 + $0x228] sm:$0xff] }
 0x36e   :  { %5129 = vmatprep.subr.bf16.mxu0 %v5128_v50  ;;  %5257 = vmatprep.subr.bf16.mxu1 %v5256_v53  ;;  %v5144_v50 = vpack.c.bf16 %v2506_v41, %v2502_v45  ;;  %v2501_v53 = vld [vmem:[#allocation16 + $0x100] sm:$0xff]  ;;  %v2531_v34 = vld [vmem:[#allocation16 + $0x1f0] sm:$0xff]  ;;  %v2536_v45 = vld [vmem:[#allocation16 + $0x218] sm:$0xff] }
 0x36f   :  { %v2540_v41 = vld [vmem:[#allocation16 + $0x238] sm:$0xff]  ;;  %v5286_v52 = vpack.c.bf16 %v2531_v34, %v2527_v33  ;;  %v2563_v33 = vld [vmem:[#allocation16 + $0x2f0] sm:$0xff]  ;;  %v2570_v34 = vld [vmem:[#allocation16 + $0x328] sm:$0xff] }
 0x370   :  { %2145 = vmatmul.mubr.f32.vlgmr.msra.gmra.mrb[6].mxu0 %v1729_v16  ;;  %2287 = vmatmul.mubr.f32.vlgmr.msra.gmra.mrb[6].mxu1 %v1729_v16  ;;  %v5274_v16 = vpack.c.bf16 %v2507_v62, %v2503_v58  ;;  %v2539_v58 = vld [vmem:[#allocation16 + $0x230] sm:$0xff]  ;;  %v2546_v62 = vld [vmem:[#allocation16 + $0x268] sm:$0xff] }
 0x371   :  { %5131 = vmatpush1.bf16.msra.mxu0 %v5130_v7  ;;  %2811 = vmatprep.mubr.f32.mxu0 %v990_v36  ;;  %v5146_v7 = vpack.c.bf16 %v2505_v55, %v2501_v53  ;;  %v2535_v53 = vld [vmem:[#allocation16 + $0x210] sm:$0xff]  ;;  %v5288_v55 = vpack.c.bf16 %v2540_v41, %v2536_v45 }
 0x372   :  { %5259 = vmatpush1.bf16.msra.mxu1 %v5258_v40  ;;  %2953 = vmatprep.mubr.f32.mxu1 %v990_v36  ;;  %v5148_v40 = vpack.c.bf16 %v2514_v31, %v2510_v1  ;;  %v5276_v36 = vpack.c.bf16 %v2516_v6, %v2512_v35  ;;  %v2544_v1 = vld [vmem:[#allocation16 + $0x258] sm:$0xff]  ;;  %v5290_v6 = vpack.c.bf16 %v2539_v58, %v2535_v53  ;;  %v2571_v53 = vld [vmem:[#allocation16 + $0x330] sm:$0xff]  ;;  %v2578_v58 = vld [vmem:[#allocation16 + $0x368] sm:$0xff] }
 0x373   :  { %5133 = vmatprep.subr.bf16.mxu0 %v5132_v17  ;;  %5261 = vmatprep.subr.bf16.mxu1 %v5260_v18  ;;  %v2515_v17 = vld [vmem:[#allocation16 + $0x170] sm:$0xff]  ;;  %v2518_v18 = vld [vmem:[#allocation16 + $0x188] sm:$0xff]  ;;  %v2548_v31 = vld [vmem:[#allocation16 + $0x278] sm:$0xff] }
 0x374   :  { %v5278_v21 = vpack.c.bf16 %v2515_v17, %v2511_v48  ;;  %v5292_v11 = vpack.c.bf16 %v2548_v31, %v2544_v1  ;;  %v2547_v48 = vld [vmem:[#allocation16 + $0x270] sm:$0xff]  ;;  %v2554_v17 = vld [vmem:[#allocation16 + $0x2a8] sm:$0xff] }
 0x375   :  { %5135 = vmatpush1.bf16.msra.mxu0 %v5134_v0  ;;  %v5152_v0 = vpack.c.bf16 %v2522_v42, %v2518_v18  ;;  %v2552_v18 = vld [vmem:[#allocation16 + $0x298] sm:$0xff]  ;;  %v5294_v20 = vpack.c.bf16 %v2547_v48, %v2543_v8  ;;  %v2579_v8 = vld [vmem:[#allocation16 + $0x370] sm:$0xff]  ;;  %v2586_v48 = vld [vmem:[#allocation16 + $0x3a8] sm:$0xff] }
 0x376   :  { %5263 = vmatpush1.bf16.msra.mxu1 %v5262_v22  ;;  %5137 = vmatprep.subr.bf16.mxu0 %v5136_v12  ;;  %v2517_v22 = vld [vmem:[#allocation16 + $0x180] sm:$0xff]  ;;  %v2556_v42 = vld [vmem:[#allocation16 + $0x2b8] sm:$0xff] }
 0x377   :  { %5265 = vmatprep.subr.bf16.mxu1 %v5264_v25  ;;  %v2521_v12 = vld [vmem:[#allocation16 + $0x1a0] sm:$0xff]  ;;  %v2526_v25 = vld [vmem:[#allocation16 + $0x1c8] sm:$0xff] }
 0x378   :  { %v5154_v24 = vpack.c.bf16 %v2521_v12, %v2517_v22  ;;  %v2551_v22 = vld [vmem:[#allocation16 + $0x290] sm:$0xff]  ;;  %v5296_v12 = vpack.c.bf16 %v2556_v42, %v2552_v18 }
 0x379   :  { %5139 = vmatpush1.bf16.msra.mxu0 %v5138_v9  ;;  %v5156_v9 = vpack.c.bf16 %v2530_v13, %v2526_v25  ;;  %v2560_v25 = vld [vmem:[#allocation16 + $0x2d8] sm:$0xff]  ;;  %v5298_v3 = vpack.c.bf16 %v2555_v56, %v2551_v22  ;;  %v2587_v22 = vld [vmem:[#allocation16 + $0x3b0] sm:$0xff]  ;;  %v2594_v56 = vld [vmem:[#allocation16 + $0x3e8] sm:$0xff] }
 0x37a   :  { %5267 = vmatpush1.bf16.msra.mxu1 %v5266_v15  ;;  %5141 = vmatprep.subr.bf16.mxu0 %v5140_v32  ;;  %v2525_v15 = vld [vmem:[#allocation16 + $0x1c0] sm:$0xff]  ;;  %v2564_v13 = vld [vmem:[#allocation16 + $0x2f8] sm:$0xff] }
 0x37b   :  { %5269 = vmatprep.subr.bf16.mxu1 %v5268_v30  ;;  %v2529_v32 = vld [vmem:[#allocation16 + $0x1e0] sm:$0xff]  ;;  %v2534_v30 = vld [vmem:[#allocation16 + $0x208] sm:$0xff] }
 0x37c   :  { %v5158_v49 = vpack.c.bf16 %v2529_v32, %v2525_v15  ;;  %v2559_v15 = vld [vmem:[#allocation16 + $0x2d0] sm:$0xff]  ;;  %v5300_v32 = vpack.c.bf16 %v2564_v13, %v2560_v25 }
 0x37d   :  { %5143 = vmatpush1.bf16.msra.mxu0 %v5142_v39  ;;  %v5160_v39 = vpack.c.bf16 %v2538_v37, %v2534_v30  ;;  %v2568_v30 = vld [vmem:[#allocation16 + $0x318] sm:$0xff]  ;;  %v5302_v41 = vpack.c.bf16 %v2563_v33, %v2559_v15  ;;  %v2595_v15 = vld [vmem:[#allocation16 + $0x3f0] sm:$0xff]  ;;  %v2602_v33 = vld [vmem:[#allocation16 + $0x428] sm:$0xff] }
 0x37e   :  { %5271 = vmatpush1.bf16.msra.mxu1 %v5270_v38  ;;  %5145 = vmatprep.subr.bf16.mxu0 %v5144_v50  ;;  %v2533_v38 = vld [vmem:[#allocation16 + $0x200] sm:$0xff]  ;;  %v2572_v37 = vld [vmem:[#allocation16 + $0x338] sm:$0xff] }
 0x37f   :  { %5273 = vmatprep.subr.bf16.mxu1 %v5272_v60  ;;  %v2537_v50 = vld [vmem:[#allocation16 + $0x220] sm:$0xff]  ;;  %v2542_v60 = vld [vmem:[#allocation16 + $0x248] sm:$0xff] }
 0x380   :  { %v5162_v35 = vpack.c.bf16 %v2537_v50, %v2533_v38  ;;  %v2567_v38 = vld [vmem:[#allocation16 + $0x310] sm:$0xff]  ;;  %v5304_v50 = vpack.c.bf16 %v2572_v37, %v2568_v30 }
 0x381   :  { %5147 = vmatpush1.bf16.msra.mxu0 %v5146_v7  ;;  %v5164_v7 = vpack.c.bf16 %v2546_v62, %v2542_v60  ;;  %v2576_v60 = vld [vmem:[#allocation16 + $0x358] sm:$0xff]  ;;  %v5306_v31 = vpack.c.bf16 %v2571_v53, %v2567_v38  ;;  %v2603_v38 = vld [vmem:[#allocation16 + $0x430] sm:$0xff]  ;;  %v2610_v53 = vld [vmem:[#allocation16 + $0x468] sm:$0xff] }
 0x382   :  { %5275 = vmatpush1.bf16.msra.mxu1 %v5274_v16  ;;  %5149 = vmatprep.subr.bf16.mxu0 %v5148_v40  ;;  %v2541_v16 = vld [vmem:[#allocation16 + $0x240] sm:$0xff]  ;;  %v2580_v62 = vld [vmem:[#allocation16 + $0x378] sm:$0xff] }
 0x383   :  { %5277 = vmatprep.subr.bf16.mxu1 %v5276_v36  ;;  %v2545_v40 = vld [vmem:[#allocation16 + $0x260] sm:$0xff]  ;;  %v2550_v36 = vld [vmem:[#allocation16 + $0x288] sm:$0xff] }
 0x384   :  { %v5166_v2 = vpack.c.bf16 %v2545_v40, %v2541_v16  ;;  %v2575_v16 = vld [vmem:[#allocation16 + $0x350] sm:$0xff]  ;;  %v5308_v40 = vpack.c.bf16 %v2580_v62, %v2576_v60  ;;  %v2612_v60 = vld [vmem:[#allocation16 + $0x478] sm:$0xff]  ;;  %v989_v62 = vmax.f32 %v6760_v4, 0.0 }
 0x385   :  { %5151 = vmatpush1.bf16.msra.mxu0 %v5150_v19  ;;  %v5168_v19 = vpack.c.bf16 %v2554_v17, %v2550_v36  ;;  %v2584_v36 = vld [vmem:[#allocation16 + $0x398] sm:$0xff]  ;;  %v5310_v42 = vpack.c.bf16 %v2579_v8, %v2575_v16  ;;  %v2611_v16 = vld [vmem:[#allocation16 + $0x470] sm:$0xff]  ;;  %v2618_v8 = vld [vmem:[#allocation16 + $0x4a8] sm:$0xff] }
 0x386   :  { %5279 = vmatpush1.bf16.msra.mxu1 %v5278_v21  ;;  %5153 = vmatprep.subr.bf16.mxu0 %v5152_v0  ;;  %v2549_v21 = vld [vmem:[#allocation16 + $0x280] sm:$0xff]  ;;  %v2588_v17 = vld [vmem:[#allocation16 + $0x3b8] sm:$0xff] }
 0x387   :  { %5281 = vmatprep.subr.bf16.mxu1 %v5280_v23  ;;  %v2553_v0 = vld [vmem:[#allocation16 + $0x2a0] sm:$0xff]  ;;  %v2558_v23 = vld [vmem:[#allocation16 + $0x2c8] sm:$0xff] }
 0x388   :  { %v5170_v29 = vpack.c.bf16 %v2553_v0, %v2549_v21  ;;  %v2583_v21 = vld [vmem:[#allocation16 + $0x390] sm:$0xff]  ;;  %v5312_v0 = vpack.c.bf16 %v2588_v17, %v2584_v36  ;;  %v2616_v36 = vld [vmem:[#allocation16 + $0x498] sm:$0xff] }
 0x389   :  { %5155 = vmatpush1.bf16.msra.mxu0 %v5154_v24  ;;  %v5172_v24 = vpack.c.bf16 %v2562_v27, %v2558_v23  ;;  %v2592_v23 = vld [vmem:[#allocation16 + $0x3d8] sm:$0xff]  ;;  %v5314_v13 = vpack.c.bf16 %v2587_v22, %v2583_v21  ;;  %v2622_v22 = vld [vmem:[#allocation16 + $0x4c8] sm:$0xff] }
 0x38a   :  { %5283 = vmatpush1.bf16.msra.mxu1 %v5282_v28  ;;  %5157 = vmatprep.subr.bf16.mxu0 %v5156_v9  ;;  %v2557_v28 = vld [vmem:[#allocation16 + $0x2c0] sm:$0xff]  ;;  %v2596_v27 = vld [vmem:[#allocation16 + $0x3f8] sm:$0xff] }
 0x38b   :  { %5285 = vmatprep.subr.bf16.mxu1 %v5284_v51  ;;  %v2561_v9 = vld [vmem:[#allocation16 + $0x2e0] sm:$0xff]  ;;  %v2566_v51 = vld [vmem:[#allocation16 + $0x308] sm:$0xff]  ;;  %v2620_v17 = vld [vmem:[#allocation16 + $0x4b8] sm:$0xff] }
 0x38c   :  { %v5174_v45 = vpack.c.bf16 %v2561_v9, %v2557_v28  ;;  %v2591_v28 = vld [vmem:[#allocation16 + $0x3d0] sm:$0xff]  ;;  %v5316_v9 = vpack.c.bf16 %v2596_v27, %v2592_v23  ;;  %v5328_v21 = vpack.c.bf16 %v2620_v17, %v2616_v36  ;;  %v2645_v17 = vld [vmem:[#allocation16 + $0x580] sm:$0xff] }
 0x38d   :  { %5159 = vmatpush1.bf16.msra.mxu0 %v5158_v49  ;;  %v5176_v49 = vpack.c.bf16 %v2570_v34, %v2566_v51  ;;  %v2600_v51 = vld [vmem:[#allocation16 + $0x418] sm:$0xff]  ;;  %v5318_v37 = vpack.c.bf16 %v2595_v15, %v2591_v28  ;;  %v2627_v28 = vld [vmem:[#allocation16 + $0x4f0] sm:$0xff]  ;;  %v2634_v15 = vld [vmem:[#allocation16 + $0x528] sm:$0xff] }
 0x38e   :  { %5287 = vmatpush1.bf16.msra.mxu1 %v5286_v52  ;;  %5161 = vmatprep.subr.bf16.mxu0 %v5160_v39  ;;  %v2565_v52 = vld [vmem:[#allocation16 + $0x300] sm:$0xff]  ;;  %v2604_v34 = vld [vmem:[#allocation16 + $0x438] sm:$0xff] }
 0x38f   :  { %5289 = vmatprep.subr.bf16.mxu1 %v5288_v55  ;;  %v2569_v39 = vld [vmem:[#allocation16 + $0x320] sm:$0xff]  ;;  %v2574_v55 = vld [vmem:[#allocation16 + $0x348] sm:$0xff] }
 0x390   :  { %v5178_v1 = vpack.c.bf16 %v2569_v39, %v2565_v52  ;;  %v5320_v52 = vpack.c.bf16 %v2604_v34, %v2600_v51  ;;  %v2599_v39 = vld [vmem:[#allocation16 + $0x410] sm:$0xff] }
 0x391   :  { %5163 = vmatpush1.bf16.msra.mxu0 %v5162_v35  ;;  %v5180_v35 = vpack.c.bf16 %v2578_v58, %v2574_v55  ;;  %v2608_v58 = vld [vmem:[#allocation16 + $0x458] sm:$0xff] }
 0x392   :  { %5291 = vmatpush1.bf16.msra.mxu1 %v5290_v6  ;;  %5165 = vmatprep.subr.bf16.mxu0 %v5164_v7  ;;  %v2573_v6 = vld [vmem:[#allocation16 + $0x340] sm:$0xff] }
 0x393   :  { %5293 = vmatprep.subr.bf16.mxu1 %v5292_v11  ;;  %v2577_v7 = vld [vmem:[#allocation16 + $0x360] sm:$0xff]  ;;  %v2582_v11 = vld [vmem:[#allocation16 + $0x388] sm:$0xff] }
 0x394   :  { %v5182_v18 = vpack.c.bf16 %v2577_v7, %v2573_v6  ;;  %v2607_v6 = vld [vmem:[#allocation16 + $0x450] sm:$0xff] }
 0x395   :  { %5167 = vmatpush1.bf16.msra.mxu0 %v5166_v2  ;;  %v5184_v2 = vpack.c.bf16 %v2586_v48, %v2582_v11  ;;  %v992_v11 = vmax.f32 %v6767_v26, 0.0  ;;  %v5324_v48 = vpack.c.bf16 %v2612_v60, %v2608_v58  ;;  %v2624_v26 = vld [vmem:[#allocation16 + $0x4d8] sm:$0xff] }
 0x396   :  { %5295 = vmatpush1.bf16.msra.mxu1 %v5294_v20  ;;  %5169 = vmatprep.subr.bf16.mxu0 %v5168_v19  ;;  %v2581_v20 = vld [vmem:[#allocation16 + $0x380] sm:$0xff] }
 0x397   :  { %5297 = vmatprep.subr.bf16.mxu1 %v5296_v12  ;;  %v2585_v19 = vld [vmem:[#allocation16 + $0x3a0] sm:$0xff]  ;;  %v2590_v12 = vld [vmem:[#allocation16 + $0x3c8] sm:$0xff] }
 0x398   :  { %v5186_v25 = vpack.c.bf16 %v2585_v19, %v2581_v20  ;;  %v2617_v20 = vld [vmem:[#allocation16 + $0x4a0] sm:$0xff]  ;;  %v2615_v19 = vld [vmem:[#allocation16 + $0x490] sm:$0xff] }
 0x399   :  { %5171 = vmatpush1.bf16.msra.mxu0 %v5170_v29  ;;  %v5188_v29 = vpack.c.bf16 %v2594_v56, %v2590_v12  ;;  %v2626_v12 = vld [vmem:[#allocation16 + $0x4e8] sm:$0xff]  ;;  %v2628_v56 = vld [vmem:[#allocation16 + $0x4f8] sm:$0xff] }
 0x39a   :  { %5299 = vmatpush1.bf16.msra.mxu1 %v5298_v3  ;;  %5173 = vmatprep.subr.bf16.mxu0 %v5172_v24  ;;  %v2589_v3 = vld [vmem:[#allocation16 + $0x3c0] sm:$0xff] }
 0x39b   :  { %5301 = vmatprep.subr.bf16.mxu1 %v5300_v32  ;;  %v2593_v24 = vld [vmem:[#allocation16 + $0x3e0] sm:$0xff]  ;;  %v2598_v32 = vld [vmem:[#allocation16 + $0x408] sm:$0xff] }
 0x39c   :  { %v5190_v30 = vpack.c.bf16 %v2593_v24, %v2589_v3  ;;  %v2623_v3 = vld [vmem:[#allocation16 + $0x4d0] sm:$0xff]  ;;  %v5332_v24 = vpack.c.bf16 %v2628_v56, %v2624_v26  ;;  %v2653_v56 = vld [vmem:[#allocation16 + $0x5c0] sm:$0xff] }
 0x39d   :  { %5175 = vmatpush1.bf16.msra.mxu0 %v5174_v45  ;;  %v5192_v45 = vpack.c.bf16 %v2602_v33, %v2598_v32  ;;  %v2632_v32 = vld [vmem:[#allocation16 + $0x518] sm:$0xff]  ;;  %v5334_v34 = vpack.c.bf16 %v2627_v28, %v2623_v3  ;;  %v2666_v3 = vld [vmem:[#allocation16 + $0x628] sm:$0xff] }
 0x39e   :  { %5303 = vmatpush1.bf16.msra.mxu1 %v5302_v41  ;;  %5177 = vmatprep.subr.bf16.mxu0 %v5176_v49  ;;  %v2597_v41 = vld [vmem:[#allocation16 + $0x400] sm:$0xff]  ;;  %v2636_v33 = vld [vmem:[#allocation16 + $0x538] sm:$0xff] }
 0x39f   :  { %5305 = vmatprep.subr.bf16.mxu1 %v5304_v50  ;;  %v2601_v49 = vld [vmem:[#allocation16 + $0x420] sm:$0xff]  ;;  %v2606_v50 = vld [vmem:[#allocation16 + $0x448] sm:$0xff]  ;;  %v2668_v28 = vld [vmem:[#allocation16 + $0x638] sm:$0xff] }
 0x3a0   :  { %v5194_v55 = vpack.c.bf16 %v2601_v49, %v2597_v41  ;;  %v5196_v7 = vpack.c.bf16 %v2610_v53, %v2606_v50  ;;  %v2631_v41 = vld [vmem:[#allocation16 + $0x510] sm:$0xff]  ;;  %v5336_v49 = vpack.c.bf16 %v2636_v33, %v2632_v32  ;;  %v2640_v50 = vld [vmem:[#allocation16 + $0x558] sm:$0xff]  ;;  %v2661_v33 = vld [vmem:[#allocation16 + $0x600] sm:$0xff] }
 0x3a1   :  { %5179 = vmatpush1.bf16.msra.mxu0 %v5178_v1  ;;  %v5322_v1 = vpack.c.bf16 %v2603_v38, %v2599_v39  ;;  %v2638_v39 = vld [vmem:[#allocation16 + $0x548] sm:$0xff]  ;;  %v2644_v53 = vld [vmem:[#allocation16 + $0x578] sm:$0xff] }
 0x3a2   :  { %5307 = vmatpush1.bf16.msra.mxu1 %v5306_v31  ;;  %5181 = vmatprep.subr.bf16.mxu0 %v5180_v35  ;;  %v2605_v31 = vld [vmem:[#allocation16 + $0x440] sm:$0xff]  ;;  %v2642_v38 = vld [vmem:[#allocation16 + $0x568] sm:$0xff] }
 0x3a3   :  { %5309 = vmatprep.subr.bf16.mxu1 %v5308_v40  ;;  %v2609_v35 = vld [vmem:[#allocation16 + $0x460] sm:$0xff]  ;;  %v2614_v40 = vld [vmem:[#allocation16 + $0x488] sm:$0xff]  ;;  %v5212_v60 = vpack.c.bf16 %v2642_v38, %v2638_v39 }
 0x3a4   :  { %v5198_v4 = vpack.c.bf16 %v2609_v35, %v2605_v31  ;;  %v2639_v31 = vld [vmem:[#allocation16 + $0x550] sm:$0xff]  ;;  %v5340_v35 = vpack.c.bf16 %v2644_v53, %v2640_v50  ;;  %v2669_v53 = vld [vmem:[#allocation16 + $0x640] sm:$0xff] }
 0x3a5   :  { %5183 = vmatpush1.bf16.msra.mxu0 %v5182_v18  ;;  %v5326_v18 = vpack.c.bf16 %v2611_v16, %v2607_v6  ;;  %v2643_v6 = vld [vmem:[#allocation16 + $0x570] sm:$0xff]  ;;  %v2650_v16 = vld [vmem:[#allocation16 + $0x5a8] sm:$0xff] }
 0x3a6   :  { %5311 = vmatpush1.bf16.msra.mxu1 %v5310_v42  ;;  %5185 = vmatprep.subr.bf16.mxu0 %v5184_v2  ;;  %v5200_v42 = vpack.c.bf16 %v2618_v8, %v2614_v40  ;;  %v2613_v2 = vld [vmem:[#allocation16 + $0x480] sm:$0xff]  ;;  %v2648_v40 = vld [vmem:[#allocation16 + $0x598] sm:$0xff] }
 0x3a7   :  { %5313 = vmatprep.subr.bf16.mxu1 %v5312_v0  ;;  %v2619_v0 = vld [vmem:[#allocation16 + $0x4b0] sm:$0xff]  ;;  %v5202_v23 = vpack.c.bf16 %v2617_v20, %v2613_v2  ;;  %v2652_v8 = vld [vmem:[#allocation16 + $0x5b8] sm:$0xff]  ;;  %v2654_v20 = vld [vmem:[#allocation16 + $0x5c8] sm:$0xff] }
 0x3a8   :  { %v5330_v27 = vpack.c.bf16 %v2619_v0, %v2615_v19  ;;  %v2651_v2 = vld [vmem:[#allocation16 + $0x5b0] sm:$0xff]  ;;  %v2658_v19 = vld [vmem:[#allocation16 + $0x5e8] sm:$0xff]  ;;  %v2660_v0 = vld [vmem:[#allocation16 + $0x5f8] sm:$0xff] }
 0x3a9   :  { %5187 = vmatpush1.bf16.msra.mxu0 %v5186_v25  ;;  %v5204_v25 = vpack.c.bf16 %v2626_v12, %v2622_v22  ;;  %v5220_v26 = vpack.c.bf16 %v2658_v19, %v2654_v20 }
 0x3aa   :  { %5315 = vmatpush1.bf16.msra.mxu1 %v5314_v13  ;;  %5189 = vmatprep.subr.bf16.mxu0 %v5188_v29  ;;  %v2621_v13 = vld [vmem:[#allocation16 + $0x4c0] sm:$0xff] }
 0x3ab   :  { %5317 = vmatprep.subr.bf16.mxu1 %v5316_v9  ;;  %v2625_v29 = vld [vmem:[#allocation16 + $0x4e0] sm:$0xff]  ;;  %v2630_v9 = vld [vmem:[#allocation16 + $0x508] sm:$0xff] }
 0x3ac   :  { %v5206_v51 = vpack.c.bf16 %v2625_v29, %v2621_v13  ;;  %v2659_v13 = vld [vmem:[#allocation16 + $0x5f0] sm:$0xff]  ;;  %v2662_v29 = vld [vmem:[#allocation16 + $0x608] sm:$0xff] }
 0x3ad   :  { %5191 = vmatpush1.bf16.msra.mxu0 %v5190_v30  ;;  %v5208_v30 = vpack.c.bf16 %v2634_v15, %v2630_v9  ;;  %v5224_v32 = vpack.c.bf16 %v2666_v3, %v2662_v29 }
 0x3ae   :  { %5319 = vmatpush1.bf16.msra.mxu1 %v5318_v37  ;;  %5193 = vmatprep.subr.bf16.mxu0 %v5192_v45  ;;  %v2629_v37 = vld [vmem:[#allocation16 + $0x500] sm:$0xff] }
 0x3af   :  { %5321 = vmatprep.subr.bf16.mxu1 %v5320_v52  ;;  %v2633_v45 = vld [vmem:[#allocation16 + $0x520] sm:$0xff]  ;;  %v2635_v52 = vld [vmem:[#allocation16 + $0x530] sm:$0xff] }
 0x3b0   :  { %2812 = vmatmul.mubr.f32.vlgmr.msra.gmra.mrb[8].mxu0 %v989_v62  ;;  %v5338_v58 = vpack.c.bf16 %v2635_v52, %v2631_v41  ;;  %v2674_v41 = vld [vmem:[#allocation16 + $0x668] sm:$0xff]  ;;  %v2676_v52 = vld [vmem:[#allocation16 + $0x678] sm:$0xff] }
 0x3b1   :  { %2954 = vmatmul.mubr.f32.vlgmr.msra.gmra.mrb[8].mxu1 %v989_v62  ;;  %5195 = vmatpush1.bf16.msra.mxu0 %v5194_v55  ;;  %v5210_v55 = vpack.c.bf16 %v2633_v45, %v2629_v37  ;;  %v2637_v62 = vld [vmem:[#allocation16 + $0x540] sm:$0xff]  ;;  %v2667_v37 = vld [vmem:[#allocation16 + $0x630] sm:$0xff]  ;;  %v2670_v45 = vld [vmem:[#allocation16 + $0x648] sm:$0xff] }
 0x3b2   :  { %2882 = vmatprep.mubr.f32.mxu0 %v992_v11  ;;  %5323 = vmatpush1.bf16.msra.mxu1 %v5322_v1  ;;  %v2641_v1 = vld [vmem:[#allocation16 + $0x560] sm:$0xff]  ;;  %v5228_v50 = vpack.c.bf16 %v2674_v41, %v2670_v45 }
 0x3b3   :  { %3024 = vmatprep.mubr.f32.mxu1 %v992_v11  ;;  %5197 = vmatprep.subr.bf16.mxu0 %v5196_v7  ;;  %v2646_v7 = vld [vmem:[#allocation16 + $0x588] sm:$0xff]  ;;  %v5214_v11 = vpack.c.bf16 %v2641_v1, %v2637_v62  ;;  %v2675_v62 = vld [vmem:[#allocation16 + $0x670] sm:$0xff] }
 0x3b4   :  { %5325 = vmatprep.subr.bf16.mxu1 %v5324_v48  ;;  %v5342_v48 = vpack.c.bf16 %v2643_v6, %v2639_v31  ;;  %v5216_v36 = vpack.c.bf16 %v2650_v16, %v2646_v7  ;;  %v2678_v1 = vld [vmem:[#allocation16 + $0x688] sm:$0xff]  ;;  %v2684_v6 = vld [vmem:[#allocation16 + $0x6b8] sm:$0xff] }
 0x3b5   :  { %5199 = vmatpush1.bf16.msra.mxu0 %v5198_v4  ;;  %v2649_v4 = vld [vmem:[#allocation16 + $0x5a0] sm:$0xff]  ;;  %v2682_v31 = vld [vmem:[#allocation16 + $0x6a8] sm:$0xff] }
 0x3b6   :  { %5327 = vmatpush1.bf16.msra.mxu1 %v5326_v18  ;;  %5201 = vmatprep.subr.bf16.mxu0 %v5200_v42  ;;  %v2647_v18 = vld [vmem:[#allocation16 + $0x590] sm:$0xff]  ;;  %v5344_v42 = vpack.c.bf16 %v2652_v8, %v2648_v40  ;;  %v5218_v22 = vpack.c.bf16 %v2649_v4, %v2645_v17  ;;  %v5232_v40 = vpack.c.bf16 %v2682_v31, %v2678_v1  ;;  %v2677_v8 = vld [vmem:[#allocation16 + $0x680] sm:$0xff]  ;;  %v2686_v4 = vld [vmem:[#allocation16 + $0x6c8] sm:$0xff] }
 0x3b7   :  { %5329 = vmatprep.subr.bf16.mxu1 %v5328_v21  ;;  %v2656_v21 = vld [vmem:[#allocation16 + $0x5d8] sm:$0xff]  ;;  %v5346_v12 = vpack.c.bf16 %v2651_v2, %v2647_v18  ;;  %v2683_v17 = vld [vmem:[#allocation16 + $0x6b0] sm:$0xff]  ;;  %v2690_v18 = vld [vmem:[#allocation16 + $0x6e8] sm:$0xff] }
 0x3b8   :  { %v2692_v2 = vld [vmem:[#allocation16 + $0x6f8] sm:$0xff] }
 0x3b9   :  { %5203 = vmatpush1.bf16.msra.mxu0 %v5202_v23  ;;  %v2657_v23 = vld [vmem:[#allocation16 + $0x5e0] sm:$0xff] }
 0x3ba   :  { %5331 = vmatpush1.bf16.msra.mxu1 %v5330_v27  ;;  %5205 = vmatprep.subr.bf16.mxu0 %v5204_v25  ;;  %v2655_v27 = vld [vmem:[#allocation16 + $0x5d0] sm:$0xff]  ;;  %v5348_v25 = vpack.c.bf16 %v2660_v0, %v2656_v21  ;;  %v5222_v9 = vpack.c.bf16 %v2657_v23, %v2653_v56  ;;  %v5236_v21 = vpack.c.bf16 %v2690_v18, %v2686_v4  ;;  %v2685_v0 = vld [vmem:[#allocation16 + $0x6c0] sm:$0xff]  ;;  %v2694_v23 = vld [vmem:[#allocation16 + $0x708] sm:$0xff] }
 0x3bb   :  { %5333 = vmatprep.subr.bf16.mxu1 %v5332_v24  ;;  %v2664_v24 = vld [vmem:[#allocation16 + $0x618] sm:$0xff]  ;;  %v5350_v15 = vpack.c.bf16 %v2659_v13, %v2655_v27  ;;  %v2691_v56 = vld [vmem:[#allocation16 + $0x6f0] sm:$0xff]  ;;  %v2698_v27 = vld [vmem:[#allocation16 + $0x728] sm:$0xff] }
 0x3bc   :  { %v2700_v13 = vld [vmem:[#allocation16 + $0x738] sm:$0xff] }
 0x3bd   :  { %5207 = vmatpush1.bf16.msra.mxu0 %v5206_v51  ;;  %v2665_v51 = vld [vmem:[#allocation16 + $0x620] sm:$0xff] }
 0x3be   :  { %5335 = vmatpush1.bf16.msra.mxu1 %v5334_v34  ;;  %5209 = vmatprep.subr.bf16.mxu0 %v5208_v30  ;;  %v2663_v34 = vld [vmem:[#allocation16 + $0x610] sm:$0xff]  ;;  %v5352_v30 = vpack.c.bf16 %v2668_v28, %v2664_v24  ;;  %v5226_v39 = vpack.c.bf16 %v2665_v51, %v2661_v33  ;;  %v5240_v24 = vpack.c.bf16 %v2698_v27, %v2694_v23  ;;  %v2693_v28 = vld [vmem:[#allocation16 + $0x700] sm:$0xff]  ;;  %v2702_v51 = vld [vmem:[#allocation16 + $0x748] sm:$0xff] }
 0x3bf   :  { %5337 = vmatprep.subr.bf16.mxu1 %v5336_v49  ;;  %v2672_v49 = vld [vmem:[#allocation16 + $0x658] sm:$0xff]  ;;  %v5354_v38 = vpack.c.bf16 %v2667_v37, %v2663_v34  ;;  %v2699_v33 = vld [vmem:[#allocation16 + $0x730] sm:$0xff]  ;;  %v2706_v34 = vld [vmem:[#allocation16 + $0x768] sm:$0xff] }
 0x3c0   :  { %v2708_v37 = vld [vmem:[#allocation16 + $0x778] sm:$0xff] }
 0x3c1   :  { %5211 = vmatpush1.bf16.msra.mxu0 %v5210_v55  ;;  %v2673_v55 = vld [vmem:[#allocation16 + $0x660] sm:$0xff] }
 0x3c2   :  { %5339 = vmatpush1.bf16.msra.mxu1 %v5338_v58  ;;  %5213 = vmatprep.subr.bf16.mxu0 %v5212_v60  ;;  %v2671_v58 = vld [vmem:[#allocation16 + $0x650] sm:$0xff]  ;;  %v5356_v60 = vpack.c.bf16 %v2676_v52, %v2672_v49  ;;  %v5230_v7 = vpack.c.bf16 %v2673_v55, %v2669_v53  ;;  %v5244_v49 = vpack.c.bf16 %v2706_v34, %v2702_v51  ;;  %v2701_v52 = vld [vmem:[#allocation16 + $0x740] sm:$0xff]  ;;  %v2710_v55 = vld [vmem:[#allocation16 + $0x788] sm:$0xff]  ;;  %v991_v34 = vmax.f32 %v6763_v14, 0.0 }
 0x3c3   :  { %5341 = vmatprep.subr.bf16.mxu1 %v5340_v35  ;;  %v2680_v35 = vld [vmem:[#allocation16 + $0x698] sm:$0xff]  ;;  %v5358_v16 = vpack.c.bf16 %v2675_v62, %v2671_v58  ;;  %v2707_v53 = vld [vmem:[#allocation16 + $0x770] sm:$0xff]  ;;  %v2714_v58 = vld [vmem:[#allocation16 + $0x7a8] sm:$0xff] }
 0x3c4   :  { %v2716_v62 = vld [vmem:[#allocation16 + $0x7b8] sm:$0xff] }
 0x3c5   :  { %5215 = vmatpush1.bf16.msra.mxu0 %v5214_v11  ;;  %v2681_v11 = vld [vmem:[#allocation16 + $0x6a0] sm:$0xff] }
 0x3c6   :  { %5343 = vmatpush1.bf16.msra.mxu1 %v5342_v48  ;;  %5217 = vmatprep.subr.bf16.mxu0 %v5216_v36  ;;  %v2679_v48 = vld [vmem:[#allocation16 + $0x690] sm:$0xff]  ;;  %v5360_v36 = vpack.c.bf16 %v2684_v6, %v2680_v35  ;;  %v5234_v20 = vpack.c.bf16 %v2681_v11, %v2677_v8  ;;  %v5248_v35 = vpack.c.bf16 %v2714_v58, %v2710_v55  ;;  %v2709_v6 = vld [vmem:[#allocation16 + $0x780] sm:$0xff]  ;;  %v2718_v11 = vld [vmem:[#allocation16 + $0x7c8] sm:$0xff] }
 0x3c7   :  { %5345 = vmatprep.subr.bf16.mxu1 %v5344_v42  ;;  %v2688_v42 = vld [vmem:[#allocation16 + $0x6d8] sm:$0xff]  ;;  %v5362_v19 = vpack.c.bf16 %v2683_v17, %v2679_v48  ;;  %v2715_v8 = vld [vmem:[#allocation16 + $0x7b0] sm:$0xff]  ;;  %v2722_v48 = vld [vmem:[#allocation16 + $0x7e8] sm:$0xff] }
 0x3c8   :  { %v2724_v17 = vld [vmem:[#allocation16 + $0x7f8] sm:$0xff]  ;;  %v3230_v55 = vld [vmem:[#allocation20 + $0xb8] sm:$0xff] }
 0x3c9   :  { %5219 = vmatpush1.bf16.msra.mxu0 %v5218_v22  ;;  %v2689_v22 = vld [vmem:[#allocation16 + $0x6e0] sm:$0xff] }
 0x3ca   :  { %5347 = vmatpush1.bf16.msra.mxu1 %v5346_v12  ;;  %5221 = vmatprep.subr.bf16.mxu0 %v5220_v26  ;;  %v2687_v12 = vld [vmem:[#allocation16 + $0x6d0] sm:$0xff]  ;;  %v5364_v26 = vpack.c.bf16 %v2692_v2, %v2688_v42  ;;  %v5238_v29 = vpack.c.bf16 %v2689_v22, %v2685_v0  ;;  %v5252_v42 = vpack.c.bf16 %v2722_v48, %v2718_v11  ;;  %v2717_v2 = vld [vmem:[#allocation16 + $0x7c0] sm:$0xff] }
 0x3cb   :  { %5349 = vmatprep.subr.bf16.mxu1 %v5348_v25  ;;  %v2696_v25 = vld [vmem:[#allocation16 + $0x718] sm:$0xff]  ;;  %v5366_v3 = vpack.c.bf16 %v2691_v56, %v2687_v12  ;;  %v2723_v0 = vld [vmem:[#allocation16 + $0x7f0] sm:$0xff] }
 0x3cc   :  { %v3208_v22 = vld [vmem:[#allocation20 + $0x8] sm:$0xff]  ;;  %v3214_v56 = vld [vmem:[#allocation20 + $0x38] sm:$0xff] }
 0x3cd   :  { %5223 = vmatpush1.bf16.msra.mxu0 %v5222_v9  ;;  %v2697_v9 = vld [vmem:[#allocation16 + $0x720] sm:$0xff] }
 0x3ce   :  { %5351 = vmatpush1.bf16.msra.mxu1 %v5350_v15  ;;  %5225 = vmatprep.subr.bf16.mxu0 %v5224_v32  ;;  %v2695_v15 = vld [vmem:[#allocation16 + $0x710] sm:$0xff]  ;;  %v5368_v32 = vpack.c.bf16 %v2700_v13, %v2696_v25  ;;  %v5242_v45 = vpack.c.bf16 %v2697_v9, %v2693_v28  ;;  %v3212_v12 = vld [vmem:[#allocation20 + $0x28] sm:$0xff]  ;;  %v3213_v28 = vld [vmem:[#allocation20 + $0x30] sm:$0xff] }
 0x3cf   :  { %5353 = vmatprep.subr.bf16.mxu1 %v5352_v30  ;;  %v2704_v30 = vld [vmem:[#allocation16 + $0x758] sm:$0xff]  ;;  %v5370_v41 = vpack.c.bf16 %v2699_v33, %v2695_v15  ;;  %v5384_v25 = vpack.c.bf16 %v3212_v12, %v3208_v22  ;;  %v3222_v33 = vld [vmem:[#allocation20 + $0x78] sm:$0xff] }
 0x3d0   :  { %v3207_v13 = vld [vmem:[#allocation20] sm:$0xff]  ;;  %v3216_v9 = vld [vmem:[#allocation20 + $0x48] sm:$0xff] }
 0x3d1   :  { %5227 = vmatpush1.bf16.msra.mxu0 %v5226_v39  ;;  %v2705_v39 = vld [vmem:[#allocation16 + $0x760] sm:$0xff] }
 0x3d2   :  { %5355 = vmatpush1.bf16.msra.mxu1 %v5354_v38  ;;  %5229 = vmatprep.subr.bf16.mxu0 %v5228_v50  ;;  %v2703_v38 = vld [vmem:[#allocation16 + $0x750] sm:$0xff]  ;;  %v5372_v50 = vpack.c.bf16 %v2708_v37, %v2704_v30  ;;  %v5246_v1 = vpack.c.bf16 %v2705_v39, %v2701_v52  ;;  %v3220_v15 = vld [vmem:[#allocation20 + $0x68] sm:$0xff]  ;;  %v3221_v39 = vld [vmem:[#allocation20 + $0x70] sm:$0xff] }
 0x3d3   :  { %5357 = vmatprep.subr.bf16.mxu1 %v5356_v60  ;;  %v2712_v60 = vld [vmem:[#allocation16 + $0x798] sm:$0xff]  ;;  %v5374_v31 = vpack.c.bf16 %v2707_v53, %v2703_v38  ;;  %v5388_v37 = vpack.c.bf16 %v3220_v15, %v3216_v9  ;;  %v3226_v53 = vld [vmem:[#allocation20 + $0x98] sm:$0xff] }
 0x3d4   :  { %v3224_v38 = vld [vmem:[#allocation20 + $0x88] sm:$0xff] }
 0x3d5   :  { %5231 = vmatpush1.bf16.msra.mxu0 %v5230_v7  ;;  %v2713_v7 = vld [vmem:[#allocation16 + $0x7a0] sm:$0xff] }
 0x3d6   :  { %5359 = vmatpush1.bf16.msra.mxu1 %v5358_v16  ;;  %5233 = vmatprep.subr.bf16.mxu0 %v5232_v40  ;;  %v2711_v16 = vld [vmem:[#allocation16 + $0x790] sm:$0xff]  ;;  %v5376_v40 = vpack.c.bf16 %v2716_v62, %v2712_v60  ;;  %v5250_v4 = vpack.c.bf16 %v2713_v7, %v2709_v6  ;;  %v3229_v6 = vld [vmem:[#allocation20 + $0xb0] sm:$0xff]  ;;  %v3232_v7 = vld [vmem:[#allocation20 + $0xc8] sm:$0xff] }
 0x3d7   :  { %5361 = vmatprep.subr.bf16.mxu1 %v5360_v36  ;;  %v2720_v36 = vld [vmem:[#allocation16 + $0x7d8] sm:$0xff]  ;;  %v5378_v18 = vpack.c.bf16 %v2715_v8, %v2711_v16  ;;  %v3238_v8 = vld [vmem:[#allocation20 + $0xf8] sm:$0xff] }
 0x3d8   :  { %v3223_v62 = vld [vmem:[#allocation20 + $0x80] sm:$0xff]  ;;  %v3236_v16 = vld [vmem:[#allocation20 + $0xe8] sm:$0xff] }
 0x3d9   :  { %5235 = vmatpush1.bf16.msra.mxu0 %v5234_v20  ;;  %v2721_v20 = vld [vmem:[#allocation16 + $0x7e0] sm:$0xff] }
 0x3da   :  { %5363 = vmatpush1.bf16.msra.mxu1 %v5362_v19  ;;  %5237 = vmatprep.subr.bf16.mxu0 %v5236_v21  ;;  %v2719_v19 = vld [vmem:[#allocation16 + $0x7d0] sm:$0xff]  ;;  %v5380_v21 = vpack.c.bf16 %v2724_v17, %v2720_v36  ;;  %v5254_v23 = vpack.c.bf16 %v2721_v20, %v2717_v2  ;;  %v5396_v36 = vpack.c.bf16 %v3236_v16, %v3232_v7  ;;  %v3237_v2 = vld [vmem:[#allocation20 + $0xf0] sm:$0xff]  ;;  %v3240_v20 = vld [vmem:[#allocation20 + $0x108] sm:$0xff] }
 0x3db   :  { %5365 = vmatprep.subr.bf16.mxu1 %v5364_v26  ;;  %v3210_v26 = vld [vmem:[#allocation20 + $0x18] sm:$0xff]  ;;  %v5382_v27 = vpack.c.bf16 %v2723_v0, %v2719_v19  ;;  %v3231_v17 = vld [vmem:[#allocation20 + $0xc0] sm:$0xff]  ;;  %v3244_v19 = vld [vmem:[#allocation20 + $0x128] sm:$0xff] }
 0x3dc   :  { %v3246_v0 = vld [vmem:[#allocation20 + $0x138] sm:$0xff] }
 0x3dd   :  { %5239 = vmatpush1.bf16.msra.mxu0 %v5238_v29  ;;  %v3211_v29 = vld [vmem:[#allocation20 + $0x20] sm:$0xff] }
 0x3de   :  { %5367 = vmatpush1.bf16.msra.mxu1 %v5366_v3  ;;  %5241 = vmatprep.subr.bf16.mxu0 %v5240_v24  ;;  %v3209_v3 = vld [vmem:[#allocation20 + $0x10] sm:$0xff]  ;;  %v5512_v24 = vpack.c.bf16 %v3214_v56, %v3210_v26  ;;  %v5386_v51 = vpack.c.bf16 %v3211_v29, %v3207_v13  ;;  %v5400_v26 = vpack.c.bf16 %v3244_v19, %v3240_v20  ;;  %v3239_v56 = vld [vmem:[#allocation20 + $0x100] sm:$0xff]  ;;  %v3248_v29 = vld [vmem:[#allocation20 + $0x148] sm:$0xff] }
 0x3df   :  { %5369 = vmatprep.subr.bf16.mxu1 %v5368_v32  ;;  %v3218_v32 = vld [vmem:[#allocation20 + $0x58] sm:$0xff]  ;;  %v5514_v30 = vpack.c.bf16 %v3213_v28, %v3209_v3  ;;  %v3245_v13 = vld [vmem:[#allocation20 + $0x130] sm:$0xff]  ;;  %v3252_v3 = vld [vmem:[#allocation20 + $0x168] sm:$0xff] }
 0x3e0   :  { %v5516_v52 = vpack.c.bf16 %v3222_v33, %v3218_v32  ;;  %v3254_v28 = vld [vmem:[#allocation20 + $0x178] sm:$0xff]  ;;  %v5404_v32 = vpack.c.bf16 %v3252_v3, %v3248_v29  ;;  %v3247_v33 = vld [vmem:[#allocation20 + $0x140] sm:$0xff] }
 0x3e1   :  { %5243 = vmatpush1.bf16.msra.mxu0 %v5242_v45  ;;  %v3215_v45 = vld [vmem:[#allocation20 + $0x40] sm:$0xff] }
 0x3e2   :  { %5371 = vmatpush1.bf16.msra.mxu1 %v5370_v41  ;;  %5245 = vmatprep.subr.bf16.mxu0 %v5244_v49  ;;  %v3219_v41 = vld [vmem:[#allocation20 + $0x60] sm:$0xff]  ;;  %v3217_v49 = vld [vmem:[#allocation20 + $0x50] sm:$0xff] }
 0x3e3   :  { %5373 = vmatprep.subr.bf16.mxu1 %v5372_v50  ;;  %v3228_v50 = vld [vmem:[#allocation20 + $0xa8] sm:$0xff]  ;;  %v5390_v58 = vpack.c.bf16 %v3219_v41, %v3215_v45  ;;  %v5518_v14 = vpack.c.bf16 %v3221_v39, %v3217_v49  ;;  %v3258_v49 = vld [vmem:[#allocation20 + $0x198] sm:$0xff] }
 0x3e4   :  { %v5392_v60 = vpack.c.bf16 %v3228_v50, %v3224_v38  ;;  %v3256_v45 = vld [vmem:[#allocation20 + $0x188] sm:$0xff] }
 0x3e5   :  { %5247 = vmatpush1.bf16.msra.mxu0 %v5246_v1  ;;  %v3227_v1 = vld [vmem:[#allocation20 + $0xa0] sm:$0xff]  ;;  %v3260_v41 = vld [vmem:[#allocation20 + $0x1a8] sm:$0xff] }
 0x3e6   :  { %5375 = vmatpush1.bf16.msra.mxu1 %v5374_v31  ;;  %5249 = vmatprep.subr.bf16.mxu0 %v5248_v35  ;;  %v3225_v31 = vld [vmem:[#allocation20 + $0x90] sm:$0xff]  ;;  %v5520_v35 = vpack.c.bf16 %v3230_v55, %v3226_v53  ;;  %v5394_v11 = vpack.c.bf16 %v3227_v1, %v3223_v62  ;;  %v5408_v50 = vpack.c.bf16 %v3260_v41, %v3256_v45  ;;  %v3255_v53 = vld [vmem:[#allocation20 + $0x180] sm:$0xff]  ;;  %v3264_v62 = vld [vmem:[#allocation20 + $0x1c8] sm:$0xff] }
 0x3e7   :  { %5377 = vmatprep.subr.bf16.mxu1 %v5376_v40  ;;  %v3234_v40 = vld [vmem:[#allocation20 + $0xd8] sm:$0xff]  ;;  %v5522_v48 = vpack.c.bf16 %v3229_v6, %v3225_v31  ;;  %v3259_v55 = vld [vmem:[#allocation20 + $0x1a0] sm:$0xff]  ;;  %v3268_v1 = vld [vmem:[#allocation20 + $0x1e8] sm:$0xff] }
 0x3e8   :  { %v3266_v31 = vld [vmem:[#allocation20 + $0x1d8] sm:$0xff]  ;;  %v5410_v6 = vpack.c.bf16 %v3259_v55, %v3255_v53  ;;  %v5412_v16 = vpack.c.bf16 %v3268_v1, %v3264_v62  ;;  %v3296_v53 = vld [vmem:[#allocation20 + $0x2c8] sm:$0xff] }
 0x3e9   :  { %5251 = vmatpush1.bf16.msra.mxu0 %v5250_v4  ;;  %v3235_v4 = vld [vmem:[#allocation20 + $0xe0] sm:$0xff]  ;;  %v3300_v55 = vld [vmem:[#allocation20 + $0x2e8] sm:$0xff] }
 0x3ea   :  { %5379 = vmatpush1.bf16.msra.mxu1 %v5378_v18  ;;  %5253 = vmatprep.subr.bf16.mxu0 %v5252_v42  ;;  %v3233_v18 = vld [vmem:[#allocation20 + $0xd0] sm:$0xff]  ;;  %v5524_v42 = vpack.c.bf16 %v3238_v8, %v3234_v40  ;;  %v5398_v22 = vpack.c.bf16 %v3235_v4, %v3231_v17  ;;  %v3263_v40 = vld [vmem:[#allocation20 + $0x1c0] sm:$0xff]  ;;  %v3272_v17 = vld [vmem:[#allocation20 + $0x208] sm:$0xff]  ;;  %v5428_v1 = vpack.c.bf16 %v3300_v55, %v3296_v53 }
 0x3eb   :  { %5381 = vmatprep.subr.bf16.mxu1 %v5380_v21  ;;  %v3242_v21 = vld [vmem:[#allocation20 + $0x118] sm:$0xff]  ;;  %v5526_v12 = vpack.c.bf16 %v3237_v2, %v3233_v18  ;;  %v3267_v8 = vld [vmem:[#allocation20 + $0x1e0] sm:$0xff]  ;;  %v3276_v4 = vld [vmem:[#allocation20 + $0x228] sm:$0xff] }
 0x3ec   :  { %v3274_v18 = vld [vmem:[#allocation20 + $0x218] sm:$0xff]  ;;  %v5414_v2 = vpack.c.bf16 %v3267_v8, %v3263_v40  ;;  %v5416_v19 = vpack.c.bf16 %v3276_v4, %v3272_v17  ;;  %v3304_v40 = vld [vmem:[#allocation20 + $0x308] sm:$0xff] }
 0x3ed   :  { %5255 = vmatpush1.bf16.msra.mxu0 %v5254_v23  ;;  %v3243_v23 = vld [vmem:[#allocation20 + $0x120] sm:$0xff]  ;;  %v3308_v8 = vld [vmem:[#allocation20 + $0x328] sm:$0xff] }
 0x3ee   :  { %5383 = vmatpush1.bf16.msra.mxu1 %v5382_v27  ;;  %5385 = vmatprep.subr.bf16.mxu0 %v5384_v25  ;;  %v3241_v27 = vld [vmem:[#allocation20 + $0x110] sm:$0xff]  ;;  %v5528_v25 = vpack.c.bf16 %v3246_v0, %v3242_v21  ;;  %v5402_v9 = vpack.c.bf16 %v3243_v23, %v3239_v56  ;;  %v3271_v21 = vld [vmem:[#allocation20 + $0x200] sm:$0xff]  ;;  %v3280_v56 = vld [vmem:[#allocation20 + $0x248] sm:$0xff]  ;;  %v5432_v4 = vpack.c.bf16 %v3308_v8, %v3304_v40 }
 0x3ef   :  { %5513 = vmatprep.subr.bf16.mxu1 %v5512_v24  ;;  %v3250_v24 = vld [vmem:[#allocation20 + $0x158] sm:$0xff]  ;;  %v5530_v15 = vpack.c.bf16 %v3245_v13, %v3241_v27  ;;  %v3275_v0 = vld [vmem:[#allocation20 + $0x220] sm:$0xff]  ;;  %v3284_v23 = vld [vmem:[#allocation20 + $0x268] sm:$0xff] }
 0x3f0   :  { %2883 = vmatmul.mubr.f32.vlgmr.msra.gmra.mrb[8].mxu0 %v991_v34  ;;  %v3282_v27 = vld [vmem:[#allocation20 + $0x258] sm:$0xff]  ;;  %v5418_v13 = vpack.c.bf16 %v3275_v0, %v3271_v21  ;;  %v5420_v3 = vpack.c.bf16 %v3284_v23, %v3280_v56  ;;  %v3312_v21 = vld [vmem:[#allocation20 + $0x348] sm:$0xff] }
 0x3f1   :  { %3025 = vmatmul.mubr.f32.vlgmr.msra.gmra.mrb[8].mxu1 %v991_v34  ;;  %5387 = vmatpush1.bf16.msra.mxu0 %v5386_v51  ;;  %v3251_v51 = vld [vmem:[#allocation20 + $0x160] sm:$0xff]  ;;  %v3249_v34 = vld [vmem:[#allocation20 + $0x150] sm:$0xff]  ;;  %v3316_v0 = vld [vmem:[#allocation20 + $0x368] sm:$0xff] }
 0x3f2   :  { %5515 = vmatpush1.bf16.msra.mxu1 %v5514_v30  ;;  %5389 = vmatprep.subr.bf16.mxu0 %v5388_v37  ;;  %v5532_v30 = vpack.c.bf16 %v3254_v28, %v3250_v24  ;;  %v3253_v37 = vld [vmem:[#allocation20 + $0x170] sm:$0xff]  ;;  %v5406_v39 = vpack.c.bf16 %v3251_v51, %v3247_v33  ;;  %v3279_v24 = vld [vmem:[#allocation20 + $0x240] sm:$0xff]  ;;  %v3288_v33 = vld [vmem:[#allocation20 + $0x288] sm:$0xff]  ;;  %v5436_v23 = vpack.c.bf16 %v3316_v0, %v3312_v21 }
 0x3f3   :  { %5517 = vmatprep.subr.bf16.mxu1 %v5516_v52  ;;  %v3262_v52 = vld [vmem:[#allocation20 + $0x1b8] sm:$0xff]  ;;  %v5534_v38 = vpack.c.bf16 %v3253_v37, %v3249_v34  ;;  %v3283_v28 = vld [vmem:[#allocation20 + $0x260] sm:$0xff]  ;;  %v3292_v51 = vld [vmem:[#allocation20 + $0x2a8] sm:$0xff] }
 0x3f4   :  { %v3290_v34 = vld [vmem:[#allocation20 + $0x298] sm:$0xff]  ;;  %v5422_v37 = vpack.c.bf16 %v3283_v28, %v3279_v24  ;;  %v5424_v41 = vpack.c.bf16 %v3292_v51, %v3288_v33 }
 0x3f5   :  { %5391 = vmatpush1.bf16.msra.mxu0 %v5390_v58  ;;  %v3257_v58 = vld [vmem:[#allocation20 + $0x190] sm:$0xff] }
 0x3f6   :  { %5519 = vmatpush1.bf16.msra.mxu1 %v5518_v14  ;;  %5393 = vmatprep.subr.bf16.mxu0 %v5392_v60  ;;  %v5536_v14 = vpack.c.bf16 %v3262_v52, %v3258_v49  ;;  %v3261_v60 = vld [vmem:[#allocation20 + $0x1b0] sm:$0xff]  ;;  %v3287_v49 = vld [vmem:[#allocation20 + $0x280] sm:$0xff] }
 0x3f7   :  { %5521 = vmatprep.subr.bf16.mxu1 %v5520_v35  ;;  %v3270_v35 = vld [vmem:[#allocation20 + $0x1f8] sm:$0xff]  ;;  %v5538_v7 = vpack.c.bf16 %v3261_v60, %v3257_v58  ;;  %v3291_v52 = vld [vmem:[#allocation20 + $0x2a0] sm:$0xff] }
 0x3f8   :  { %v3298_v58 = vld [vmem:[#allocation20 + $0x2d8] sm:$0xff]  ;;  %v5426_v60 = vpack.c.bf16 %v3291_v52, %v3287_v49 }
 0x3f9   :  { %5395 = vmatpush1.bf16.msra.mxu0 %v5394_v11  ;;  %v3265_v11 = vld [vmem:[#allocation20 + $0x1d0] sm:$0xff] }
 0x3fa   :  { %5523 = vmatpush1.bf16.msra.mxu1 %v5522_v48  ;;  %5397 = vmatprep.subr.bf16.mxu0 %v5396_v36  ;;  %v5540_v48 = vpack.c.bf16 %v3270_v35, %v3266_v31  ;;  %v3269_v36 = vld [vmem:[#allocation20 + $0x1f0] sm:$0xff]  ;;  %v3295_v31 = vld [vmem:[#allocation20 + $0x2c0] sm:$0xff] }
 0x3fb   :  { %5525 = vmatprep.subr.bf16.mxu1 %v5524_v42  ;;  %v3278_v42 = vld [vmem:[#allocation20 + $0x238] sm:$0xff]  ;;  %v5542_v20 = vpack.c.bf16 %v3269_v36, %v3265_v11  ;;  %v3299_v35 = vld [vmem:[#allocation20 + $0x2e0] sm:$0xff] }
 0x3fc   :  { %v3306_v11 = vld [vmem:[#allocation20 + $0x318] sm:$0xff]  ;;  %v5430_v36 = vpack.c.bf16 %v3299_v35, %v3295_v31 }
 0x3fd   :  { %5399 = vmatpush1.bf16.msra.mxu0 %v5398_v22  ;;  %v3273_v22 = vld [vmem:[#allocation20 + $0x210] sm:$0xff] }
 0x3fe   :  { %5527 = vmatpush1.bf16.msra.mxu1 %v5526_v12  ;;  %5401 = vmatprep.subr.bf16.mxu0 %v5400_v26  ;;  %v5544_v12 = vpack.c.bf16 %v3278_v42, %v3274_v18  ;;  %v3277_v26 = vld [vmem:[#allocation20 + $0x230] sm:$0xff]  ;;  %v3303_v18 = vld [vmem:[#allocation20 + $0x300] sm:$0xff] }
 0x3ff   :  { %5529 = vmatprep.subr.bf16.mxu1 %v5528_v25  ;;  %v3286_v25 = vld [vmem:[#allocation20 + $0x278] sm:$0xff]  ;;  %v5546_v29 = vpack.c.bf16 %v3277_v26, %v3273_v22  ;;  %v3307_v42 = vld [vmem:[#allocation20 + $0x320] sm:$0xff] }
 0x400   :  { %v3314_v22 = vld [vmem:[#allocation20 + $0x358] sm:$0xff]  ;;  %v5434_v26 = vpack.c.bf16 %v3307_v42, %v3303_v18 }
 0x401   :  { %5403 = vmatpush1.bf16.msra.mxu0 %v5402_v9  ;;  %v3281_v9 = vld [vmem:[#allocation20 + $0x250] sm:$0xff] }
 0x402   :  { %5531 = vmatpush1.bf16.msra.mxu1 %v5530_v15  ;;  %5405 = vmatprep.subr.bf16.mxu0 %v5404_v32  ;;  %v5548_v15 = vpack.c.bf16 %v3286_v25, %v3282_v27  ;;  %v3285_v32 = vld [vmem:[#allocation20 + $0x270] sm:$0xff]  ;;  %v3311_v27 = vld [vmem:[#allocation20 + $0x340] sm:$0xff] }
 0x403   :  { %5533 = vmatprep.subr.bf16.mxu1 %v5532_v30  ;;  %v3294_v30 = vld [vmem:[#allocation20 + $0x2b8] sm:$0xff]  ;;  %v5550_v45 = vpack.c.bf16 %v3285_v32, %v3281_v9  ;;  %v3315_v25 = vld [vmem:[#allocation20 + $0x360] sm:$0xff] }
 0x404   :  { %v5438_v24 = vpack.c.bf16 %v3315_v25, %v3311_v27  ;;  %v2293_v9 = vld [vmem:[%s7006_s9] sm:$0xff] }
 0x405   :  { %5407 = vmatpush1.bf16.msra.mxu0 %v5406_v39  ;;  %v3289_v39 = vld [vmem:[#allocation20 + $0x290] sm:$0xff]  ;;  %v2300_v32 = vrot.slane %v2293_v9, %v6500_v43  ;;  %v2380_v33 = vrot.slane %v2293_v9, %v6503_v44  ;;  %v2384_v49 = vrot.slane %v2293_v9, %v6613_v63 }
 0x406   :  { %5535 = vmatpush1.bf16.msra.mxu1 %v5534_v38  ;;  %5409 = vmatprep.subr.bf16.mxu0 %v5408_v50  ;;  %v5552_v38 = vpack.c.bf16 %v3294_v30, %v3290_v34  ;;  %v3293_v50 = vld [vmem:[#allocation20 + $0x2b0] sm:$0xff]  ;;  %v2304_v30 = vrot.slane %v2293_v9, %v6605_v59 }
 0x407   :  { %5537 = vmatprep.subr.bf16.mxu1 %v5536_v14  ;;  %v3302_v14 = vld [vmem:[#allocation20 + $0x2f8] sm:$0xff]  ;;  %v5554_v62 = vpack.c.bf16 %v3293_v50, %v3289_v39  ;;  %v2320_v50 = vrot.slane %v2300_v32, %v6500_v43  ;;  %v2400_v53 = vrot.slane %v2380_v33, %v6503_v44 }
 0x409   :  { %5411 = vmatpush1.bf16.msra.mxu0 %v5410_v6  ;;  %v3297_v6 = vld [vmem:[#allocation20 + $0x2d0] sm:$0xff] }
 0x40a   :  { %5539 = vmatpush1.bf16.msra.mxu1 %v5538_v7  ;;  %5413 = vmatprep.subr.bf16.mxu0 %v5412_v16  ;;  %v5556_v7 = vpack.c.bf16 %v3302_v14, %v3298_v58  ;;  %v3301_v16 = vld [vmem:[#allocation20 + $0x2f0] sm:$0xff]  ;;  %v2324_v14 = vrot.slane %v2304_v30, %v6500_v43  ;;  %v3320_v30 = vld [vmem:[#allocation20 + $0x388] sm:$0xff] }
 0x40b   :  { %5541 = vmatprep.subr.bf16.mxu1 %v5540_v48  ;;  %v3310_v48 = vld [vmem:[#allocation20 + $0x338] sm:$0xff]  ;;  %v5558_v17 = vpack.c.bf16 %v3301_v16, %v3297_v6  ;;  %v2404_v6 = vrot.slane %v2384_v49, %v6503_v44  ;;  %v1987_v16 = vld [vmem:[#allocation14] sm:$0xf] }
 0x40c   :  { %v2334_v42 = vmul.f32 %v2324_v14, %v6548_v5  ;;  %v1992_v21 = vrot.slane %v1987_v16, %v6500_v43  ;;  %v2000_v0 = vrot.slane %v1987_v16, %v6503_v44 }
 0x40d   :  { %5415 = vmatpush1.bf16.msra.mxu0 %v5414_v2  ;;  %v3305_v2 = vld [vmem:[#allocation20 + $0x310] sm:$0xff] }
 0x40e   :  { %5543 = vmatpush1.bf16.msra.mxu1 %v5542_v20  ;;  %5417 = vmatprep.subr.bf16.mxu0 %v5416_v19  ;;  %v5560_v20 = vpack.c.bf16 %v3310_v48, %v3306_v11  ;;  %v3309_v19 = vld [vmem:[#allocation20 + $0x330] sm:$0xff] }
 0x40f   :  { %5545 = vmatprep.subr.bf16.mxu1 %v5544_v12  ;;  %v3318_v12 = vld [vmem:[#allocation20 + $0x378] sm:$0xff]  ;;  %v5562_v56 = vpack.c.bf16 %v3309_v19, %v3305_v2 }
 0x411   :  { %5419 = vmatpush1.bf16.msra.mxu0 %v5418_v13  ;;  %v5564_v13 = vpack.c.bf16 %v3318_v12, %v3314_v22  ;;  %v2414_v22 = vmul.f32 %v2404_v6, %v6548_v5 }
 0x412   :  { %5547 = vmatpush1.bf16.msra.mxu1 %v5546_v29  ;;  %5421 = vmatprep.subr.bf16.mxu0 %v5420_v3  ;;  %v3313_v29 = vld [vmem:[#allocation20 + $0x350] sm:$0xff] }
 0x413   :  { %5549 = vmatprep.subr.bf16.mxu1 %v5548_v15  ;;  %v3317_v3 = vld [vmem:[#allocation20 + $0x370] sm:$0xff] }
 0x414   :  { %v5566_v28 = vpack.c.bf16 %v3317_v3, %v3313_v29  ;;  %v2294_v15 = vld [vmem:[%s7006_s9 + $0x8] sm:$0xff] }
 0x415   :  { %5423 = vmatpush1.bf16.msra.mxu0 %v5422_v37  ;;  %v2308_v51 = vrot.slane %v2294_v15, %v6500_v43  ;;  %v2388_v34 = vrot.slane %v2294_v15, %v6503_v44  ;;  %v2312_v37 = vrot.slane %v2294_v15, %v6605_v59  ;;  %v2348_v52 = vrot.slane %v2294_v15, %v6508_v46 }
 0x416   :  { %5551 = vmatpush1.bf16.msra.mxu1 %v5550_v45  ;;  %5425 = vmatprep.subr.bf16.mxu0 %v5424_v41  ;;  %v2340_v45 = vrot.slane %v2293_v9, %v6508_v46  ;;  %v2420_v41 = vrot.slane %v2293_v9, %v6511_v47  ;;  %v2428_v39 = vrot.slane %v2294_v15, %v6511_v47 }
 0x417   :  { %5553 = vmatprep.subr.bf16.mxu1 %v5552_v38  ;;  %v2392_v38 = vrot.slane %v2294_v15, %v6613_v63  ;;  %v2328_v55 = vrot.slane %v2308_v51, %v6500_v43  ;;  %v2408_v58 = vrot.slane %v2388_v34, %v6503_v44  ;;  %v2368_v40 = vrot.slane %v2348_v52, %v6508_v46  ;;  %v3326_v52 = vld [vmem:[#allocation20 + $0x3b8] sm:$0xff] }
 0x418   :  { %v2360_v31 = vrot.slane %v2340_v45, %v6508_v46  ;;  %v2440_v35 = vrot.slane %v2420_v41, %v6511_v47  ;;  %v2448_v8 = vrot.slane %v2428_v39, %v6511_v47  ;;  %v2432_v48 = vrot.slane %v2294_v15, %v6626_v10  ;;  %v3322_v45 = vld [vmem:[#allocation20 + $0x398] sm:$0xff]  ;;  %v3319_v39 = vld [vmem:[#allocation20 + $0x380] sm:$0xff] }
 0x419   :  { %5427 = vmatpush1.bf16.msra.mxu0 %v5426_v60  ;;  %v2344_v60 = vrot.slane %v2293_v9, %v6609_v61  ;;  %v2412_v11 = vrot.slane %v2392_v38, %v6503_v44  ;;  %v2415_v18 = vmul.f32 %v2408_v58, %v6548_v5  ;;  %v3323_v38 = vld [vmem:[#allocation20 + $0x3a0] sm:$0xff] }
 0x41a   :  { %5555 = vmatpush1.bf16.msra.mxu1 %v5554_v62  ;;  %5429 = vmatprep.subr.bf16.mxu0 %v5428_v1  ;;  %v2332_v62 = vrot.slane %v2312_v37, %v6500_v43  ;;  %v2352_v1 = vrot.slane %v2294_v15, %v6609_v61  ;;  %v2452_v27 = vrot.slane %v2432_v48, %v6511_v47  ;;  %v3324_v37 = vld [vmem:[#allocation20 + $0x3a8] sm:$0xff]  ;;  %v3330_v48 = vld [vmem:[#allocation20 + $0x3d8] sm:$0xff] }
 0x41b   :  { %5557 = vmatprep.subr.bf16.mxu1 %v5556_v7  ;;  %v2424_v7 = vrot.slane %v2293_v9, %v6626_v10  ;;  %v2364_v2 = vrot.slane %v2344_v60, %v6508_v46  ;;  %v5440_v14 = vpack.c.bf16 %v3324_v37, %v3320_v30  ;;  %v5568_v60 = vpack.c.bf16 %v3326_v52, %v3322_v45  ;;  %v2725_v30 = vld [vmem:[#allocation17] sm:$0xf] }
 0x41c   :  { %v2372_v19 = vrot.slane %v2352_v1, %v6508_v46  ;;  %v3325_v1 = vld [vmem:[#allocation20 + $0x3b0] sm:$0xff]  ;;  %v5442_v6 = vpack.c.bf16 %v3323_v38, %v3319_v39 }
 0x41d   :  { %5431 = vmatpush1.bf16.msra.mxu0 %v5430_v36  ;;  %v2333_v36 = vmul.f32 %v2320_v50, %v6548_v5  ;;  %v2444_v12 = vrot.slane %v2424_v7, %v6511_v47  ;;  %v2374_v33 = vadd.f32 %v2364_v2, %v2334_v42 }
 0x41e   :  { %5559 = vmatpush1.bf16.msra.mxu1 %v5558_v17  ;;  %5433 = vmatprep.subr.bf16.mxu0 %v5432_v4  ;;  %v2413_v17 = vmul.f32 %v2400_v53, %v6548_v5  ;;  %v2335_v4 = vmul.f32 %v2328_v55, %v6548_v5 }
 0x41f   :  { %5561 = vmatprep.subr.bf16.mxu1 %v5560_v20  ;;  %v2336_v20 = vmul.f32 %v2332_v62, %v6548_v5  ;;  %v2454_v50 = vadd.f32 %v2444_v12, %v2414_v22  ;;  %v3321_v62 = vld [vmem:[#allocation20 + $0x390] sm:$0xff]  ;;  %v3336_v12 = vld [vmem:[#allocation20 + $0x408] sm:$0xff] }
 0x420   :  { %v2453_v29 = vadd.f32 %v2440_v35, %v2413_v17  ;;  %v5570_v7 = vpack.c.bf16 %v3325_v1, %v3321_v62  ;;  %v3334_v17 = vld [vmem:[#allocation20 + $0x3f8] sm:$0xff]  ;;  %v2738_v62 = vrot.slane %v2725_v30, %v6503_v44  ;;  %v2734_v1 = vrot.slane %v2725_v30, %v6508_v46 }
 0x421   :  { %5435 = vmatpush1.bf16.msra.mxu0 %v5434_v26  ;;  %v1996_v26 = vrot.slane %v1987_v16, %v6508_v46  ;;  %v2376_v34 = vadd.f32 %v2372_v19, %v2336_v20  ;;  %v5572_v20 = vpack.c.bf16 %v3334_v17, %v3330_v48 }
 0x422   :  { %5563 = vmatpush1.bf16.msra.mxu1 %v5562_v56  ;;  %5437 = vmatprep.subr.bf16.mxu0 %v5436_v23  ;;  %v2004_v56 = vrot.slane %v1987_v16, %v6511_v47  ;;  %v2416_v23 = vmul.f32 %v2412_v11, %v6548_v5  ;;  %v3332_v11 = vld [vmem:[#allocation20 + $0x3e8] sm:$0xff] }
 0x423   :  { %5565 = vmatprep.subr.bf16.mxu1 %v5564_v13  ;;  %v2373_v13 = vadd.f32 %v2360_v31, %v2333_v36 }
 0x424   :  { %v2456_v53 = vadd.f32 %v2452_v27, %v2416_v23  ;;  %v3342_v27 = vld [vmem:[#allocation20 + $0x438] sm:$0xff] }
 0x425   :  { %5439 = vmatpush1.bf16.msra.mxu0 %v5438_v24  ;;  %v2375_v24 = vadd.f32 %v2368_v40, %v2335_v4  ;;  %v3327_v4 = vld [vmem:[#allocation20 + $0x3c0] sm:$0xff] }
 0x426   :  { %5567 = vmatpush1.bf16.msra.mxu1 %v5566_v28  ;;  %v2455_v28 = vadd.f32 %v2448_v8, %v2415_v18  ;;  %5441 = vmatprep.subr.bf16.mxu0 %v5440_v14  ;;  %v3328_v8 = vld [vmem:[#allocation20 + $0x3c8] sm:$0xff]  ;;  %v3331_v18 = vld [vmem:[#allocation20 + $0x3e0] sm:$0xff] }
 0x427   :  { %5569 = vmatprep.subr.bf16.mxu1 %v5568_v60  ;;  %v5444_v36 = vpack.c.bf16 %v3332_v11, %v3328_v8  ;;  %v5446_v19 = vpack.c.bf16 %v3331_v18, %v3327_v4 }
 0x429   :  { %5443 = vmatpush1.bf16.msra.mxu0 %v5442_v6 }
 0x42a   :  { %5571 = vmatpush1.bf16.msra.mxu1 %v5570_v7  ;;  %5445 = vmatprep.subr.bf16.mxu0 %v5444_v36  ;;  %v2742_v7 = vrot.slane %v2725_v30, %v6511_v47 }
 0x42b   :  { %5573 = vmatprep.subr.bf16.mxu1 %v5572_v20 }
 0x42d   :  { %5447 = vmatpush1.bf16.msra.mxu0 %v5446_v19 }
 0x443   :  { %v2146_v25 = vpop.f32.mrb[6].mxu0  ;;  %v2288_v3 = vpop.f32.mrb[6].mxu1 }
 0x444   :  { %v5772_v9 = vadd.f32 %v2146_v25, %v1992_v21  ;;  %v5774_v15 = vadd.f32 %v2288_v3, %v2000_v0  ;;  %v2148_v32 = vpop.f32.mrb[7].mxu0  ;;  %v2290_v51 = vpop.f32.mrb[7].mxu1  ;;  %v3329_v21 = vld [vmem:[#allocation20 + $0x3d0] sm:$0xff] }
 0x445   :  { %v5773_v41 = vadd.f32 %v2148_v32, %v1996_v26  ;;  %v5775_v49 = vadd.f32 %v2290_v51, %v2004_v56  ;;  %v3333_v0 = vld [vmem:[#allocation20 + $0x3f0] sm:$0xff]  ;;  %v3340_v26 = vld [vmem:[#allocation20 + $0x428] sm:$0xff]  ;;  %v3338_v56 = vld [vmem:[#allocation20 + $0x418] sm:$0xff] }
 0x446   :  { %v2457_v55 = vmul.f32 %v5772_v9, %v2373_v13  ;;  %v2459_v58 = vmul.f32 %v5774_v15, %v2375_v24  ;;  %v5574_v22 = vpack.c.bf16 %v3333_v0, %v3329_v21  ;;  %v5448_v23 = vpack.c.bf16 %v3340_v26, %v3336_v12  ;;  %v3031_v13 = vld [vmem:[#allocation19] sm:$0xff] }
 0x447   :  { %v2458_v31 = vmul.f32 %v5773_v41, %v2374_v33  ;;  %v2460_v35 = vmul.f32 %v5775_v49, %v2376_v34  ;;  %v5576_v25 = vpack.c.bf16 %v3342_v27, %v3338_v56  ;;  %v3118_v3 = vrot.slane %v3031_v13, %v6503_v44 }
 0x448   :  { %v6869_v16 = vadd.f32 %v2457_v55, %v2453_v29  ;;  %v6871_v40 = vadd.f32 %v2459_v58, %v2455_v28  ;;  %5575 = vmatpush1.bf16.msra.mxu1 %v5574_v22  ;;  %5449 = vmatprep.subr.bf16.mxu0 %v5448_v23  ;;  %v3038_v29 = vrot.slane %v3031_v13, %v6500_v43  ;;  %v5825_v28 = vld [vmem:[#allocation19 + $0x8] sm:$0xff] }
 0x449   :  { %v6873_v42 = vadd.f32 %v2458_v31, %v2454_v50  ;;  %v6875_v2 = vadd.f32 %v2460_v35, %v2456_v53  ;;  %5577 = vmatprep.subr.bf16.mxu1 %v5576_v25  ;;  %v3042_v24 = vrot.slane %v3031_v13, %v6605_v59  ;;  %v3050_v9 = vrot.slane %v5825_v28, %v6605_v59 }
 0x44a   :  { %v3058_v15 = vrot.slane %v3038_v29, %v6500_v43  ;;  %v3078_v32 = vrot.slane %v3031_v13, %v6508_v46  ;;  %v3122_v33 = vrot.slane %v3031_v13, %v6613_v63  ;;  %v3138_v51 = vrot.slane %v3118_v3, %v6503_v44 }
 0x44b   :  { %v3130_v34 = vrot.slane %v5825_v28, %v6613_v63  ;;  %v3062_v37 = vrot.slane %v3042_v24, %v6500_v43  ;;  %v3082_v45 = vrot.slane %v3031_v13, %v6609_v61  ;;  %v3158_v41 = vrot.slane %v3031_v13, %v6511_v47 }
 0x44c   :  { %v3070_v49 = vrot.slane %v3050_v9, %v6500_v43  ;;  %v3090_v52 = vrot.slane %v5825_v28, %v6609_v61  ;;  %v3071_v39 = vmul.f32 %v3058_v15, %v6548_v5  ;;  %v3098_v38 = vrot.slane %v3078_v32, %v6508_v46  ;;  %v3339_v32 = vld [vmem:[#allocation20 + $0x420] sm:$0xff] }
 0x44d   :  { %v3142_v50 = vrot.slane %v3122_v33, %v6503_v44  ;;  %v3162_v53 = vrot.slane %v3031_v13, %v6626_v10  ;;  %v2730_v55 = vrot.slane %v2725_v30, %v6500_v43  ;;  %v3151_v58 = vmul.f32 %v3138_v51, %v6548_v5  ;;  %v3337_v33 = vld [vmem:[#allocation20 + $0x410] sm:$0xff] }
 0x44e   :  { %v3150_v14 = vrot.slane %v3130_v34, %v6503_v44  ;;  %v3170_v60 = vrot.slane %v5825_v28, %v6626_v10  ;;  %v3072_v31 = vmul.f32 %v3062_v37, %v6548_v5  ;;  %v3102_v35 = vrot.slane %v3082_v45, %v6508_v46  ;;  %v3335_v28 = vld [vmem:[#allocation20 + $0x400] sm:$0xff]  ;;  %v3341_v51 = vld [vmem:[#allocation20 + $0x430] sm:$0xff]  ;;  %v3344_v45 = vld [vmem:[#allocation20 + $0x448] sm:$0xff] }
 0x44f   :  { %v3178_v6 = vrot.slane %v3158_v41, %v6511_v47  ;;  %v3074_v8 = vmul.f32 %v3070_v49, %v6548_v5  ;;  %v3110_v11 = vrot.slane %v3090_v52, %v6508_v46  ;;  %v3152_v36 = vmul.f32 %v3142_v50, %v6548_v5  ;;  %v3348_v49 = vld [vmem:[#allocation20 + $0x468] sm:$0xff]  ;;  %v3346_v52 = vld [vmem:[#allocation20 + $0x458] sm:$0xff] }
 0x450   :  { %v3182_v17 = vrot.slane %v3162_v53, %v6511_v47  ;;  %v3111_v18 = vadd.f32 %v3098_v38, %v3071_v39  ;;  %v3154_v21 = vmul.f32 %v3150_v14, %v6548_v5  ;;  %v3190_v0 = vrot.slane %v3170_v60, %v6511_v47  ;;  %v3350_v39 = vld [vmem:[#allocation20 + $0x478] sm:$0xff]  ;;  %v3343_v53 = vld [vmem:[#allocation20 + $0x440] sm:$0xff]  ;;  %v3345_v14 = vld [vmem:[#allocation20 + $0x450] sm:$0xff] }
 0x451   :  { %v3112_v26 = vadd.f32 %v3102_v35, %v3072_v31  ;;  %v3191_v23 = vadd.f32 %v3178_v6, %v3151_v58  ;;  %v3114_v13 = vadd.f32 %v3110_v11, %v3074_v8  ;;  %v5578_v50 = vpack.c.bf16 %v3341_v51, %v3337_v33  ;;  %v3349_v60 = vld [vmem:[#allocation20 + $0x470] sm:$0xff]  ;;  %v3356_v31 = vld [vmem:[#allocation20 + $0x4a8] sm:$0xff]  ;;  %v3354_v35 = vld [vmem:[#allocation20 + $0x498] sm:$0xff] }
 0x452   :  { %v3192_v24 = vadd.f32 %v3182_v17, %v3152_v36  ;;  %v3194_v34 = vadd.f32 %v3190_v0, %v3154_v21  ;;  %v3358_v6 = vld [vmem:[#allocation20 + $0x4b8] sm:$0xff]  ;;  %v5582_v11 = vpack.c.bf16 %v3349_v60, %v3345_v14  ;;  %v3355_v36 = vld [vmem:[#allocation20 + $0x4a0] sm:$0xff]  ;;  %v3364_v21 = vld [vmem:[#allocation20 + $0x4e8] sm:$0xff] }
 0x453   :  { %v3362_v0 = vld [vmem:[#allocation20 + $0x4d8] sm:$0xff]  ;;  %v3367_v33 = vld [vmem:[#allocation20 + $0x500] sm:$0xff]  ;;  %v3377_v60 = vld [vmem:[#allocation20 + $0x550] sm:$0xff] }
 0x454   :  { %v3371_v51 = vld [vmem:[#allocation20 + $0x520] sm:$0xff] }
 0x4c3   :  { %v2884_v48 = vpop.f32.mrb[8].mxu0 }
 0x4c4   :  { %v5776_v4 = vadd.f32 %v2884_v48, %v2730_v55  ;;  %v3026_v20 = vpop.f32.mrb[8].mxu1  ;;  %v2886_v19 = vpop.f32.mrb[9].mxu0  ;;  %v3347_v55 = vld [vmem:[#allocation20 + $0x460] sm:$0xff] }
 0x4c5   :  { %v5778_v22 = vadd.f32 %v3026_v20, %v2738_v62  ;;  %v5777_v12 = vadd.f32 %v2886_v19, %v2734_v1  ;;  %v3028_v56 = vpop.f32.mrb[9].mxu1  ;;  %v3352_v62 = vld [vmem:[#allocation20 + $0x488] sm:$0xff]  ;;  %v5452_v1 = vpack.c.bf16 %v3348_v49, %v3344_v45  ;;  %v5454_v8 = vpack.c.bf16 %v3347_v55, %v3343_v53  ;;  %v3351_v48 = vld [vmem:[#allocation20 + $0x480] sm:$0xff]  ;;  %v3357_v20 = vld [vmem:[#allocation20 + $0x4b0] sm:$0xff] }
 0x4c6   :  { %v3195_v27 = vmul.f32 %v5776_v4, %v3111_v18  ;;  %v5779_v25 = vadd.f32 %v3028_v56, %v2742_v7  ;;  %v5456_v17 = vpack.c.bf16 %v3356_v31, %v3352_v62  ;;  %v5584_v4 = vpack.c.bf16 %v3358_v6, %v3354_v35  ;;  %v3353_v18 = vld [vmem:[#allocation20 + $0x490] sm:$0xff]  ;;  %v3360_v19 = vld [vmem:[#allocation20 + $0x4c8] sm:$0xff]  ;;  %v3359_v56 = vld [vmem:[#allocation20 + $0x4c0] sm:$0xff] }
 0x4c7   :  { %v3197_v29 = vmul.f32 %v5778_v22, %v6598_v54  ;;  %v3196_v3 = vmul.f32 %v5777_v12, %v3112_v26  ;;  %v5450_v54 = vpack.c.bf16 %v3339_v32, %v3335_v28  ;;  %v3366_v22 = vld [vmem:[#allocation20 + $0x4f8] sm:$0xff]  ;;  %v5458_v12 = vpack.c.bf16 %v3355_v36, %v3351_v48  ;;  %v3369_v45 = vld [vmem:[#allocation20 + $0x510] sm:$0xff]  ;;  %v3376_v49 = vld [vmem:[#allocation20 + $0x548] sm:$0xff] }
 0x4c8   :  { %v3199_v9 = vadd.f32 %v3195_v27, %v3191_v23  ;;  %v3198_v15 = vmul.f32 %v5779_v25, %v3114_v13  ;;  %v5586_v26 = vpack.c.bf16 %v3357_v20, %v3353_v18  ;;  %v3363_v23 = vld [vmem:[#allocation20 + $0x4e0] sm:$0xff]  ;;  %v5460_v27 = vpack.c.bf16 %v3364_v21, %v3360_v19  ;;  %v3361_v13 = vld [vmem:[#allocation20 + $0x4d0] sm:$0xff]  ;;  %v3370_v28 = vld [vmem:[#allocation20 + $0x518] sm:$0xff] }
 0x4c9   :  { %v6913_v30 = vadd.f32 %v3197_v29, %v6602_v57  ;;  %v3200_v37 = vadd.f32 %v3196_v3, %v3192_v24  ;;  %v5580_v57 = vpack.c.bf16 %v3350_v39, %v3346_v52  ;;  %v5588_v25 = vpack.c.bf16 %v3366_v22, %v3362_v0  ;;  %v3365_v29 = vld [vmem:[#allocation20 + $0x4f0] sm:$0xff]  ;;  %v3368_v3 = vld [vmem:[#allocation20 + $0x508] sm:$0xff]  ;;  %v3378_v39 = vld [vmem:[#allocation20 + $0x558] sm:$0xff] }
 0x4ca   :  { %v3202_v41 = vadd.f32 %v3198_v15, %v3194_v34  ;;  %v3203_v58 = vmax.f32 %v3199_v9, 0.0  ;;  %v3372_v24 = vld [vmem:[#allocation20 + $0x528] sm:$0xff]  ;;  %v3374_v9 = vld [vmem:[#allocation20 + $0x538] sm:$0xff]  ;;  %v5462_v15 = vpack.c.bf16 %v3363_v23, %v3359_v56  ;;  %v5590_v32 = vpack.c.bf16 %v3365_v29, %v3361_v13  ;;  %v3375_v53 = vld [vmem:[#allocation20 + $0x540] sm:$0xff] }
 0x4cb   :  { %v3204_v38 = vmax.f32 %v3200_v37, 0.0  ;;  %v5464_v34 = vpack.c.bf16 %v3372_v24, %v3368_v3  ;;  %v5592_v37 = vpack.c.bf16 %v3374_v9, %v3370_v28  ;;  %v3380_v52 = vld [vmem:[#allocation20 + $0x568] sm:$0xff]  ;;  %v3379_v55 = vld [vmem:[#allocation20 + $0x560] sm:$0xff]  ;;  %v3381_v62 = vld [vmem:[#allocation20 + $0x570] sm:$0xff] }
 0x4cc   :  { %v3206_v7 = vmax.f32 %v3202_v41, 0.0  ;;  %v3373_v41 = vld [vmem:[#allocation20 + $0x530] sm:$0xff]  ;;  %v3386_v31 = vld [vmem:[#allocation20 + $0x598] sm:$0xff]  ;;  %v5470_v6 = vpack.c.bf16 %v3379_v55, %v3375_v53  ;;  %v3392_v18 = vld [vmem:[#allocation20 + $0x5c8] sm:$0xff] }
 0x4cd   :  { %3549 = vmatprep.mubr.f32.mxu0 %v3204_v38  ;;  %3691 = vmatprep.mubr.f32.mxu1 %v3204_v38  ;;  %v3382_v38 = vld [vmem:[#allocation20 + $0x578] sm:$0xff]  ;;  %v3396_v20 = vld [vmem:[#allocation20 + $0x5e8] sm:$0xff] }
 0x4ce   :  { %3550 = vmatmul.mubr.f32.vlgmr.msra.gmra.mrb[10].mxu0 %v3203_v58  ;;  %3692 = vmatmul.mubr.f32.vlgmr.msra.gmra.mrb[10].mxu1 %v3203_v58  ;;  %v5468_v58 = vpack.c.bf16 %v3380_v52, %v3376_v49  ;;  %v5596_v14 = vpack.c.bf16 %v3382_v38, %v3378_v39  ;;  %v3390_v35 = vld [vmem:[#allocation20 + $0x5b8] sm:$0xff]  ;;  %v5476_v56 = vpack.c.bf16 %v3396_v20, %v3392_v18  ;;  %v3400_v13 = vld [vmem:[#allocation20 + $0x608] sm:$0xff] }
 0x4cf   :  { %5451 = vmatpush1.bf16.msra.mxu0 %v5450_v54  ;;  %5579 = vmatpush1.bf16.msra.mxu1 %v5578_v50  ;;  %v5466_v54 = vpack.c.bf16 %v3371_v51, %v3367_v33  ;;  %v5594_v50 = vpack.c.bf16 %v3373_v41, %v3369_v45  ;;  %v5600_v36 = vpack.c.bf16 %v3390_v35, %v3386_v31  ;;  %v3394_v19 = vld [vmem:[#allocation20 + $0x5d8] sm:$0xff]  ;;  %v3404_v29 = vld [vmem:[#allocation20 + $0x628] sm:$0xff] }
 0x4d0   :  { %3620 = vmatprep.mubr.f32.mxu0 %v3206_v7  ;;  %3762 = vmatprep.mubr.f32.mxu1 %v3206_v7  ;;  %v5598_v7 = vpack.c.bf16 %v3381_v62, %v3377_v60  ;;  %v3398_v21 = vld [vmem:[#allocation20 + $0x5f8] sm:$0xff]  ;;  %v5480_v33 = vpack.c.bf16 %v3404_v29, %v3400_v13  ;;  %v3408_v45 = vld [vmem:[#allocation20 + $0x648] sm:$0xff] }
 0x4d1   :  { %5453 = vmatprep.subr.bf16.mxu0 %v5452_v1  ;;  %5581 = vmatprep.subr.bf16.mxu1 %v5580_v57  ;;  %v3384_v1 = vld [vmem:[#allocation20 + $0x588] sm:$0xff]  ;;  %v5604_v23 = vpack.c.bf16 %v3398_v21, %v3394_v19  ;;  %v3402_v3 = vld [vmem:[#allocation20 + $0x618] sm:$0xff] }
 0x4d2   :  { %v3388_v57 = vld [vmem:[#allocation20 + $0x5a8] sm:$0xff]  ;;  %v3406_v24 = vld [vmem:[#allocation20 + $0x638] sm:$0xff] }
 0x4d3   :  { %5455 = vmatpush1.bf16.msra.mxu0 %v5454_v8  ;;  %5583 = vmatpush1.bf16.msra.mxu1 %v5582_v11  ;;  %v3383_v8 = vld [vmem:[#allocation20 + $0x580] sm:$0xff]  ;;  %v5472_v48 = vpack.c.bf16 %v3388_v57, %v3384_v1  ;;  %v5608_v51 = vpack.c.bf16 %v3406_v24, %v3402_v3  ;;  %v3412_v41 = vld [vmem:[#allocation20 + $0x668] sm:$0xff]  ;;  %v3410_v49 = vld [vmem:[#allocation20 + $0x658] sm:$0xff] }
 0x4d4   :  { %5457 = vmatprep.subr.bf16.mxu0 %v5456_v17  ;;  %5585 = vmatprep.subr.bf16.mxu1 %v5584_v4  ;;  %v3387_v11 = vld [vmem:[#allocation20 + $0x5a0] sm:$0xff]  ;;  %v3385_v17 = vld [vmem:[#allocation20 + $0x590] sm:$0xff]  ;;  %v3414_v52 = vld [vmem:[#allocation20 + $0x678] sm:$0xff]  ;;  %v5484_v53 = vpack.c.bf16 %v3412_v41, %v3408_v45 }
 0x4d5   :  { %v3389_v4 = vld [vmem:[#allocation20 + $0x5b0] sm:$0xff]  ;;  %v5474_v0 = vpack.c.bf16 %v3387_v11, %v3383_v8  ;;  %v5612_v55 = vpack.c.bf16 %v3414_v52, %v3410_v49  ;;  %v3416_v60 = vld [vmem:[#allocation20 + $0x688] sm:$0xff]  ;;  %v3418_v1 = vld [vmem:[#allocation20 + $0x698] sm:$0xff] }
 0x4d6   :  { %v5602_v22 = vpack.c.bf16 %v3389_v4, %v3385_v17  ;;  %v3420_v62 = vld [vmem:[#allocation20 + $0x6a8] sm:$0xff]  ;;  %v3422_v57 = vld [vmem:[#allocation20 + $0x6b8] sm:$0xff] }
 0x4d7   :  { %5459 = vmatpush1.bf16.msra.mxu0 %v5458_v12  ;;  %5587 = vmatpush1.bf16.msra.mxu1 %v5586_v26  ;;  %v3391_v12 = vld [vmem:[#allocation20 + $0x5c0] sm:$0xff]  ;;  %v5488_v8 = vpack.c.bf16 %v3420_v62, %v3416_v60  ;;  %v5616_v11 = vpack.c.bf16 %v3422_v57, %v3418_v1  ;;  %v3424_v17 = vld [vmem:[#allocation20 + $0x6c8] sm:$0xff]  ;;  %v3426_v18 = vld [vmem:[#allocation20 + $0x6d8] sm:$0xff] }
 0x4d8   :  { %5461 = vmatprep.subr.bf16.mxu0 %v5460_v27  ;;  %5589 = vmatprep.subr.bf16.mxu1 %v5588_v25  ;;  %v3395_v26 = vld [vmem:[#allocation20 + $0x5e0] sm:$0xff]  ;;  %v3393_v27 = vld [vmem:[#allocation20 + $0x5d0] sm:$0xff]  ;;  %v3428_v4 = vld [vmem:[#allocation20 + $0x6e8] sm:$0xff] }
 0x4d9   :  { %v3397_v25 = vld [vmem:[#allocation20 + $0x5f0] sm:$0xff]  ;;  %v5478_v28 = vpack.c.bf16 %v3395_v26, %v3391_v12  ;;  %v3430_v20 = vld [vmem:[#allocation20 + $0x6f8] sm:$0xff]  ;;  %v5492_v12 = vpack.c.bf16 %v3428_v4, %v3424_v17 }
 0x4da   :  { %v5606_v9 = vpack.c.bf16 %v3397_v25, %v3393_v27  ;;  %v5620_v26 = vpack.c.bf16 %v3430_v20, %v3426_v18  ;;  %v3432_v27 = vld [vmem:[#allocation20 + $0x708] sm:$0xff]  ;;  %v3434_v13 = vld [vmem:[#allocation20 + $0x718] sm:$0xff] }
 0x4db   :  { %5463 = vmatpush1.bf16.msra.mxu0 %v5462_v15  ;;  %5591 = vmatpush1.bf16.msra.mxu1 %v5590_v32  ;;  %v3399_v15 = vld [vmem:[#allocation20 + $0x600] sm:$0xff]  ;;  %v3436_v25 = vld [vmem:[#allocation20 + $0x728] sm:$0xff]  ;;  %v3438_v29 = vld [vmem:[#allocation20 + $0x738] sm:$0xff] }
 0x4dc   :  { %5465 = vmatprep.subr.bf16.mxu0 %v5464_v34  ;;  %5593 = vmatprep.subr.bf16.mxu1 %v5592_v37  ;;  %v3403_v32 = vld [vmem:[#allocation20 + $0x620] sm:$0xff]  ;;  %v3401_v34 = vld [vmem:[#allocation20 + $0x610] sm:$0xff]  ;;  %v3442_v45 = vld [vmem:[#allocation20 + $0x758] sm:$0xff] }
 0x4dd   :  { %v3405_v37 = vld [vmem:[#allocation20 + $0x630] sm:$0xff]  ;;  %v5482_v39 = vpack.c.bf16 %v3403_v32, %v3399_v15  ;;  %v5496_v15 = vpack.c.bf16 %v3436_v25, %v3432_v27  ;;  %v5624_v32 = vpack.c.bf16 %v3438_v29, %v3434_v13  ;;  %v3446_v41 = vld [vmem:[#allocation20 + $0x778] sm:$0xff]  ;;  %v4057_v27 = vld [vmem:[#allocation23 + $0x180] sm:$0xff] }
 0x4de   :  { %v5610_v38 = vpack.c.bf16 %v3405_v37, %v3401_v34  ;;  %v3440_v34 = vld [vmem:[#allocation20 + $0x748] sm:$0xff]  ;;  %v3450_v60 = vld [vmem:[#allocation20 + $0x798] sm:$0xff] }
 0x4df   :  { %5467 = vmatpush1.bf16.msra.mxu0 %v5466_v54  ;;  %5595 = vmatpush1.bf16.msra.mxu1 %v5594_v50  ;;  %v3407_v54 = vld [vmem:[#allocation20 + $0x640] sm:$0xff]  ;;  %v3444_v37 = vld [vmem:[#allocation20 + $0x768] sm:$0xff]  ;;  %v3454_v62 = vld [vmem:[#allocation20 + $0x7b8] sm:$0xff] }
 0x4e0   :  { %5469 = vmatprep.subr.bf16.mxu0 %v5468_v58  ;;  %5597 = vmatprep.subr.bf16.mxu1 %v5596_v14  ;;  %v3411_v50 = vld [vmem:[#allocation20 + $0x660] sm:$0xff]  ;;  %v3409_v58 = vld [vmem:[#allocation20 + $0x650] sm:$0xff]  ;;  %v3458_v17 = vld [vmem:[#allocation20 + $0x7d8] sm:$0xff] }
 0x4e1   :  { %v3413_v14 = vld [vmem:[#allocation20 + $0x670] sm:$0xff]  ;;  %v5486_v31 = vpack.c.bf16 %v3411_v50, %v3407_v54  ;;  %v5500_v54 = vpack.c.bf16 %v3444_v37, %v3440_v34  ;;  %v5628_v50 = vpack.c.bf16 %v3446_v41, %v3442_v45  ;;  %v3462_v4 = vld [vmem:[#allocation20 + $0x7f8] sm:$0xff]  ;;  %v4058_v25 = vld [vmem:[#allocation23 + $0x188] sm:$0xff] }
 0x4e2   :  { %v5614_v35 = vpack.c.bf16 %v3413_v14, %v3409_v58  ;;  %v3448_v58 = vld [vmem:[#allocation20 + $0x788] sm:$0xff]  ;;  %v4059_v34 = vld [vmem:[#allocation23 + $0x190] sm:$0xff]  ;;  %v4060_v37 = vld [vmem:[#allocation23 + $0x198] sm:$0xff] }
 0x4e3   :  { %5471 = vmatpush1.bf16.msra.mxu0 %v5470_v6  ;;  %5599 = vmatpush1.bf16.msra.mxu1 %v5598_v7  ;;  %v3415_v6 = vld [vmem:[#allocation20 + $0x680] sm:$0xff]  ;;  %v3452_v14 = vld [vmem:[#allocation20 + $0x7a8] sm:$0xff] }
 0x4e4   :  { %5473 = vmatprep.subr.bf16.mxu0 %v5472_v48  ;;  %5601 = vmatprep.subr.bf16.mxu1 %v5600_v36  ;;  %v3419_v7 = vld [vmem:[#allocation20 + $0x6a0] sm:$0xff]  ;;  %v3417_v48 = vld [vmem:[#allocation20 + $0x690] sm:$0xff] }
 0x4e5   :  { %v3421_v36 = vld [vmem:[#allocation20 + $0x6b0] sm:$0xff]  ;;  %v5490_v19 = vpack.c.bf16 %v3419_v7, %v3415_v6  ;;  %v5504_v6 = vpack.c.bf16 %v3452_v14, %v3448_v58  ;;  %v5632_v7 = vpack.c.bf16 %v3454_v62, %v3450_v60  ;;  %v4030_v58 = vld [vmem:[#allocation23 + $0xa8] sm:$0xff]  ;;  %v4061_v14 = vld [vmem:[#allocation23 + $0x1a0] sm:$0xff] }
 0x4e6   :  { %v5618_v21 = vpack.c.bf16 %v3421_v36, %v3417_v48  ;;  %v3456_v48 = vld [vmem:[#allocation20 + $0x7c8] sm:$0xff] }
 0x4e7   :  { %5475 = vmatpush1.bf16.msra.mxu0 %v5474_v0  ;;  %5603 = vmatpush1.bf16.msra.mxu1 %v5602_v22  ;;  %v3423_v0 = vld [vmem:[#allocation20 + $0x6c0] sm:$0xff]  ;;  %v3460_v36 = vld [vmem:[#allocation20 + $0x7e8] sm:$0xff] }
 0x4e8   :  { %5477 = vmatprep.subr.bf16.mxu0 %v5476_v56  ;;  %5605 = vmatprep.subr.bf16.mxu1 %v5604_v23  ;;  %v3427_v22 = vld [vmem:[#allocation20 + $0x6e0] sm:$0xff]  ;;  %v3425_v56 = vld [vmem:[#allocation20 + $0x6d0] sm:$0xff]  ;;  %v4062_v60 = vld [vmem:[#allocation23 + $0x1a8] sm:$0xff] }
 0x4e9   :  { %v3429_v23 = vld [vmem:[#allocation20 + $0x6f0] sm:$0xff]  ;;  %v5494_v3 = vpack.c.bf16 %v3427_v22, %v3423_v0  ;;  %v5508_v0 = vpack.c.bf16 %v3460_v36, %v3456_v48  ;;  %v5636_v22 = vpack.c.bf16 %v3462_v4, %v3458_v17  ;;  %v4064_v36 = vld [vmem:[#allocation23 + $0x1b8] sm:$0xff] }
 0x4ea   :  { %v5622_v24 = vpack.c.bf16 %v3429_v23, %v3425_v56  ;;  %v4025_v56 = vld [vmem:[#allocation23 + $0x80] sm:$0xff]  ;;  %v4026_v23 = vld [vmem:[#allocation23 + $0x88] sm:$0xff]  ;;  %v4063_v48 = vld [vmem:[#allocation23 + $0x1b0] sm:$0xff] }
 0x4eb   :  { %5479 = vmatpush1.bf16.msra.mxu0 %v5478_v28  ;;  %5607 = vmatpush1.bf16.msra.mxu1 %v5606_v9  ;;  %v3431_v28 = vld [vmem:[#allocation20 + $0x700] sm:$0xff] }
 0x4ec   :  { %5481 = vmatprep.subr.bf16.mxu0 %v5480_v33  ;;  %5609 = vmatprep.subr.bf16.mxu1 %v5608_v51  ;;  %v3435_v9 = vld [vmem:[#allocation20 + $0x720] sm:$0xff]  ;;  %v3433_v33 = vld [vmem:[#allocation20 + $0x710] sm:$0xff] }
 0x4ed   :  { %v3437_v51 = vld [vmem:[#allocation20 + $0x730] sm:$0xff]  ;;  %v5498_v49 = vpack.c.bf16 %v3435_v9, %v3431_v28  ;;  %v5640_v28 = vpack.c.bf16 %v4026_v23, %v4025_v56  ;;  %v5672_v9 = vpack.c.bf16 %v4058_v25, %v4057_v27  ;;  %v4065_v56 = vld [vmem:[#allocation23 + $0x1c0] sm:$0xff]  ;;  %v4066_v23 = vld [vmem:[#allocation23 + $0x1c8] sm:$0xff] }
 0x4ee   :  { %v5626_v52 = vpack.c.bf16 %v3437_v51, %v3433_v33  ;;  %v4027_v33 = vld [vmem:[#allocation23 + $0x90] sm:$0xff]  ;;  %v4028_v51 = vld [vmem:[#allocation23 + $0x98] sm:$0xff] }
 0x4ef   :  { %5483 = vmatpush1.bf16.msra.mxu0 %v5482_v39  ;;  %5611 = vmatpush1.bf16.msra.mxu1 %v5610_v38  ;;  %v3439_v39 = vld [vmem:[#allocation20 + $0x740] sm:$0xff] }
 0x4f0   :  { %5485 = vmatprep.subr.bf16.mxu0 %v5484_v53  ;;  %5613 = vmatprep.subr.bf16.mxu1 %v5612_v55  ;;  %v3443_v38 = vld [vmem:[#allocation20 + $0x760] sm:$0xff]  ;;  %v3441_v53 = vld [vmem:[#allocation20 + $0x750] sm:$0xff] }
 0x4f1   :  { %v3445_v55 = vld [vmem:[#allocation20 + $0x770] sm:$0xff]  ;;  %v5502_v1 = vpack.c.bf16 %v3443_v38, %v3439_v39  ;;  %v3205_v39 = vmax.f32 %v6913_v30, 0.0  ;;  %v5644_v38 = vpack.c.bf16 %v4028_v51, %v4027_v33  ;;  %v4068_v51 = vld [vmem:[#allocation23 + $0x1d8] sm:$0xff] }
 0x4f2   :  { %v5630_v57 = vpack.c.bf16 %v3445_v55, %v3441_v53  ;;  %v4044_v53 = vld [vmem:[#allocation23 + $0x118] sm:$0xff]  ;;  %v4029_v55 = vld [vmem:[#allocation23 + $0xa0] sm:$0xff]  ;;  %v4067_v33 = vld [vmem:[#allocation23 + $0x1d0] sm:$0xff] }
 0x4f3   :  { %5487 = vmatpush1.bf16.msra.mxu0 %v5486_v31  ;;  %5615 = vmatpush1.bf16.msra.mxu1 %v5614_v35  ;;  %v3447_v31 = vld [vmem:[#allocation20 + $0x780] sm:$0xff]  ;;  %v5648_v30 = vpack.c.bf16 %v4030_v58, %v4029_v55  ;;  %v4038_v55 = vld [vmem:[#allocation23 + $0xe8] sm:$0xff] }
 0x4f4   :  { %5489 = vmatprep.subr.bf16.mxu0 %v5488_v8  ;;  %5617 = vmatprep.subr.bf16.mxu1 %v5616_v11  ;;  %v3451_v35 = vld [vmem:[#allocation20 + $0x7a0] sm:$0xff]  ;;  %v3449_v8 = vld [vmem:[#allocation20 + $0x790] sm:$0xff] }
 0x4f5   :  { %v3453_v11 = vld [vmem:[#allocation20 + $0x7b0] sm:$0xff]  ;;  %v5506_v18 = vpack.c.bf16 %v3451_v35, %v3447_v31  ;;  %v4014_v31 = vld [vmem:[#allocation23 + $0x28] sm:$0xff]  ;;  %v5680_v35 = vpack.c.bf16 %v4062_v60, %v4061_v14  ;;  %v4069_v58 = vld [vmem:[#allocation23 + $0x1e0] sm:$0xff] }
 0x4f6   :  { %v5634_v20 = vpack.c.bf16 %v3453_v11, %v3449_v8  ;;  %v4031_v8 = vld [vmem:[#allocation23 + $0xb0] sm:$0xff]  ;;  %v4032_v11 = vld [vmem:[#allocation23 + $0xb8] sm:$0xff]  ;;  %v4070_v60 = vld [vmem:[#allocation23 + $0x1e8] sm:$0xff] }
 0x4f7   :  { %5491 = vmatpush1.bf16.msra.mxu0 %v5490_v19  ;;  %5619 = vmatpush1.bf16.msra.mxu1 %v5618_v21  ;;  %v3455_v19 = vld [vmem:[#allocation20 + $0x7c0] sm:$0xff] }
 0x4f8   :  { %5493 = vmatprep.subr.bf16.mxu0 %v5492_v12  ;;  %5621 = vmatprep.subr.bf16.mxu1 %v5620_v26  ;;  %v3459_v21 = vld [vmem:[#allocation20 + $0x7e0] sm:$0xff]  ;;  %v3457_v12 = vld [vmem:[#allocation20 + $0x7d0] sm:$0xff] }
 0x4f9   :  { %v3461_v26 = vld [vmem:[#allocation20 + $0x7f0] sm:$0xff]  ;;  %v5510_v13 = vpack.c.bf16 %v3459_v21, %v3455_v19  ;;  %v5652_v19 = vpack.c.bf16 %v4032_v11, %v4031_v8  ;;  %v5684_v21 = vpack.c.bf16 %v4064_v36, %v4063_v48  ;;  %v4040_v8 = vld [vmem:[#allocation23 + $0xf8] sm:$0xff] }
 0x4fa   :  { %v5638_v29 = vpack.c.bf16 %v3461_v26, %v3457_v12  ;;  %v4033_v12 = vld [vmem:[#allocation23 + $0xc0] sm:$0xff]  ;;  %v4034_v26 = vld [vmem:[#allocation23 + $0xc8] sm:$0xff]  ;;  %v4071_v11 = vld [vmem:[#allocation23 + $0x1f0] sm:$0xff] }
 0x4fb   :  { %5495 = vmatpush1.bf16.msra.mxu0 %v5494_v3  ;;  %5623 = vmatpush1.bf16.msra.mxu1 %v5622_v24  ;;  %v4009_v3 = vld [vmem:[#allocation23] sm:$0xff]  ;;  %v4010_v24 = vld [vmem:[#allocation23 + $0x8] sm:$0xff]  ;;  %v4072_v36 = vld [vmem:[#allocation23 + $0x1f8] sm:$0xff] }
 0x4fc   :  { %5497 = vmatprep.subr.bf16.mxu0 %v5496_v15  ;;  %5625 = vmatprep.subr.bf16.mxu1 %v5624_v32  ;;  %v4041_v15 = vld [vmem:[#allocation23 + $0x100] sm:$0xff]  ;;  %v4042_v32 = vld [vmem:[#allocation23 + $0x108] sm:$0xff]  ;;  %v5642_v45 = vpack.c.bf16 %v4010_v24, %v4009_v3  ;;  %v5656_v3 = vpack.c.bf16 %v4034_v26, %v4033_v12  ;;  %v5688_v24 = vpack.c.bf16 %v4066_v23, %v4065_v56 }
 0x4fd   :  { %v5674_v41 = vpack.c.bf16 %v4042_v32, %v4041_v15  ;;  %v4035_v15 = vld [vmem:[#allocation23 + $0xd0] sm:$0xff]  ;;  %v4036_v32 = vld [vmem:[#allocation23 + $0xd8] sm:$0xff]  ;;  %v3962_v12 = vld [vmem:[#allocation22 + $0x88] sm:$0xff] }
 0x4fe   :  { %v3993_v26 = vld [vmem:[#allocation22 + $0x180] sm:$0xff]  ;;  %v3994_v23 = vld [vmem:[#allocation22 + $0x188] sm:$0xff] }
 0x4ff   :  { %5499 = vmatpush1.bf16.msra.mxu0 %v5498_v49  ;;  %5627 = vmatpush1.bf16.msra.mxu1 %v5626_v52  ;;  %v4011_v49 = vld [vmem:[#allocation23 + $0x10] sm:$0xff]  ;;  %v4012_v52 = vld [vmem:[#allocation23 + $0x18] sm:$0xff] }
 0x500   :  { %5501 = vmatprep.subr.bf16.mxu0 %v5500_v54  ;;  %5629 = vmatprep.subr.bf16.mxu1 %v5628_v50  ;;  %v5676_v54 = vpack.c.bf16 %v4060_v37, %v4059_v34  ;;  %v4043_v50 = vld [vmem:[#allocation23 + $0x110] sm:$0xff]  ;;  %v5646_v62 = vpack.c.bf16 %v4012_v52, %v4011_v49  ;;  %v5692_v49 = vpack.c.bf16 %v4068_v51, %v4067_v33  ;;  %v4020_v52 = vld [vmem:[#allocation23 + $0x58] sm:$0xff] }
 0x503   :  { %5503 = vmatpush1.bf16.msra.mxu0 %v5502_v1  ;;  %5631 = vmatpush1.bf16.msra.mxu1 %v5630_v57  ;;  %v5678_v1 = vpack.c.bf16 %v4044_v53, %v4043_v50  ;;  %v4013_v57 = vld [vmem:[#allocation23 + $0x20] sm:$0xff] }
 0x504   :  { %5505 = vmatprep.subr.bf16.mxu0 %v5504_v6  ;;  %5633 = vmatprep.subr.bf16.mxu1 %v5632_v7  ;;  %v4045_v6 = vld [vmem:[#allocation23 + $0x120] sm:$0xff]  ;;  %v4046_v7 = vld [vmem:[#allocation23 + $0x128] sm:$0xff]  ;;  %v5650_v17 = vpack.c.bf16 %v4014_v31, %v4013_v57  ;;  %v5696_v57 = vpack.c.bf16 %v4070_v60, %v4069_v58 }
 0x505   :  { %v5682_v4 = vpack.c.bf16 %v4046_v7, %v4045_v6  ;;  %v4037_v53 = vld [vmem:[#allocation23 + $0xe0] sm:$0xff]  ;;  %v4039_v7 = vld [vmem:[#allocation23 + $0xf0] sm:$0xff] }
 0x506   :  { %v5664_v14 = vpack.c.bf16 %v4038_v55, %v4037_v53  ;;  %v5668_v48 = vpack.c.bf16 %v4040_v8, %v4039_v7 }
 0x507   :  { %5507 = vmatpush1.bf16.msra.mxu0 %v5506_v18  ;;  %5635 = vmatpush1.bf16.msra.mxu1 %v5634_v20  ;;  %v4015_v18 = vld [vmem:[#allocation23 + $0x30] sm:$0xff]  ;;  %v4016_v20 = vld [vmem:[#allocation23 + $0x38] sm:$0xff] }
 0x508   :  { %5509 = vmatprep.subr.bf16.mxu0 %v5508_v0  ;;  %5637 = vmatprep.subr.bf16.mxu1 %v5636_v22  ;;  %v4047_v0 = vld [vmem:[#allocation23 + $0x130] sm:$0xff]  ;;  %v4048_v22 = vld [vmem:[#allocation23 + $0x138] sm:$0xff]  ;;  %v5654_v27 = vpack.c.bf16 %v4016_v20, %v4015_v18  ;;  %v5700_v18 = vpack.c.bf16 %v4072_v36, %v4071_v11 }
 0x509   :  { %v5686_v25 = vpack.c.bf16 %v4048_v22, %v4047_v0  ;;  %v3961_v22 = vld [vmem:[#allocation22 + $0x80] sm:$0xff] }
 0x50a   :  { %v5704_v56 = vpack.c.bf16 %v3962_v12, %v3961_v22 }
 0x50b   :  { %5511 = vmatpush1.bf16.msra.mxu0 %v5510_v13  ;;  %5639 = vmatpush1.bf16.msra.mxu1 %v5638_v29  ;;  %v4017_v13 = vld [vmem:[#allocation23 + $0x40] sm:$0xff]  ;;  %v4018_v29 = vld [vmem:[#allocation23 + $0x48] sm:$0xff] }
 0x50c   :  { %5641 = vmatprep.subr.bf16.mxu0 %v5640_v28  ;;  %5673 = vmatprep.subr.bf16.mxu1 %v5672_v9  ;;  %v4049_v28 = vld [vmem:[#allocation23 + $0x140] sm:$0xff]  ;;  %v4050_v9 = vld [vmem:[#allocation23 + $0x148] sm:$0xff]  ;;  %v5658_v34 = vpack.c.bf16 %v4018_v29, %v4017_v13 }
 0x50d   :  { %v5690_v37 = vpack.c.bf16 %v4050_v9, %v4049_v28  ;;  %v3770_v13 = vld [vmem:[%s7012_s15 + $0x8] sm:$0xff] }
 0x50e   :  { %3621 = vmatmul.mubr.f32.vlgmr.msra.gmra.mrb[10].mxu0 %v3205_v39  ;;  %3763 = vmatmul.mubr.f32.vlgmr.msra.gmra.mrb[10].mxu1 %v3205_v39  ;;  %v4051_v39 = vld [vmem:[#allocation23 + $0x150] sm:$0xff]  ;;  %v3824_v51 = vrot.slane %v3770_v13, %v6508_v46 }
 0x50f   :  { %5643 = vmatpush3.bf16.msra.mxu0 %v5642_v45  ;;  %5675 = vmatpush3.bf16.msra.mxu1 %v5674_v41  ;;  %v4019_v45 = vld [vmem:[#allocation23 + $0x50] sm:$0xff]  ;;  %v5660_v41 = vpack.c.bf16 %v4036_v32, %v4035_v15  ;;  %v3788_v32 = vrot.slane %v3770_v13, %v6605_v59 }
 0x510   :  { %5645 = vmatprep.subr.bf16.mxu0 %v5644_v38  ;;  %5677 = vmatprep.subr.bf16.mxu1 %v5676_v54  ;;  %v4052_v38 = vld [vmem:[#allocation23 + $0x158] sm:$0xff]  ;;  %v5662_v54 = vpack.c.bf16 %v4020_v52, %v4019_v45  ;;  %v3868_v45 = vrot.slane %v3770_v13, %v6613_v63  ;;  %v3844_v55 = vrot.slane %v3824_v51, %v6508_v46 }
 0x511   :  { %v5694_v50 = vpack.c.bf16 %v4052_v38, %v4051_v39 }
 0x513   :  { %5647 = vmatpush3.bf16.msra.mxu0 %v5646_v62  ;;  %5679 = vmatpush3.bf16.msra.mxu1 %v5678_v1  ;;  %v4021_v62 = vld [vmem:[#allocation23 + $0x60] sm:$0xff]  ;;  %v4022_v1 = vld [vmem:[#allocation23 + $0x68] sm:$0xff] }
 0x514   :  { %5649 = vmatprep.subr.bf16.mxu0 %v5648_v30  ;;  %5681 = vmatprep.subr.bf16.mxu1 %v5680_v35  ;;  %v5666_v31 = vpack.c.bf16 %v4022_v1, %v4021_v62  ;;  %v4053_v30 = vld [vmem:[#allocation23 + $0x160] sm:$0xff]  ;;  %v4054_v35 = vld [vmem:[#allocation23 + $0x168] sm:$0xff]  ;;  %v3888_v1 = vrot.slane %v3868_v45, %v6503_v44 }
 0x515   :  { %v5698_v6 = vpack.c.bf16 %v4054_v35, %v4053_v30 }
 0x517   :  { %5651 = vmatpush3.bf16.msra.mxu0 %v5650_v17  ;;  %5683 = vmatpush3.bf16.msra.mxu1 %v5682_v4  ;;  %v4023_v17 = vld [vmem:[#allocation23 + $0x70] sm:$0xff]  ;;  %v4024_v4 = vld [vmem:[#allocation23 + $0x78] sm:$0xff] }
 0x518   :  { %5653 = vmatprep.subr.bf16.mxu0 %v5652_v19  ;;  %5685 = vmatprep.subr.bf16.mxu1 %v5684_v21  ;;  %v5670_v20 = vpack.c.bf16 %v4024_v4, %v4023_v17  ;;  %v4055_v19 = vld [vmem:[#allocation23 + $0x170] sm:$0xff]  ;;  %v4056_v21 = vld [vmem:[#allocation23 + $0x178] sm:$0xff] }
 0x519   :  { %v5702_v0 = vpack.c.bf16 %v4056_v21, %v4055_v19  ;;  %v3892_v21 = vmul.f32 %v3888_v1, %v6548_v5  ;;  %v3948_v1 = vld [vmem:[#allocation22 + $0x18] sm:$0xff] }
 0x51b   :  { %5655 = vmatpush3.bf16.msra.mxu0 %v5654_v27  ;;  %5687 = vmatpush3.bf16.msra.mxu1 %v5686_v25  ;;  %v5736_v27 = vpack.c.bf16 %v3994_v23, %v3993_v26  ;;  %v3769_v25 = vld [vmem:[%s7012_s15] sm:$0xff] }
 0x51c   :  { %5657 = vmatprep.subr.bf16.mxu0 %v5656_v3  ;;  %5689 = vmatprep.subr.bf16.mxu1 %v5688_v24  ;;  %v3776_v29 = vrot.slane %v3769_v25, %v6500_v43  ;;  %v3784_v3 = vrot.slane %v3770_v13, %v6500_v43  ;;  %v3816_v24 = vrot.slane %v3769_v25, %v6508_v46 }
 0x51d   :  { %v3780_v28 = vrot.slane %v3769_v25, %v6605_v59  ;;  %v3856_v15 = vrot.slane %v3769_v25, %v6503_v44  ;;  %v3820_v39 = vrot.slane %v3769_v25, %v6609_v61  ;;  %v3463_v59 = vld [vmem:[%s7011_s14] sm:$0xf]  ;;  %v3900_v62 = vrot.slane %v3769_v25, %v6626_v10 }
 0x51e   :  { %v3796_v9 = vrot.slane %v3776_v29, %v6500_v43  ;;  %v3804_v33 = vrot.slane %v3784_v3, %v6500_v43  ;;  %v3480_v7 = vrot.slane %v3463_v59, %v6511_v47 }
 0x51f   :  { %5659 = vmatpush3.bf16.msra.mxu0 %v5658_v34  ;;  %5691 = vmatpush3.bf16.msra.mxu1 %v5690_v37  ;;  %v3864_v34 = vrot.slane %v3770_v13, %v6503_v44  ;;  %v3860_v37 = vrot.slane %v3769_v25, %v6613_v63  ;;  %v3800_v52 = vrot.slane %v3780_v28, %v6500_v43 }
 0x520   :  { %5661 = vmatprep.subr.bf16.mxu0 %v5660_v41  ;;  %5693 = vmatprep.subr.bf16.mxu1 %v5692_v49  ;;  %v3836_v41 = vrot.slane %v3816_v24, %v6508_v46  ;;  %v3896_v49 = vrot.slane %v3769_v25, %v6511_v47  ;;  %v3809_v38 = vmul.f32 %v3796_v9, %v6548_v5 }
 0x521   :  { %v3828_v63 = vrot.slane %v3770_v13, %v6609_v61  ;;  %v3811_v53 = vmul.f32 %v3804_v33, %v6548_v5  ;;  %v3884_v58 = vrot.slane %v3864_v34, %v6503_v44  ;;  %v3880_v60 = vrot.slane %v3860_v37, %v6503_v44  ;;  %v3945_v37 = vld [vmem:[#allocation22] sm:$0xff] }
 0x522   :  { %v3476_v61 = vrot.slane %v3463_v59, %v6503_v44  ;;  %v3810_v30 = vmul.f32 %v3800_v52, %v6548_v5  ;;  %v3840_v35 = vrot.slane %v3820_v39, %v6508_v46  ;;  %v3920_v19 = vrot.slane %v3900_v62, %v6511_v47  ;;  %v3977_v52 = vld [vmem:[#allocation22 + $0x100] sm:$0xff]  ;;  %v3978_v39 = vld [vmem:[#allocation22 + $0x108] sm:$0xff]  ;;  %v3947_v62 = vld [vmem:[#allocation22 + $0x10] sm:$0xff] }
 0x523   :  { %5663 = vmatpush3.bf16.msra.mxu0 %v5662_v54  ;;  %5695 = vmatpush3.bf16.msra.mxu1 %v5694_v50  ;;  %v3876_v54 = vrot.slane %v3856_v15, %v6503_v44  ;;  %v3808_v50 = vrot.slane %v3788_v32, %v6500_v43  ;;  %v3848_v11 = vrot.slane %v3828_v63, %v6508_v46  ;;  %v3995_v63 = vld [vmem:[#allocation22 + $0x190] sm:$0xff] }
 0x524   :  { %5665 = vmatprep.subr.bf16.mxu0 %v5664_v14  ;;  %5697 = vmatprep.subr.bf16.mxu1 %v5696_v57  ;;  %v3904_v14 = vrot.slane %v3770_v13, %v6511_v47  ;;  %v3908_v57 = vrot.slane %v3770_v13, %v6626_v10  ;;  %v3916_v10 = vrot.slane %v3896_v49, %v6511_v47 }
 0x525   :  { %v3812_v8 = vmul.f32 %v3808_v50, %v6548_v5  ;;  %v3891_v36 = vmul.f32 %v3884_v58, %v6548_v5  ;;  %v3849_v12 = vadd.f32 %v3836_v41, %v3809_v38  ;;  %v3850_v13 = vadd.f32 %v3840_v35, %v3810_v30  ;;  %v3946_v41 = vld [vmem:[#allocation22 + $0x8] sm:$0xff]  ;;  %v3964_v50 = vld [vmem:[#allocation22 + $0x98] sm:$0xff]  ;;  %v3965_v35 = vld [vmem:[#allocation22 + $0xa0] sm:$0xff] }
 0x526   :  { %v3924_v17 = vrot.slane %v3904_v14, %v6511_v47  ;;  %v5706_v14 = vpack.c.bf16 %v3946_v41, %v3945_v37  ;;  %v3980_v30 = vld [vmem:[#allocation22 + $0x118] sm:$0xff]  ;;  %v3954_v37 = vld [vmem:[#allocation22 + $0x48] sm:$0xff]  ;;  %v3985_v41 = vld [vmem:[#allocation22 + $0x140] sm:$0xff] }
 0x527   :  { %5667 = vmatpush3.bf16.msra.mxu0 %v5666_v31  ;;  %5699 = vmatpush3.bf16.msra.mxu1 %v5698_v6  ;;  %v3468_v31 = vrot.slane %v3463_v59, %v6500_v43  ;;  %v3472_v6 = vrot.slane %v3463_v59, %v6508_v46  ;;  %v3852_v3 = vadd.f32 %v3848_v11, %v3812_v8  ;;  %v3966_v8 = vld [vmem:[#allocation22 + $0xa8] sm:$0xff]  ;;  %v3997_v11 = vld [vmem:[#allocation22 + $0x1a0] sm:$0xff] }
 0x528   :  { %5669 = vmatprep.subr.bf16.mxu0 %v5668_v48  ;;  %5701 = vmatprep.subr.bf16.mxu1 %v5700_v18  ;;  %v3889_v48 = vmul.f32 %v3876_v54, %v6548_v5  ;;  %v3931_v9 = vadd.f32 %v3924_v17, %v3891_v36  ;;  %v3963_v54 = vld [vmem:[#allocation22 + $0x90] sm:$0xff]  ;;  %v2468_v36 = vmax.f32 %v6875_v2, 0.0  ;;  %v5710_v17 = vpack.c.bf16 %v3948_v1, %v3947_v62  ;;  %v3988_v62 = vld [vmem:[#allocation22 + $0x158] sm:$0xff]  ;;  %v3973_v1 = vld [vmem:[#allocation22 + $0xe0] sm:$0xff] }
 0x52a   :  { %v3929_v24 = vadd.f32 %v3916_v10, %v3889_v48  ;;  %v3998_v48 = vld [vmem:[#allocation22 + $0x1a8] sm:$0xff]  ;;  %v2466_v10 = vmax.f32 %v6873_v42, 0.0  ;;  %v4000_v42 = vld [vmem:[#allocation22 + $0x1b8] sm:$0xff] }
 0x52b   :  { %5671 = vmatpush3.bf16.msra.mxu0 %v5670_v20  ;;  %5703 = vmatpush3.bf16.msra.mxu1 %v5702_v0  ;;  %v3890_v20 = vmul.f32 %v3880_v60, %v6548_v5  ;;  %v3928_v0 = vrot.slane %v3908_v57, %v6511_v47  ;;  %v5738_v60 = vpack.c.bf16 %v3978_v39, %v3977_v52  ;;  %v3986_v52 = vld [vmem:[#allocation22 + $0x148] sm:$0xff]  ;;  %v3971_v39 = vld [vmem:[#allocation22 + $0xd0] sm:$0xff] }
 0x52c   :  { %5705 = vmatprep.subr.bf16.mxu0 %v5704_v56  ;;  %5737 = vmatprep.subr.bf16.mxu1 %v5736_v27  ;;  %v3851_v56 = vadd.f32 %v3844_v55, %v3811_v53  ;;  %v3996_v53 = vld [vmem:[#allocation22 + $0x198] sm:$0xff] }
 0x52d   :  { %v3930_v51 = vadd.f32 %v3920_v19, %v3890_v20  ;;  %v3932_v34 = vadd.f32 %v3928_v0, %v3892_v21  ;;  %v3950_v20 = vld [vmem:[#allocation22 + $0x28] sm:$0xff]  ;;  %v5712_v19 = vpack.c.bf16 %v3966_v8, %v3965_v35  ;;  %v5744_v21 = vpack.c.bf16 %v3998_v48, %v3997_v11  ;;  %v3981_v0 = vld [vmem:[#allocation22 + $0x120] sm:$0xff] }
 0x52e   :  { %v3989_v48 = vld [vmem:[#allocation22 + $0x160] sm:$0xff] }
 0x5e1   :  { %v3622_v4 = vpop.f32.mrb[10].mxu0  ;;  %v3764_v18 = vpop.f32.mrb[10].mxu1 }
 0x5e2   :  { %v5780_v22 = vadd.f32 %v3622_v4, %v3468_v31  ;;  %v5782_v26 = vadd.f32 %v3764_v18, %v3476_v61  ;;  %v3624_v23 = vpop.f32.mrb[11].mxu0  ;;  %v3766_v27 = vpop.f32.mrb[11].mxu1  ;;  %v3979_v61 = vld [vmem:[#allocation22 + $0x110] sm:$0xff]  ;;  %v3949_v18 = vld [vmem:[#allocation22 + $0x20] sm:$0xff] }
 0x5e3   :  { %v5781_v25 = vadd.f32 %v3624_v23, %v3472_v6  ;;  %v5783_v29 = vadd.f32 %v3766_v27, %v3480_v7  ;;  %v5708_v6 = vpack.c.bf16 %v3964_v50, %v3963_v54  ;;  %v5740_v7 = vpack.c.bf16 %v3996_v53, %v3995_v63  ;;  %v3951_v27 = vld [vmem:[#allocation22 + $0x30] sm:$0xff]  ;;  %v4004_v54 = vld [vmem:[#allocation22 + $0x1d8] sm:$0xff] }
 0x5e4   :  { %v3933_v28 = vmul.f32 %v5780_v22, %v3849_v12  ;;  %v3935_v15 = vmul.f32 %v5782_v26, %v3851_v56  ;;  %v5742_v4 = vpack.c.bf16 %v3980_v30, %v3979_v61  ;;  %v3982_v22 = vld [vmem:[#allocation22 + $0x128] sm:$0xff]  ;;  %v3967_v12 = vld [vmem:[#allocation22 + $0xb0] sm:$0xff]  ;;  %v3968_v26 = vld [vmem:[#allocation22 + $0xb8] sm:$0xff]  ;;  %v5714_v2 = vpack.c.bf16 %v3950_v20, %v3949_v18 }
 0x5e5   :  { %v3934_v32 = vmul.f32 %v5781_v25, %v3850_v13  ;;  %v3936_v33 = vmul.f32 %v5783_v29, %v3852_v3  ;;  %v3999_v56 = vld [vmem:[#allocation22 + $0x1b0] sm:$0xff]  ;;  %v5746_v23 = vpack.c.bf16 %v3982_v22, %v3981_v0  ;;  %v3952_v25 = vld [vmem:[#allocation22 + $0x38] sm:$0xff]  ;;  %v5716_v13 = vpack.c.bf16 %v3968_v26, %v3967_v12  ;;  %v4006_v61 = vld [vmem:[#allocation22 + $0x1e8] sm:$0xff] }
 0x5e6   :  { %v3937_v45 = vadd.f32 %v3933_v28, %v3929_v24  ;;  %v3939_v49 = vadd.f32 %v3935_v15, %v3931_v9  ;;  %v5748_v29 = vpack.c.bf16 %v4000_v42, %v3999_v56  ;;  %v3983_v3 = vld [vmem:[#allocation22 + $0x130] sm:$0xff]  ;;  %v3984_v24 = vld [vmem:[#allocation22 + $0x138] sm:$0xff]  ;;  %v3969_v28 = vld [vmem:[#allocation22 + $0xc0] sm:$0xff]  ;;  %v5754_v63 = vpack.c.bf16 %v3986_v52, %v3985_v41 }
 0x5e7   :  { %v3938_v59 = vadd.f32 %v3934_v32, %v3930_v51  ;;  %v3940_v38 = vadd.f32 %v3936_v33, %v3932_v34  ;;  %v3970_v9 = vld [vmem:[#allocation22 + $0xc8] sm:$0xff]  ;;  %v4001_v15 = vld [vmem:[#allocation22 + $0x1c0] sm:$0xff]  ;;  %v5718_v33 = vpack.c.bf16 %v3952_v25, %v3951_v27  ;;  %v5750_v51 = vpack.c.bf16 %v3984_v24, %v3983_v3  ;;  %v3955_v53 = vld [vmem:[#allocation22 + $0x50] sm:$0xff] }
 0x5e8   :  { %v3941_v57 = vmax.f32 %v3937_v45, 0.0  ;;  %v3943_v31 = vmax.f32 %v3939_v49, 0.0  ;;  %v4002_v32 = vld [vmem:[#allocation22 + $0x1c8] sm:$0xff]  ;;  %v3953_v34 = vld [vmem:[#allocation22 + $0x40] sm:$0xff]  ;;  %v5720_v45 = vpack.c.bf16 %v3970_v9, %v3969_v28  ;;  %v4008_v18 = vld [vmem:[#allocation22 + $0x1f8] sm:$0xff]  ;;  %v2467_v27 = vmax.f32 %v6871_v40, 0.0 }
 0x5e9   :  { %v3942_v55 = vmax.f32 %v3938_v59, 0.0  ;;  %v3944_v58 = vmax.f32 %v3940_v38, 0.0  ;;  %v5752_v49 = vpack.c.bf16 %v4002_v32, %v4001_v15  ;;  %v3972_v59 = vld [vmem:[#allocation22 + $0xd8] sm:$0xff]  ;;  %v4003_v38 = vld [vmem:[#allocation22 + $0x1d0] sm:$0xff]  ;;  %v5722_v50 = vpack.c.bf16 %v3954_v37, %v3953_v34  ;;  %v4361_v15 = vld [vmem:[%s7037_s27] sm:$0xf] }
 0x5ea   :  { %v3960_v12 = vld [vmem:[#allocation22 + $0x78] sm:$0xff]  ;;  %v3991_v26 = vld [vmem:[#allocation22 + $0x170] sm:$0xff]  ;;  %v4370_v52 = vrot.slane %v4361_v15, %v6508_v46 }
 0x5eb   :  { %4137 = vmatprep.mubr.f32.mxu0 %v3942_v55  ;;  %4207 = vmatprep.mubr.f32.mxu1 %v3944_v58  ;;  %v3956_v55 = vld [vmem:[#allocation22 + $0x58] sm:$0xff]  ;;  %v5724_v58 = vpack.c.bf16 %v3972_v59, %v3971_v39  ;;  %v4411_v39 = vld [vmem:[%s7038_s20] ss:$0 sm:$0xff] }
 0x5ec   :  { %4138 = vmatmul.mubr.f32.vlgmr.msra.gmra.mrb[12].mxu0 %v3941_v57  ;;  %4208 = vmatmul.mubr.f32.vlgmr.msra.gmra.mrb[12].mxu1 %v3943_v31  ;;  %v3974_v57 = vld [vmem:[#allocation22 + $0xe8] sm:$0xff]  ;;  %v4005_v31 = vld [vmem:[#allocation22 + $0x1e0] sm:$0xff]  ;;  %v5726_v30 = vpack.c.bf16 %v3956_v55, %v3955_v53  ;;  %v3992_v56 = vld [vmem:[#allocation22 + $0x178] sm:$0xff] }
 0x5ed   :  { %5707 = vmatpush3.bf16.msra.mxu0 %v5706_v14  ;;  %5739 = vmatpush3.bf16.msra.mxu1 %v5738_v60  ;;  %v5756_v14 = vpack.c.bf16 %v4004_v54, %v4003_v38  ;;  %v3987_v60 = vld [vmem:[#allocation22 + $0x150] sm:$0xff]  ;;  %v5728_v8 = vpack.c.bf16 %v3974_v57, %v3973_v1  ;;  %v5760_v11 = vpack.c.bf16 %v4006_v61, %v4005_v31 }
 0x5ee   :  { %4277 = vmatprep.mubr.f32.mxu0 %v2466_v10  ;;  %4347 = vmatprep.mubr.f32.mxu1 %v2468_v36  ;;  %v5758_v35 = vpack.c.bf16 %v3988_v62, %v3987_v60  ;;  %v3990_v10 = vld [vmem:[#allocation22 + $0x168] sm:$0xff]  ;;  %v3975_v36 = vld [vmem:[#allocation22 + $0xf0] sm:$0xff] }
 0x5ef   :  { %5709 = vmatprep.subr.bf16.mxu0 %v5708_v6  ;;  %5741 = vmatprep.subr.bf16.mxu1 %v5740_v7  ;;  %v3957_v6 = vld [vmem:[#allocation22 + $0x60] sm:$0xff]  ;;  %v3958_v7 = vld [vmem:[#allocation22 + $0x68] sm:$0xff] }
 0x5f0   :  { %v5730_v20 = vpack.c.bf16 %v3958_v7, %v3957_v6 }
 0x5f1   :  { %5711 = vmatpush3.bf16.msra.mxu0 %v5710_v17  ;;  %5743 = vmatpush3.bf16.msra.mxu1 %v5742_v4  ;;  %v3976_v17 = vld [vmem:[#allocation22 + $0xf8] sm:$0xff]  ;;  %v4007_v4 = vld [vmem:[#allocation22 + $0x1f0] sm:$0xff] }
 0x5f2   :  { %5713 = vmatprep.subr.bf16.mxu0 %v5712_v19  ;;  %5745 = vmatprep.subr.bf16.mxu1 %v5744_v21  ;;  %v5762_v19 = vpack.c.bf16 %v3990_v10, %v3989_v48  ;;  %v3959_v21 = vld [vmem:[#allocation22 + $0x70] sm:$0xff]  ;;  %v5732_v0 = vpack.c.bf16 %v3976_v17, %v3975_v36  ;;  %v5764_v22 = vpack.c.bf16 %v4008_v18, %v4007_v4 }
 0x5f3   :  { %v5734_v42 = vpack.c.bf16 %v3960_v12, %v3959_v21 }
 0x5f5   :  { %5715 = vmatpush3.bf16.msra.mxu0 %v5714_v2  ;;  %5747 = vmatpush3.bf16.msra.mxu1 %v5746_v23  ;;  %v5766_v2 = vpack.c.bf16 %v3992_v56, %v3991_v26  ;;  %v2465_v23 = vmax.f32 %v6869_v16, 0.0 }
 0x5f6   :  { %5717 = vmatprep.subr.bf16.mxu0 %v5716_v13  ;;  %5749 = vmatprep.subr.bf16.mxu1 %v5748_v29 }
 0x5f9   :  { %5719 = vmatpush3.bf16.msra.mxu0 %v5718_v33  ;;  %5751 = vmatpush3.bf16.msra.mxu1 %v5750_v51  ;;  %v4365_v51 = vrot.slane %v4361_v15, %v6500_v43  ;;  %v4380_v43 = vrot.slane %v4361_v15, %v6511_v47 }
 0x5fa   :  { %5721 = vmatprep.subr.bf16.mxu0 %v5720_v45  ;;  %5753 = vmatprep.subr.bf16.mxu1 %v5752_v49  ;;  %v4375_v45 = vrot.slane %v4361_v15, %v6503_v44 }
 0x5fb   :  { %v4366_v41 = vmul.f32 %v4365_v51, %v6548_v5 }
 0x5fc   :  { %v4376_v38 = vmul.f32 %v4375_v45, %v6548_v5 }
 0x5fd   :  { %5723 = vmatpush3.bf16.msra.mxu0 %v5722_v50  ;;  %5755 = vmatpush3.bf16.msra.mxu1 %v5754_v63  ;;  %v4371_v50 = vadd.f32 %v4370_v52, %v4366_v41 }
 0x5fe   :  { %5725 = vmatprep.subr.bf16.mxu0 %v5724_v58  ;;  %5757 = vmatprep.subr.bf16.mxu1 %v5756_v14  ;;  %v4381_v63 = vadd.f32 %v4380_v43, %v4376_v38 }
 0x601   :  { %5727 = vmatpush3.bf16.msra.mxu0 %v5726_v30  ;;  %5759 = vmatpush3.bf16.msra.mxu1 %v5758_v35 }
 0x602   :  { %5729 = vmatprep.subr.bf16.mxu0 %v5728_v8  ;;  %5761 = vmatprep.subr.bf16.mxu1 %v5760_v11 }
 0x605   :  { %5731 = vmatpush3.bf16.msra.mxu0 %v5730_v20  ;;  %5763 = vmatpush3.bf16.msra.mxu1 %v5762_v19 }
 0x606   :  { %5733 = vmatprep.subr.bf16.mxu0 %v5732_v0  ;;  %5765 = vmatprep.subr.bf16.mxu1 %v5764_v22 }
 0x609   :  { %5735 = vmatpush3.bf16.msra.mxu0 %v5734_v42  ;;  %5767 = vmatpush3.bf16.msra.mxu1 %v5766_v2 }
 0x60c   :  { %4278 = vmatmul.mubr.f32.vlgmr.msra.gmra.mrb[14].mxu0 %v2465_v23  ;;  %4348 = vmatmul.mubr.f32.vlgmr.msra.gmra.mrb[14].mxu1 %v2467_v27 }
 0x6bf   :  { %v4444_v25 = vpop.f32.mrb[12].mxu0  ;;  %v4479_v13 = vpop.f32.mrb[12].mxu1 }
 0x6c0   :  { %v4445_v29 = vpop.f32.mrb[13].mxu0  ;;  %v4480_v3 = vpop.f32.mrb[13].mxu1 }
 0x6c1   :  { %v4446_v24 = vadd.f32 %v4445_v29, %v4444_v25  ;;  %v4481_v28 = vadd.f32 %v4480_v3, %v4479_v13 }
 0x6c3   :  { %v4210_v9 = vadd.f32 %v4481_v28, %v4446_v24 }
 0x6df   :  { %v4514_v32 = vpop.f32.mrb[14].mxu0  ;;  %v4549_v33 = vpop.f32.mrb[14].mxu1 }
 0x6e0   :  { %v4515_v16 = vpop.f32.mrb[15].mxu0  ;;  %v4550_v34 = vpop.f32.mrb[15].mxu1 }
 0x6e1   :  { %v4516_v40 = vadd.f32 %v4515_v16, %v4514_v32  ;;  %v4551_v37 = vadd.f32 %v4550_v34, %v4549_v33 }
 0x6e3   :  { %v4280_v49 = vadd.f32 %v4516_v40, %v4210_v9 }
 0x6e5   :  { %v4350_v59 = vadd.f32 %v4551_v37, %v4280_v49 }
 0x6e7   :  { %v4360_v54 = vadd.f32 %v4411_v39, %v4350_v59 }
 0x6e9   :  { %v4382_v44 = vmul.f32 %v4371_v50, %v4360_v54 }
 0x6eb   :  { %v4383_v53 = vadd.f32 %v4382_v44, %v4381_v63 }
 0x6ed   :  { %4384 = vst [vmem:[#allocation25] sm:$0xff] %v4383_v53 }
 0x6ee   :  { %6145 = shalt.err (!%p6142_p4)
}
 0x6ef   :  { %s7039_s5 = sld [smem:[#allocation42_spill]] }
 0x6f5   :  { %s6146_s10 = scalar_lea.hbm %s7039_s5, 128 }
 0x6f6   :  { %p6147_p5 = scmp.ne.s32.totalorder %s7039_s5, %s6146_s10  ;;  %p6150_p6 = scmp.lt.u32.totalorder %s6146_s10, %s7039_s5 }
 0x6f8   :  { %p6152_p7 = pnand %p6150_p6, %p6147_p5 }
 0x6fa   :  { %6155 = shalt.err (!%p6152_p7)
}
 0x6fb   :  { %4394 = dma.vmem_to_hbm [thread:$0]  %s4392_s13, 128, %s7039_s5, [#allocation4]  }
 0x6fc   :  { %6172 = dma.done.wait [#allocation4], 128  }
 0x6fd   :  { %6173 = vsyncadd [#allocation4], 4294967168 }
 0x6fe   :  { %4398 = vsyncpa [#allocation3], 1 }
 0x6ff   :  { %4399 = vsyncpa [#allocation6], 1 }
 0x700   :  { %4400 = vsyncpa [#allocation9], 1 }
 0x701   :  { %4401 = vsyncpa [#allocation12], 1 }
 0x702   :  { %4402 = vsyncpa [#allocation15], 1 }
 0x703   :  { %4403 = vsyncpa [#allocation18], 1 }
 0x704   :  { %4404 = vsyncpa [#allocation21], 1 }
 0x705   :  { %4405 = vsyncpa [#allocation24], 1 }
 0x706   :  { %4406 = vsyncpa [#allocation4], 1 }

</bundles_post_ra>
